<compile_context>
chip_gen: v7x
topology: tpu7x:2x2x1
jax: 0.10.0
libtpu: 0.0.40
codegen_flags: <defaults>
</compile_context>

<pallas_src>
import functools

import jax
import jax.numpy as jnp
from jax.experimental import pallas as pl
from jax.experimental.pallas import tpu as pltpu

L1 = 200          # true width of the two first-layer linears
L2 = 300          # true width of the second layer / LayerNorm
L1P = 256         # padded to a lane multiple
L2P = 384         # padded to a lane multiple
LN_EPS = 1e-6     # ERL LayerNorm eps (added to std)


def _elu(x):
    # Clamp the dead branch so exp never sees large positive arguments
    # (avoids inf in the unselected branch / NaN under autodiff).
    return jnp.where(x > 0, x, jnp.exp(jnp.minimum(x, 0.0)) - 1.0)


def _round_up(x, m):
    return (x + m - 1) // m * m


def critic_kernel(
    s_ref, a_ref,                  # (bB, S) f32, (bB, A) f32 batch tiles
    ws_ref, bs_ref,                # (S, L1P) bf16, (1, L1P) f32
    wa_ref, ba_ref,                # (A, L1P) bf16, (1, L1P) f32
    w2s_ref, w2a_ref, b2_ref,      # (L1P, L2P) bf16 x2, (1, L2P) f32
    g_ref, beta_ref,               # (1, L2P) f32 (zero in padded cols)
    wo_ref,                        # (1, L2P) f32 head weights (zero in padded cols)
    bo_ref,                        # (1, 1) f32 head bias in SMEM
    out_ref,                       # (1, bB) f32 -- batch on lanes (unmasked stores)
):
    # ---- layer 1: two parallel linears + ELU (bf16 MXU, f32 accumulate) -------
    hs = _elu(
        jnp.dot(s_ref[...].astype(jnp.bfloat16), ws_ref[...],
                preferred_element_type=jnp.float32) + bs_ref[...])
    ha = _elu(
        jnp.dot(a_ref[...].astype(jnp.bfloat16), wa_ref[...],
                preferred_element_type=jnp.float32) + ba_ref[...])

    # ---- layer 2: concat([hs, ha]) @ W2 == hs @ W2_top + ha @ W2_bot ----------
    z = (jnp.dot(hs.astype(jnp.bfloat16), w2s_ref[...],
                 preferred_element_type=jnp.float32)
         + jnp.dot(ha.astype(jnp.bfloat16), w2a_ref[...],
                   preferred_element_type=jnp.float32)
         + b2_ref[...])
    # Padded columns of z are exactly zero (zero-padded weights & biases).

    # ---- ERL LayerNorm over the true 300 features (unbiased std, eps on std) --
    col = jax.lax.broadcasted_iota(jnp.int32, z.shape, dimension=1)
    valid = col < L2
    mean = jnp.sum(z, axis=-1, keepdims=True) * (1.0 / L2)       # padded cols are 0
    d = jnp.where(valid, z - mean, 0.0)                          # mask padded cols
    var = jnp.sum(d * d, axis=-1, keepdims=True) * (1.0 / (L2 - 1))
    inv = pl.reciprocal(jnp.sqrt(var) + LN_EPS, approx=True)     # EUP, ~free
    zn = g_ref[...] * d * inv + beta_ref[...]                    # padded cols stay 0

    # ---- ELU + output head as a lane reduction (no N=1 MXU pass) --------------
    h = _elu(zn)
    q = jnp.sum(h * wo_ref[...], axis=-1) + bo_ref[0, 0]         # (bB,)
    out_ref[0, :] = q


def critic_forward(state, action, dev_params, *, block_b=512):
    """state: (B, state_dim), action: (B, action_dim) -> (B, 1) float32."""
    B, S = state.shape
    A = action.shape[1]

    bB = _round_up(min(block_b, _round_up(B, 128)), 128)   # batch tile (lane mult.)
    B_pad = _round_up(B, bB)
    G = B_pad // bB
    pad = B_pad - B

    state_p = jnp.pad(state.astype(jnp.float32), ((0, pad), (0, 0)))
    action_p = jnp.pad(action.astype(jnp.float32), ((0, pad), (0, 0)))

    def const(shape):
        # Weights/biases: same block every grid step -> fetched once, VMEM-resident.
        return pl.BlockSpec(shape, lambda i: (0, 0))

    in_specs = [
        pl.BlockSpec((bB, S), lambda i: (i, 0)),                 # state tile
        pl.BlockSpec((bB, A), lambda i: (i, 0)),                 # action tile
        const((S, L1P)), const((1, L1P)),                        # ws, bs
        const((A, L1P)), const((1, L1P)),                        # wa, ba
        const((L1P, L2P)), const((L1P, L2P)), const((1, L2P)),   # w2s, w2a, b2
        const((1, L2P)), const((1, L2P)),                        # gamma, beta
        const((1, L2P)),                                         # wo (row)
        pl.BlockSpec(memory_space=pltpu.MemorySpace.SMEM),       # bo scalar
    ]
    out_specs = pl.BlockSpec((1, bB), lambda i: (0, i))          # lane-dense output

    out = pl.pallas_call(
        critic_kernel,
        grid=(G,),
        out_shape=jax.ShapeDtypeStruct((1, B_pad), jnp.float32),
        in_specs=in_specs,
        out_specs=out_specs,
        compiler_params=pltpu.CompilerParams(
            dimension_semantics=("parallel",),      # 2 TCs on v7x; no-op on v5e/v6e
            vmem_limit_bytes=32 * 1024 * 1024,
        ),
    )(state_p, action_p,
      dev_params["ws"], dev_params["bs"],
      dev_params["wa"], dev_params["ba"],
      dev_params["w2s"], dev_params["w2a"], dev_params["b2"],
      dev_params["gamma"], dev_params["beta"],
      dev_params["wo_row"], dev_params["bo"])

    return out[0, :B].reshape(B, 1)


# ----------------------------- parameters -----------------------------------

def init_params(key, state_dim, action_dim):
    """PyTorch-style init: U(-1/sqrt(fan_in), +1/sqrt(fan_in)), true shapes."""
    def linear(key, fan_in, fan_out):
        kw, kb = jax.random.split(key)
        bound = 1.0 / jnp.sqrt(jnp.float32(fan_in))
        w = jax.random.uniform(kw, (fan_in, fan_out), jnp.float32, -bound, bound)
        b = jax.random.uniform(kb, (fan_out,), jnp.float32, -bound, bound)
        return w, b

    k1, k2, k3, k4 = jax.random.split(key, 4)
    ws, bs = linear(k1, state_dim, L1)
    wa, ba = linear(k2, action_dim, L1)
    w2, b2 = linear(k3, 2 * L1, L2)
    wo, bo = linear(k4, L2, 1)
    return {
        "ws": ws, "bs": bs, "wa": wa, "ba": ba,
        "w2": w2, "b2": b2,
        "gamma": jnp.ones((L2,), jnp.float32),
        "beta": jnp.zeros((L2,), jnp.float32),
        "wo": wo * 0.1,    # self.w_out.weight.data.mul_(0.1)
        "bo": bo * 0.1,    # self.w_out.bias.data.mul_(0.1)
    }


def prepare_params(p):
    """Pad features to lane multiples (200->256, 300->384), split the concat
    weight, cast matmul weights to bf16. Padded rows/cols are zero, so padded
    lanes carry exact zeros through the whole network."""
    def pad2(w, r, c):
        return jnp.pad(w, ((0, r - w.shape[0]), (0, c - w.shape[1])))

    def pad_row(v, c):
        v = v.reshape(1, -1)
        return jnp.pad(v, ((0, 0), (0, c - v.shape[1]))).astype(jnp.float32)

    return {
        "ws": pad2(p["ws"], p["ws"].shape[0], L1P).astype(jnp.bfloat16),
        "bs": pad_row(p["bs"], L1P),
        "wa": pad2(p["wa"], p["wa"].shape[0], L1P).astype(jnp.bfloat16),
        "ba": pad_row(p["ba"], L1P),
        "w2s": pad2(p["w2"][:L1, :], L1P, L2P).astype(jnp.bfloat16),
        "w2a": pad2(p["w2"][L1:, :], L1P, L2P).astype(jnp.bfloat16),
        "b2": pad_row(p["b2"], L2P),
        "gamma": pad_row(p["gamma"], L2P),
        "beta": pad_row(p["beta"], L2P),
        "wo_row": pad_row(p["wo"].reshape(-1), L2P),   # head weights kept f32
        "bo": p["bo"].reshape(1, 1).astype(jnp.float32),
    }


# ----------------------------- references -----------------------------------

def critic_reference_f32(state, action, p):
    """Pure-f32 reference with the exact semantics of the PyTorch module."""
    hs = jax.nn.elu(state @ p["ws"] + p["bs"])
    ha = jax.nn.elu(action @ p["wa"] + p["ba"])
    z = jnp.concatenate([hs, ha], axis=1) @ p["w2"] + p["b2"]
    mean = z.mean(-1, keepdims=True)
    d = z - mean
    std = jnp.sqrt((d * d).sum(-1, keepdims=True) / (z.shape[-1] - 1))
    zn = p["gamma"] * d / (std + LN_EPS) + p["beta"]
    return jax.nn.elu(zn) @ p["wo"] + p["bo"]


def critic_reference_matched(state, action, dp):
    """Reference that mirrors the kernel's bf16 matmul precision."""
    dot = functools.partial(jnp.dot, preferred_element_type=jnp.float32)
    hs = _elu(dot(state.astype(jnp.bfloat16), dp["ws"]) + dp["bs"])
    ha = _elu(dot(action.astype(jnp.bfloat16), dp["wa"]) + dp["ba"])
    z = (dot(hs.astype(jnp.bfloat16), dp["w2s"])
         + dot(ha.astype(jnp.bfloat16), dp["w2a"]) + dp["b2"])[:, :L2]
    mean = jnp.sum(z, -1, keepdims=True) / L2
    d = z - mean
    std = jnp.sqrt(jnp.sum(d * d, -1, keepdims=True) / (L2 - 1))
    zn = dp["gamma"][:, :L2] * d / (std + LN_EPS) + dp["beta"][:, :L2]
    h = _elu(zn)
    return jnp.sum(h * dp["wo_row"][:, :L2], axis=-1, keepdims=True) + dp["bo"][0, 0]


if __name__ == "__main__":
    key = jax.random.PRNGKey(0)
    k_p, k_s, k_a = jax.random.split(key, 3)

    batch, state_dim, action_dim = 8, 16, 8

    params = init_params(k_p, state_dim, action_dim)
    dev_params = prepare_params(params)

    state = jax.random.normal(k_s, (batch, state_dim), jnp.float32)
    action = jax.random.normal(k_a, (batch, action_dim), jnp.float32)

    out = critic_forward(state, action, dev_params)
    out = jax.block_until_ready(out)
    assert out.shape == (batch, 1), out.shape

    ref_matched = critic_reference_matched(state, action, dev_params)
    ref_f32 = critic_reference_f32(state, action, params)

    # Tight check vs. a reference with matching (bf16-matmul) precision.
    assert jnp.allclose(out, ref_matched, atol=5e-3, rtol=5e-3), (out, ref_matched)
    # Loose check vs. the pure-f32 module semantics (bf16 weights perturb low bits).
    assert jnp.allclose(out, ref_f32, atol=2e-2, rtol=5e-2), (out, ref_f32)

    print("KERNEL_OK")
</pallas_src>

<mosaic_0001>
module attributes {stable_mosaic.version = 11 : i64} {
  func.func @critic_kernel(%arg0: i32, %arg1: memref<128x16xf32, #tpu.memory_space<vmem>>, %arg2: memref<128x8xf32, #tpu.memory_space<vmem>>, %arg3: memref<16x256xbf16, #tpu.memory_space<vmem>>, %arg4: memref<1x256xf32, #tpu.memory_space<vmem>>, %arg5: memref<8x256xbf16, #tpu.memory_space<vmem>>, %arg6: memref<1x256xf32, #tpu.memory_space<vmem>>, %arg7: memref<256x384xbf16, #tpu.memory_space<vmem>>, %arg8: memref<256x384xbf16, #tpu.memory_space<vmem>>, %arg9: memref<1x384xf32, #tpu.memory_space<vmem>>, %arg10: memref<1x384xf32, #tpu.memory_space<vmem>>, %arg11: memref<1x384xf32, #tpu.memory_space<vmem>>, %arg12: memref<1x384xf32, #tpu.memory_space<vmem>>, %arg13: memref<1x1xf32, #tpu.memory_space<smem>>, %arg14: memref<1x128xf32, #tpu.memory_space<vmem>>) attributes {dimension_semantics = [#tpu.dimension_semantics<parallel>], iteration_bounds = array<i64: 1>, scalar_prefetch = 0 : i64, scratch_operands = 0 : i64, tpu.core_type = #tpu.core_type<tc>, window_params = [{transform_indices = @transform_0, window_bounds = array<i64: 128, 16>}, {transform_indices = @transform_1, window_bounds = array<i64: 128, 8>}, {pipeline_mode = #tpu.pipeline_mode<synchronous>, transform_indices = @transform_2, window_bounds = array<i64: 16, 256>}, {pipeline_mode = #tpu.pipeline_mode<synchronous>, transform_indices = @transform_3, window_bounds = array<i64: 1, 256>}, {pipeline_mode = #tpu.pipeline_mode<synchronous>, transform_indices = @transform_4, window_bounds = array<i64: 8, 256>}, {pipeline_mode = #tpu.pipeline_mode<synchronous>, transform_indices = @transform_5, window_bounds = array<i64: 1, 256>}, {pipeline_mode = #tpu.pipeline_mode<synchronous>, transform_indices = @transform_6, window_bounds = array<i64: 256, 384>}, {pipeline_mode = #tpu.pipeline_mode<synchronous>, transform_indices = @transform_7, window_bounds = array<i64: 256, 384>}, {pipeline_mode = #tpu.pipeline_mode<synchronous>, transform_indices = @transform_8, window_bounds = array<i64: 1, 384>}, {pipeline_mode = #tpu.pipeline_mode<synchronous>, transform_indices = @transform_9, window_bounds = array<i64: 1, 384>}, {pipeline_mode = #tpu.pipeline_mode<synchronous>, transform_indices = @transform_10, window_bounds = array<i64: 1, 384>}, {pipeline_mode = #tpu.pipeline_mode<synchronous>, transform_indices = @transform_11, window_bounds = array<i64: 1, 384>}, {transform_indices = @transform_12, window_bounds = array<i64: 1, 1>}, {transform_indices = @transform_13, window_bounds = array<i64: 1, 128>}]} {
    %c0 = arith.constant 0 : index
    %c0_0 = arith.constant 0 : index
    %0 = vector.load %arg1[%c0, %c0_0] : memref<128x16xf32, #tpu.memory_space<vmem>>, vector<128x16xf32>
    %1 = arith.truncf %0 : vector<128x16xf32> to vector<128x16xbf16>
    %c0_1 = arith.constant 0 : index
    %c0_2 = arith.constant 0 : index
    %2 = vector.load %arg3[%c0_1, %c0_2] : memref<16x256xbf16, #tpu.memory_space<vmem>>, vector<16x256xbf16>
    %cst = arith.constant dense<0.000000e+00> : vector<128x256xf32>
    %3 = tpu.matmul %1, %2, %cst {dimension_numbers = #tpu.dot_dimension_numbers<[1], [0], [0], [1], [0, 0, 1, 1], [], []>} : vector<128x16xbf16>, vector<16x256xbf16>, vector<128x256xf32> -> vector<128x256xf32>
    %c0_3 = arith.constant 0 : index
    %c0_4 = arith.constant 0 : index
    %4 = vector.load %arg4[%c0_3, %c0_4] : memref<1x256xf32, #tpu.memory_space<vmem>>, vector<1x256xf32>
    %5 = vector.broadcast %4 : vector<1x256xf32> to vector<128x256xf32>
    %6 = arith.addf %3, %5 : vector<128x256xf32>
    %cst_5 = arith.constant 0.000000e+00 : f32
    %7 = vector.broadcast %cst_5 : f32 to vector<128x256xf32>
    %8 = arith.cmpf ogt, %6, %7 : vector<128x256xf32>
    %cst_6 = arith.constant 0.000000e+00 : f32
    %9 = vector.broadcast %cst_6 : f32 to vector<128x256xf32>
    %10 = arith.minimumf %6, %9 : vector<128x256xf32>
    %11 = math.exp %10 : vector<128x256xf32>
    %cst_7 = arith.constant 1.000000e+00 : f32
    %12 = vector.broadcast %cst_7 : f32 to vector<128x256xf32>
    %13 = arith.subf %11, %12 : vector<128x256xf32>
    %14 = arith.select %8, %6, %13 : vector<128x256xi1>, vector<128x256xf32>
    %c0_8 = arith.constant 0 : index
    %c0_9 = arith.constant 0 : index
    %15 = vector.load %arg2[%c0_8, %c0_9] : memref<128x8xf32, #tpu.memory_space<vmem>>, vector<128x8xf32>
    %16 = arith.truncf %15 : vector<128x8xf32> to vector<128x8xbf16>
    %c0_10 = arith.constant 0 : index
    %c0_11 = arith.constant 0 : index
    %17 = vector.load %arg5[%c0_10, %c0_11] : memref<8x256xbf16, #tpu.memory_space<vmem>>, vector<8x256xbf16>
    %cst_12 = arith.constant dense<0.000000e+00> : vector<128x256xf32>
    %18 = tpu.matmul %16, %17, %cst_12 {dimension_numbers = #tpu.dot_dimension_numbers<[1], [0], [0], [1], [0, 0, 1, 1], [], []>} : vector<128x8xbf16>, vector<8x256xbf16>, vector<128x256xf32> -> vector<128x256xf32>
    %c0_13 = arith.constant 0 : index
    %c0_14 = arith.constant 0 : index
    %19 = vector.load %arg6[%c0_13, %c0_14] : memref<1x256xf32, #tpu.memory_space<vmem>>, vector<1x256xf32>
    %20 = vector.broadcast %19 : vector<1x256xf32> to vector<128x256xf32>
    %21 = arith.addf %18, %20 : vector<128x256xf32>
    %cst_15 = arith.constant 0.000000e+00 : f32
    %22 = vector.broadcast %cst_15 : f32 to vector<128x256xf32>
    %23 = arith.cmpf ogt, %21, %22 : vector<128x256xf32>
    %cst_16 = arith.constant 0.000000e+00 : f32
    %24 = vector.broadcast %cst_16 : f32 to vector<128x256xf32>
    %25 = arith.minimumf %21, %24 : vector<128x256xf32>
    %26 = math.exp %25 : vector<128x256xf32>
    %cst_17 = arith.constant 1.000000e+00 : f32
    %27 = vector.broadcast %cst_17 : f32 to vector<128x256xf32>
    %28 = arith.subf %26, %27 : vector<128x256xf32>
    %29 = arith.select %23, %21, %28 : vector<128x256xi1>, vector<128x256xf32>
    %30 = arith.truncf %14 : vector<128x256xf32> to vector<128x256xbf16>
    %c0_18 = arith.constant 0 : index
    %c0_19 = arith.constant 0 : index
    %31 = vector.load %arg7[%c0_18, %c0_19] : memref<256x384xbf16, #tpu.memory_space<vmem>>, vector<256x384xbf16>
    %cst_20 = arith.constant dense<0.000000e+00> : vector<128x384xf32>
    %32 = tpu.matmul %30, %31, %cst_20 {dimension_numbers = #tpu.dot_dimension_numbers<[1], [0], [0], [1], [0, 0, 1, 1], [], []>} : vector<128x256xbf16>, vector<256x384xbf16>, vector<128x384xf32> -> vector<128x384xf32>
    %33 = arith.truncf %29 : vector<128x256xf32> to vector<128x256xbf16>
    %c0_21 = arith.constant 0 : index
    %c0_22 = arith.constant 0 : index
    %34 = vector.load %arg8[%c0_21, %c0_22] : memref<256x384xbf16, #tpu.memory_space<vmem>>, vector<256x384xbf16>
    %cst_23 = arith.constant dense<0.000000e+00> : vector<128x384xf32>
    %35 = tpu.matmul %33, %34, %cst_23 {dimension_numbers = #tpu.dot_dimension_numbers<[1], [0], [0], [1], [0, 0, 1, 1], [], []>} : vector<128x256xbf16>, vector<256x384xbf16>, vector<128x384xf32> -> vector<128x384xf32>
    %36 = arith.addf %32, %35 : vector<128x384xf32>
    %c0_24 = arith.constant 0 : index
    %c0_25 = arith.constant 0 : index
    %37 = vector.load %arg9[%c0_24, %c0_25] : memref<1x384xf32, #tpu.memory_space<vmem>>, vector<1x384xf32>
    %38 = vector.broadcast %37 : vector<1x384xf32> to vector<128x384xf32>
    %39 = arith.addf %36, %38 : vector<128x384xf32>
    %40 = tpu.iota {dimensions = array<i32: 1>} : vector<128x384xi32>
    %c300_i32 = arith.constant 300 : i32
    %41 = vector.broadcast %c300_i32 : i32 to vector<128x384xi32>
    %42 = arith.cmpi slt, %40, %41 : vector<128x384xi32>
    %cst_26 = arith.constant dense<0.000000e+00> : vector<128xf32>
    %43 = vector.multi_reduction <add>, %39, %cst_26 [1] : vector<128x384xf32> to vector<128xf32>
    %44 = vector.shape_cast %43 : vector<128xf32> to vector<128x1xf32>
    %cst_27 = arith.constant 0.00333333341 : f32
    %45 = vector.broadcast %cst_27 : f32 to vector<128x1xf32>
    %46 = arith.mulf %44, %45 : vector<128x1xf32>
    %47 = vector.broadcast %46 : vector<128x1xf32> to vector<128x384xf32>
    %48 = arith.subf %39, %47 : vector<128x384xf32>
    %cst_28 = arith.constant 0.000000e+00 : f32
    %49 = vector.broadcast %cst_28 : f32 to vector<128x384xf32>
    %50 = arith.select %42, %48, %49 : vector<128x384xi1>, vector<128x384xf32>
    %51 = arith.mulf %50, %50 : vector<128x384xf32>
    %cst_29 = arith.constant dense<0.000000e+00> : vector<128xf32>
    %52 = vector.multi_reduction <add>, %51, %cst_29 [1] : vector<128x384xf32> to vector<128xf32>
    %53 = vector.shape_cast %52 : vector<128xf32> to vector<128x1xf32>
    %cst_30 = arith.constant 0.00334448158 : f32
    %54 = vector.broadcast %cst_30 : f32 to vector<128x1xf32>
    %55 = arith.mulf %53, %54 : vector<128x1xf32>
    %56 = math.sqrt %55 : vector<128x1xf32>
    %cst_31 = arith.constant 9.99999997E-7 : f32
    %57 = vector.broadcast %cst_31 : f32 to vector<128x1xf32>
    %58 = arith.addf %56, %57 : vector<128x1xf32>
    %59 = tpu.reciprocal %58 {approx = true} : vector<128x1xf32> -> vector<128x1xf32>
    %c0_32 = arith.constant 0 : index
    %c0_33 = arith.constant 0 : index
    %60 = vector.load %arg10[%c0_32, %c0_33] : memref<1x384xf32, #tpu.memory_space<vmem>>, vector<1x384xf32>
    %61 = vector.broadcast %60 : vector<1x384xf32> to vector<128x384xf32>
    %62 = arith.mulf %61, %50 : vector<128x384xf32>
    %63 = vector.broadcast %59 : vector<128x1xf32> to vector<128x384xf32>
    %64 = arith.mulf %62, %63 : vector<128x384xf32>
    %c0_34 = arith.constant 0 : index
    %c0_35 = arith.constant 0 : index
    %65 = vector.load %arg11[%c0_34, %c0_35] : memref<1x384xf32, #tpu.memory_space<vmem>>, vector<1x384xf32>
    %66 = vector.broadcast %65 : vector<1x384xf32> to vector<128x384xf32>
    %67 = arith.addf %64, %66 : vector<128x384xf32>
    %cst_36 = arith.constant 0.000000e+00 : f32
    %68 = vector.broadcast %cst_36 : f32 to vector<128x384xf32>
    %69 = arith.cmpf ogt, %67, %68 : vector<128x384xf32>
    %cst_37 = arith.constant 0.000000e+00 : f32
    %70 = vector.broadcast %cst_37 : f32 to vector<128x384xf32>
    %71 = arith.minimumf %67, %70 : vector<128x384xf32>
    %72 = math.exp %71 : vector<128x384xf32>
    %cst_38 = arith.constant 1.000000e+00 : f32
    %73 = vector.broadcast %cst_38 : f32 to vector<128x384xf32>
    %74 = arith.subf %72, %73 : vector<128x384xf32>
    %75 = arith.select %69, %67, %74 : vector<128x384xi1>, vector<128x384xf32>
    %c0_39 = arith.constant 0 : index
    %c0_40 = arith.constant 0 : index
    %76 = vector.load %arg12[%c0_39, %c0_40] : memref<1x384xf32, #tpu.memory_space<vmem>>, vector<1x384xf32>
    %77 = vector.broadcast %76 : vector<1x384xf32> to vector<128x384xf32>
    %78 = arith.mulf %75, %77 : vector<128x384xf32>
    %cst_41 = arith.constant dense<0.000000e+00> : vector<128xf32>
    %79 = vector.multi_reduction <add>, %78, %cst_41 [1] : vector<128x384xf32> to vector<128xf32>
    %c0_42 = arith.constant 0 : index
    %c0_43 = arith.constant 0 : index
    %80 = memref.load %arg13[%c0_42, %c0_43] : memref<1x1xf32, #tpu.memory_space<smem>>
    %81 = vector.broadcast %80 : f32 to vector<128xf32>
    %82 = arith.addf %79, %81 : vector<128xf32>
    %c0_44 = arith.constant 0 : index
    %c0_45 = arith.constant 0 : index
    %83 = vector.load %arg14[%c0_44, %c0_45] : memref<1x128xf32, #tpu.memory_space<vmem>>, vector<1x128xf32>
    %84 = vector.shape_cast %83 : vector<1x128xf32> to vector<128xf32>
    %85 = vector.shape_cast %82 : vector<128xf32> to vector<1x128xf32>
    tpu.vector_store %arg14[%c0_44, %c0_45], %85 {strides = array<i32>} : memref<1x128xf32, #tpu.memory_space<vmem>>, vector<1x128xf32>,
    return
  }
  func.func @transform_0(%arg0: i32) -> (i32, i32) {
    %c0_i32 = arith.constant 0 : i32
    %c0_i32_0 = arith.constant 0 : i32
    return %arg0, %c0_i32 : i32, i32
  }
  func.func @transform_1(%arg0: i32) -> (i32, i32) {
    %c0_i32 = arith.constant 0 : i32
    %c0_i32_0 = arith.constant 0 : i32
    return %arg0, %c0_i32 : i32, i32
  }
  func.func @transform_2(%arg0: i32) -> (i32, i32) {
    %c0_i32 = arith.constant 0 : i32
    %c0_i32_0 = arith.constant 0 : i32
    %c0_i32_1 = arith.constant 0 : i32
    return %c0_i32, %c0_i32_0 : i32, i32
  }
  func.func @transform_3(%arg0: i32) -> (i32, i32) {
    %c0_i32 = arith.constant 0 : i32
    %c0_i32_0 = arith.constant 0 : i32
    %c0_i32_1 = arith.constant 0 : i32
    return %c0_i32, %c0_i32_0 : i32, i32
  }
  func.func @transform_4(%arg0: i32) -> (i32, i32) {
    %c0_i32 = arith.constant 0 : i32
    %c0_i32_0 = arith.constant 0 : i32
    %c0_i32_1 = arith.constant 0 : i32
    return %c0_i32, %c0_i32_0 : i32, i32
  }
  func.func @transform_5(%arg0: i32) -> (i32, i32) {
    %c0_i32 = arith.constant 0 : i32
    %c0_i32_0 = arith.constant 0 : i32
    %c0_i32_1 = arith.constant 0 : i32
    return %c0_i32, %c0_i32_0 : i32, i32
  }
  func.func @transform_6(%arg0: i32) -> (i32, i32) {
    %c0_i32 = arith.constant 0 : i32
    %c0_i32_0 = arith.constant 0 : i32
    %c0_i32_1 = arith.constant 0 : i32
    return %c0_i32, %c0_i32_0 : i32, i32
  }
  func.func @transform_7(%arg0: i32) -> (i32, i32) {
    %c0_i32 = arith.constant 0 : i32
    %c0_i32_0 = arith.constant 0 : i32
    %c0_i32_1 = arith.constant 0 : i32
    return %c0_i32, %c0_i32_0 : i32, i32
  }
  func.func @transform_8(%arg0: i32) -> (i32, i32) {
    %c0_i32 = arith.constant 0 : i32
    %c0_i32_0 = arith.constant 0 : i32
    %c0_i32_1 = arith.constant 0 : i32
    return %c0_i32, %c0_i32_0 : i32, i32
  }
  func.func @transform_9(%arg0: i32) -> (i32, i32) {
    %c0_i32 = arith.constant 0 : i32
    %c0_i32_0 = arith.constant 0 : i32
    %c0_i32_1 = arith.constant 0 : i32
    return %c0_i32, %c0_i32_0 : i32, i32
  }
  func.func @transform_10(%arg0: i32) -> (i32, i32) {
    %c0_i32 = arith.constant 0 : i32
    %c0_i32_0 = arith.constant 0 : i32
    %c0_i32_1 = arith.constant 0 : i32
    return %c0_i32, %c0_i32_0 : i32, i32
  }
  func.func @transform_11(%arg0: i32) -> (i32, i32) {
    %c0_i32 = arith.constant 0 : i32
    %c0_i32_0 = arith.constant 0 : i32
    %c0_i32_1 = arith.constant 0 : i32
    return %c0_i32, %c0_i32_0 : i32, i32
  }
  func.func @transform_12(%arg0: i32) -> (i32, i32) {
    %c0_i32 = arith.constant 0 : i32
    %c0_i32_0 = arith.constant 0 : i32
    %c0_i32_1 = arith.constant 0 : i32
    return %c0_i32, %c0_i32_0 : i32, i32
  }
  func.func @transform_13(%arg0: i32) -> (i32, i32) {
    %c0_i32 = arith.constant 0 : i32
    %c0_i32_0 = arith.constant 0 : i32
    return %c0_i32, %arg0 : i32, i32
  }
}

</mosaic_0001>

<bundles_post_ra>
// kernel: tpu_custom_call.1
= control target key start
LH: loop header
LB: loop body
LE: loop exit
PB: predicated region body
PF: predicated region fallthrough
CT: control target
= control target key end

     0   :  { %19 = vsyncpa [#allocation4], 0  ;;  %s6336_s0 = inlined_call_operand.vmem [shape: f32[128,16], index: 0, kind: input, shape index: {}]   ;;  %s6337_s1 = inlined_call_operand.vmem [shape: f32[128,8], index: 1, kind: input, shape index: {}]   ;;  %s6338_s2 = inlined_call_operand.vmem [shape: bf16[16,256], index: 2, kind: input, shape index: {}]   ;;  %s6339_s3 = inlined_call_operand.vmem [shape: f32[1,256], index: 3, kind: input, shape index: {}]   ;;  %s6340_s4 = inlined_call_operand.vmem [shape: bf16[8,256], index: 4, kind: input, shape index: {}]   ;;  %s6341_s5 = inlined_call_operand.vmem [shape: f32[1,256], index: 5, kind: input, shape index: {}]   ;;  %s6342_s6 = inlined_call_operand.hbm [shape: bf16[256,384], index: 6, kind: input, shape index: {}]   ;;  %s6343_s7 = inlined_call_operand.hbm [shape: bf16[256,384], index: 7, kind: input, shape index: {}]   ;;  %s6344_s8 = inlined_call_operand.vmem [shape: f32[1,384], index: 8, kind: input, shape index: {}]   ;;  %s6345_s9 = inlined_call_operand.vmem [shape: f32[1,384], index: 9, kind: input, shape index: {}]   ;;  %s6346_s10 = inlined_call_operand.vmem [shape: f32[1,384], index: 10, kind: input, shape index: {}]   ;;  %s6347_s11 = inlined_call_operand.vmem [shape: f32[1,384], index: 11, kind: input, shape index: {}]   ;;  %s6348_s12 = inlined_call_operand.<no memory space> [shape: f32[1,1], index: 12, kind: input, shape index: {}]   ;;  %s6349_s13 = inlined_call_operand.hbm [shape: f32[1,128], index: 13, kind: output, shape index: {}]  }
   0x1   :  { %20 = vsyncpa [#allocation7], 0 }
   0x2   :  { %21 = vsyncpa [#allocation5], 0  ;;  %s4088_s25 = smov [#allocation3]   ;;  %s4016_s29 = scalar_lea.hbm %s6342_s6, 6144 }
   0x3   :  { %s39_s26 = sshll.u32 %s4088_s25, 4  ;;  %p4017_p0 = scmp.ne.s32.totalorder %s6342_s6, %s4016_s29  ;;  %s40_s26 = int_to_ptr.vmem [resolvable:$true] %s39_s26 }
   0x4   :  { %p4020_p1 = scmp.lt.u32.totalorder %s4016_s29, %s6342_s6 }
   0x6   :  { %p4022_p2 = pnand %p4020_p1, %p4017_p0 }
   0x8   :  { %4025 = shalt.err (!%p4022_p2)
}
   0x9   :  { %s4026_s17 = scalar_lea.vmem %s40_s26, 6144  ;;  %p4031_p4 = scmp.lt.s32.totalorder %s40_s26, %s40_s26 }
   0xa   :  { %p4027_p3 = scmp.ne.s32.totalorder %s40_s26, %s4026_s17  ;;  %p4032_p5 = scmp.lt.s32.totalorder %s4026_s17, %s4026_s17 }
   0xc   :  { %p4033_p6 = por %p4032_p5, %p4031_p4 }
   0xe   :  { %p4034_p7 = pnand %p4033_p6, %p4027_p3 }
  0x10   :  { %4037 = shalt.err (!%p4034_p7)
}
  0x11   :  { %s4089_s18 = smov 192   ;;  %s4090_s19 = smov 12  }
  0x12   :  { %45 = dma.hbm_to_vmem [thread:$0]  %s6342_s6, 6144, %s40_s26, [#allocation4], %s4089_s18, %s4089_s18, %s4090_s19  }
  0x13   :  { %s4091_s22 = smov [#allocation6]   ;;  %s4038_s27 = scalar_lea.hbm %s6343_s7, 6144 }
  0x14   :  { %s51_s23 = sshll.u32 %s4091_s22, 4  ;;  %p4039_p8 = scmp.ne.s32.totalorder %s6343_s7, %s4038_s27  ;;  %s52_s23 = int_to_ptr.vmem [resolvable:$true] %s51_s23 }
  0x15   :  { %p4042_p9 = scmp.lt.u32.totalorder %s4038_s27, %s6343_s7 }
  0x17   :  { %p4044_p10 = pnand %p4042_p9, %p4039_p8 }
  0x19   :  { %4047 = shalt.err (!%p4044_p10)
}
  0x1a   :  { %s4048_s15 = scalar_lea.vmem %s52_s23, 6144  ;;  %p4053_p12 = scmp.lt.s32.totalorder %s52_s23, %s52_s23 }
  0x1b   :  { %p4049_p11 = scmp.ne.s32.totalorder %s52_s23, %s4048_s15  ;;  %p4054_p13 = scmp.lt.s32.totalorder %s4048_s15, %s4048_s15 }
  0x1d   :  { %p4055_p0 = por %p4054_p13, %p4053_p12 }
  0x1f   :  { %p4056_p1 = pnand %p4055_p0, %p4049_p11 }
  0x21   :  { %4059 = shalt.err (!%p4056_p1)
}
  0x22   :  { %57 = dma.hbm_to_vmem [thread:$0]  %s6343_s7, 6144, %s52_s23, [#allocation7], %s4089_s18, %s4089_s18, %s4090_s19  }
  0x23   :  { %4082 = dma.done.wait [#allocation4], 6144  }
  0x24   :  { %4083 = vsyncadd [#allocation4], 4294961152 }
  0x25   :  { %4084 = dma.done.wait [#allocation7], 6144  }
  0x26   :  { %4085 = vsyncadd [#allocation7], 4294961152  ;;  %v4092_v0 = vmov 0   ;;  %v477_v1 = vld [vmem:[%s6340_s4] sm:$0xff]  ;;  %vm520_vm0 = vcmask 1043456   ;;  %v454_v3 = vld [vmem:[%s6337_s1 + $0x8] sm:$0xff] }
  0x27   :  { %559 = vmatprep.mubr.bf16.mxu1 %v4092_v0  ;;  %180 = vmatprep.mubr.bf16.mxu0 %v4092_v0  ;;  %v453_v2 = vld [vmem:[%s6337_s1] sm:$0xff]  ;;  %v3243_v4 = vcombine.high %v477_v1, %v477_v1  ;;  %v3242_v5 = vcombine.low %v477_v1, %v477_v1  ;;  %vm495_vm1 = vcmask 64512   ;;  %v76_v11 = vld [vmem:[%s6336_s0 + $0x8] sm:$0xff]  ;;  %vm123_vm2 = vcmask 130048   ;;  %v455_v13 = vld [vmem:[%s6337_s1 + $0x10] sm:$0xff] }
  0x28   :  { %v469_v7 = vpack.c.bf16 %v454_v3, %v453_v2  ;;  %v3597_v8 = vld [vmem:[%s6338_s2 + $0x4] ss:$8 sps:$4 sm:$0xff]   ;;  %v3599_v9 = vld [vmem:[%s6338_s2] ss:$8 sps:$4 sm:$0xff]   ;;  %v456_v14 = vld [vmem:[%s6337_s1 + $0x18] sm:$0xff] }
  0x29   :  { %3244 = vmatprep.subr.msk.bf16.mxu1 %vm520_vm0, %v3243_v4  ;;  %v522_v6 = vsel %vm520_vm0, %v3242_v5, 0  ;;  %v75_v10 = vld [vmem:[%s6336_s0] sm:$0xff]  ;;  %148 = vmatprep.subr.bf16.mxu0 %v3597_v8  ;;  %v470_v15 = vpack.c.bf16 %v456_v14, %v455_v13  ;;  %v77_v16 = vld [vmem:[%s6336_s0 + $0x10] sm:$0xff]  ;;  %v78_v17 = vld [vmem:[%s6336_s0 + $0x18] sm:$0xff] }
  0x2a   :  { %528 = vmatpush1.bf16.msra.mxu1 %v522_v6  ;;  %149 = vmatpush1.bf16.msra.mxu0 %v3599_v9  ;;  %v91_v12 = vpack.c.bf16 %v76_v11, %v75_v10  ;;  %v3600_v18 = vld [vmem:[#allocation6 + $0xc8] ss:$12 sps:$4 sm:$0xff]   ;;  %v457_v19 = vld [vmem:[%s6337_s1 + $0x20] sm:$0xff]  ;;  %v92_v21 = vpack.c.bf16 %v78_v17, %v77_v16  ;;  %v3609_v33 = vld [vmem:[#allocation6 + $0x30] ss:$12 sps:$4 sm:$0xff]  }
  0x2b   :  { %v458_v20 = vld [vmem:[%s6337_s1 + $0x28] sm:$0xff]  ;;  %v3603_v23 = vld [vmem:[#allocation6 + $0x4] ss:$12 sps:$4 sm:$0xff]   ;;  %3429 = vmatprep.subr.bf16.mxu1 %v3600_v18  ;;  %v3611_v31 = vld [vmem:[#allocation6 + $0x34] ss:$12 sps:$4 sm:$0xff]  }
  0x2c   :  { %v3601_v22 = vld [vmem:[#allocation6] ss:$12 sps:$4 sm:$0xff]   ;;  %v3604_v24 = vld [vmem:[#allocation6 + $0x8] ss:$12 sps:$4 sm:$0xff]   ;;  %1248 = vmatprep.subr.bf16.mxu0 %v3603_v23  ;;  %v3605_v25 = vld [vmem:[#allocation6 + $0x18] ss:$12 sps:$4 sm:$0xff]   ;;  %v471_v30 = vpack.c.bf16 %v458_v20, %v457_v19 }
  0x2d   :  { %3245 = vmatmul.mubr.msk.bf16.vlgmr.msra.gmra.mrb[0].mxu1 %vm495_vm1, %v469_v7  ;;  %3202 = vmatmul.mubr.msk.bf16.vlgmr.msra.gmra.mrb[0].mxu0 %vm123_vm2, %v91_v12  ;;  %v3607_v26 = vld [vmem:[#allocation6 + $0x1c] ss:$12 sps:$4 sm:$0xff]   ;;  %v79_v27 = vld [vmem:[%s6336_s0 + $0x20] sm:$0xff]  ;;  %v3615_v34 = vld [vmem:[#allocation6 + $0x4c] ss:$12 sps:$4 sm:$0xff]  }
  0x2e   :  { %569 = vmatprep.mubr.bf16.mxu1 %v4092_v0  ;;  %190 = vmatprep.mubr.bf16.mxu0 %v4092_v0  ;;  %v3608_v28 = vld [vmem:[#allocation6 + $0xe0] ss:$12 sps:$4 sm:$0xff]   ;;  %v3616_v36 = vld [vmem:[#allocation6 + $0xf8] ss:$12 sps:$4 sm:$0xff]   ;;  %v459_v37 = vld [vmem:[%s6337_s1 + $0x30] sm:$0xff] }
  0x2f   :  { %3430 = vmatpush3.bf16.msra.mxu1 %v3604_v24  ;;  %1249 = vmatpush1.bf16.msra.mxu0 %v3601_v22  ;;  %v80_v29 = vld [vmem:[%s6336_s0 + $0x28] sm:$0xff]  ;;  %v460_v38 = vld [vmem:[%s6337_s1 + $0x38] sm:$0xff]  ;;  %v81_v40 = vld [vmem:[%s6336_s0 + $0x30] sm:$0xff] }
  0x30   :  { %1250 = vmatprep.subr.bf16.mxu0 %v3607_v26  ;;  %3431 = vmatprep.subr.bf16.mxu1 %v3608_v28  ;;  %v3612_v32 = vld [vmem:[#allocation6 + $0x20] ss:$12 sps:$4 sm:$0xff]   ;;  %v93_v35 = vpack.c.bf16 %v80_v29, %v79_v27  ;;  %v3620_v39 = vld [vmem:[#allocation6 + $0x38] ss:$12 sps:$4 sm:$0xff]   ;;  %v3613_v42 = vld [vmem:[#allocation6 + $0x48] ss:$12 sps:$4 sm:$0xff]   ;;  %v472_v44 = vpack.c.bf16 %v460_v38, %v459_v37 }
  0x31   :  { %v82_v41 = vld [vmem:[%s6336_s0 + $0x38] sm:$0xff]  ;;  %v3619_v43 = vld [vmem:[#allocation6 + $0x64] ss:$12 sps:$4 sm:$0xff]   ;;  %v3617_v46 = vld [vmem:[#allocation6 + $0x60] ss:$12 sps:$4 sm:$0xff]  }
  0x32   :  { %v3624_v45 = vld [vmem:[#allocation6 + $0x110] ss:$12 sps:$4 sm:$0xff]   ;;  %v461_v48 = vld [vmem:[%s6337_s1 + $0x40] sm:$0xff]  ;;  %v462_v49 = vld [vmem:[%s6337_s1 + $0x48] sm:$0xff]  ;;  %v94_v50 = vpack.c.bf16 %v82_v41, %v81_v40  ;;  %v6350_v41 = vlaneseq }
  0x33   :  { %1251 = vmatpush1.bf16.msra.mxu0 %v3605_v25  ;;  %3432 = vmatpush3.bf16.msra.mxu1 %v3612_v32  ;;  %v3628_v47 = vld [vmem:[#allocation6 + $0x50] ss:$12 sps:$4 sm:$0xff]   ;;  %v3632_v52 = vld [vmem:[#allocation6 + $0x128] ss:$12 sps:$4 sm:$0xff]   ;;  %v3621_v53 = vld [vmem:[#allocation6 + $0x78] ss:$12 sps:$4 sm:$0xff]   ;;  %v473_v56 = vpack.c.bf16 %v462_v49, %v461_v48 }
  0x34   :  { %1252 = vmatprep.subr.bf16.mxu0 %v3611_v31  ;;  %3433 = vmatprep.subr.bf16.mxu1 %v3616_v36  ;;  %v3623_v51 = vld [vmem:[#allocation6 + $0x7c] ss:$12 sps:$4 sm:$0xff]   ;;  %v3627_v54 = vld [vmem:[#allocation6 + $0x94] ss:$12 sps:$4 sm:$0xff]   ;;  %v3631_v60 = vld [vmem:[#allocation6 + $0xac] ss:$12 sps:$4 sm:$0xff]  }
  0x35   :  { %3246 = vmatmul.mubr.msk.bf16.gmra.mrb[4].mxu1 %vm495_vm1, %v470_v15  ;;  %3203 = vmatmul.mubr.msk.bf16.gmra.mrb[4].mxu0 %vm123_vm2, %v92_v21  ;;  %v3636_v55 = vld [vmem:[#allocation6 + $0x68] ss:$12 sps:$4 sm:$0xff]   ;;  %v83_v57 = vld [vmem:[%s6336_s0 + $0x40] sm:$0xff]  ;;  %v3625_v59 = vld [vmem:[#allocation6 + $0x90] ss:$12 sps:$4 sm:$0xff]  }
  0x36   :  { %579 = vmatprep.mubr.bf16.mxu1 %v4092_v0  ;;  %200 = vmatprep.mubr.bf16.mxu0 %v4092_v0  ;;  %v84_v58 = vld [vmem:[%s6336_s0 + $0x48] sm:$0xff]  ;;  %v463_v61 = vld [vmem:[%s6337_s1 + $0x50] sm:$0xff]  ;;  %v464_v62 = vld [vmem:[%s6337_s1 + $0x58] sm:$0xff] }
  0x37   :  { %1253 = vmatpush1.bf16.msra.mxu0 %v3609_v33  ;;  %3434 = vmatpush3.bf16.msra.mxu1 %v3620_v39  ;;  %v95_v63 = vpack.c.bf16 %v84_v58, %v83_v57  ;;  %v3629_v1 = vld [vmem:[#allocation6 + $0xa8] ss:$12 sps:$4 sm:$0xff]   ;;  %v3635_v2 = vld [vmem:[#allocation6 + $0xc4] ss:$12 sps:$4 sm:$0xff]   ;;  %v86_v4 = vld [vmem:[%s6336_s0 + $0x58] sm:$0xff]  ;;  %v474_v5 = vpack.c.bf16 %v464_v62, %v463_v61 }
  0x38   :  { %1254 = vmatprep.subr.bf16.mxu0 %v3615_v34  ;;  %3435 = vmatprep.subr.bf16.mxu1 %v3624_v45  ;;  %v85_v3 = vld [vmem:[%s6336_s0 + $0x50] sm:$0xff]  ;;  %v3633_v6 = vld [vmem:[#allocation6 + $0xc0] ss:$12 sps:$4 sm:$0xff]   ;;  %v3639_v7 = vld [vmem:[#allocation6 + $0xdc] ss:$12 sps:$4 sm:$0xff]  }
  0x39   :  { %v465_v8 = vld [vmem:[%s6337_s1 + $0x60] sm:$0xff]  ;;  %v466_v9 = vld [vmem:[%s6337_s1 + $0x68] sm:$0xff]  ;;  %v96_v10 = vpack.c.bf16 %v86_v4, %v85_v3  ;;  %v467_v15 = vld [vmem:[%s6337_s1 + $0x70] sm:$0xff] }
  0x3a   :  { %v3637_v11 = vld [vmem:[#allocation6 + $0xd8] ss:$12 sps:$4 sm:$0xff]   ;;  %v88_v13 = vld [vmem:[%s6336_s0 + $0x68] sm:$0xff]  ;;  %v475_v14 = vpack.c.bf16 %v466_v9, %v465_v8  ;;  %v89_v18 = vld [vmem:[%s6336_s0 + $0x70] sm:$0xff] }
  0x3b   :  { %1255 = vmatpush1.bf16.msra.mxu0 %v3613_v42  ;;  %3436 = vmatpush3.bf16.msra.mxu1 %v3628_v47  ;;  %v87_v12 = vld [vmem:[%s6336_s0 + $0x60] sm:$0xff]  ;;  %v468_v16 = vld [vmem:[%s6337_s1 + $0x78] sm:$0xff]  ;;  %v3645_v25 = vld [vmem:[#allocation6 + $0x108] ss:$12 sps:$4 sm:$0xff]   ;;  %v4326_v42 = vshrl.u32 %v6350_v41, 7 }
  0x3c   :  { %1256 = vmatprep.subr.bf16.mxu0 %v3619_v43  ;;  %3437 = vmatprep.subr.bf16.mxu1 %v3632_v52  ;;  %v97_v17 = vpack.c.bf16 %v88_v13, %v87_v12  ;;  %v90_v19 = vld [vmem:[%s6336_s0 + $0x78] sm:$0xff]  ;;  %v476_v20 = vpack.c.bf16 %v468_v16, %v467_v15  ;;  %v3643_v22 = vld [vmem:[#allocation6 + $0xf4] ss:$12 sps:$4 sm:$0xff]   ;;  %v3651_v26 = vld [vmem:[#allocation6 + $0x124] ss:$12 sps:$4 sm:$0xff]  }
  0x3d   :  { %3247 = vmatmul.mubr.msk.bf16.gmra.mrb[8].mxu1 %vm495_vm1, %v471_v30  ;;  %3204 = vmatmul.mubr.msk.bf16.gmra.mrb[8].mxu0 %vm123_vm2, %v93_v35  ;;  %v98_v21 = vpack.c.bf16 %v90_v19, %v89_v18  ;;  %v3641_v23 = vld [vmem:[#allocation6 + $0xf0] ss:$12 sps:$4 sm:$0xff]   ;;  %v3647_v24 = vld [vmem:[#allocation6 + $0x10c] ss:$12 sps:$4 sm:$0xff]   ;;  %v3659_v33 = vld [vmem:[#allocation6 + $0x154] ss:$12 sps:$4 sm:$0xff]  }
  0x3e   :  { %589 = vmatprep.mubr.bf16.mxu1 %v4092_v0  ;;  %210 = vmatprep.mubr.bf16.mxu0 %v4092_v0  ;;  %v3649_v27 = vld [vmem:[#allocation6 + $0x120] ss:$12 sps:$4 sm:$0xff]   ;;  %v3655_v29 = vld [vmem:[#allocation6 + $0x13c] ss:$12 sps:$4 sm:$0xff]   ;;  %v3653_v30 = vld [vmem:[#allocation6 + $0x138] ss:$12 sps:$4 sm:$0xff]  }
  0x3f   :  { %1257 = vmatpush1.bf16.msra.mxu0 %v3617_v46  ;;  %3438 = vmatpush3.bf16.msra.mxu1 %v3636_v55  ;;  %v3640_v28 = vld [vmem:[#allocation6 + $0x140] ss:$12 sps:$4 sm:$0xff]   ;;  %v3648_v31 = vld [vmem:[#allocation6 + $0x158] ss:$12 sps:$4 sm:$0xff]   ;;  %v3657_v34 = vld [vmem:[#allocation6 + $0x150] ss:$12 sps:$4 sm:$0xff]  }
  0x40   :  { %1258 = vmatprep.subr.bf16.mxu0 %v3623_v51  ;;  %3439 = vmatprep.subr.bf16.mxu1 %v3640_v28  ;;  %v3652_v32 = vld [vmem:[#allocation6 + $0x98] ss:$12 sps:$4 sm:$0xff]   ;;  %v3656_v35 = vld [vmem:[#allocation6 + $0x170] ss:$12 sps:$4 sm:$0xff]   ;;  %v3661_v38 = vld [vmem:[#allocation6 + $0x168] ss:$12 sps:$4 sm:$0xff]  }
  0x41   :  { %v3663_v36 = vld [vmem:[#allocation6 + $0x16c] ss:$12 sps:$4 sm:$0xff]   ;;  %v3660_v37 = vld [vmem:[#allocation6 + $0xb0] ss:$12 sps:$4 sm:$0xff]   ;;  %v3664_v40 = vld [vmem:[#allocation3 + $0xc8] ss:$12 sps:$4 sm:$0xff]  }
  0x42   :  { %v3667_v39 = vld [vmem:[#allocation3 + $0x4] ss:$12 sps:$4 sm:$0xff]   ;;  %6368 = vst [vmem:[#allocation12_spill] sm:$0xff] %v4326_v42  ;;  %v4329_v43 = vsub.s32 0, %v4326_v42  ;;  %v4335_v45 = vsub.s32 1, %v4326_v42 }
  0x43   :  { %1259 = vmatpush1.bf16.msra.mxu0 %v3621_v53  ;;  %v101_v62 = vld [vmem:[%s6339_s3] sm:$0x3] }
  0x44   :  { %1260 = vmatprep.subr.bf16.mxu0 %v3627_v54  ;;  %6369 = vst [vmem:[#allocation13_spill] sm:$0xff] %v4329_v43  ;;  %6370 = vst [vmem:[#allocation14_spill] sm:$0xff] %v4335_v45 }
  0x45   :  { %3248 = vmatmul.mubr.msk.bf16.gmra.mrb[12].mxu1 %vm495_vm1, %v472_v44  ;;  %3205 = vmatmul.mubr.msk.bf16.gmra.mrb[12].mxu0 %vm123_vm2, %v94_v50  ;;  %v478_v44 = vld [vmem:[%s6341_s5] sm:$0x3] }
  0x46   :  { %599 = vmatprep.mubr.bf16.mxu1 %v4092_v0  ;;  %220 = vmatprep.mubr.bf16.mxu0 %v4092_v0  ;;  %v4338_v46 = vrot.slane %v478_v44, %v4329_v43  ;;  %v4341_v47 = vrot.slane %v478_v44, %v4335_v45 }
  0x47   :  { %1261 = vmatpush1.bf16.msra.mxu0 %v3625_v59 }
  0x48   :  { %1262 = vmatprep.subr.bf16.mxu0 %v3631_v60 }
  0x4b   :  { %1263 = vmatpush1.bf16.msra.mxu0 %v3629_v1 }
  0x4c   :  { %1264 = vmatprep.subr.bf16.mxu0 %v3635_v2 }
  0x4d   :  { %3249 = vmatmul.mubr.msk.bf16.gmra.mrb[16].mxu1 %vm495_vm1, %v473_v56  ;;  %3206 = vmatmul.mubr.msk.bf16.gmra.mrb[16].mxu0 %vm123_vm2, %v95_v63 }
  0x4e   :  { %609 = vmatprep.mubr.bf16.mxu1 %v4092_v0  ;;  %230 = vmatprep.mubr.bf16.mxu0 %v4092_v0 }
  0x4f   :  { %1265 = vmatpush1.bf16.msra.mxu0 %v3633_v6 }
  0x50   :  { %1266 = vmatprep.subr.bf16.mxu0 %v3639_v7  ;;  %v4367_v7 = vrot.slane %v101_v62, %v4329_v43 }
  0x53   :  { %1267 = vmatpush1.bf16.msra.mxu0 %v3637_v11 }
  0x54   :  { %1268 = vmatprep.subr.bf16.mxu0 %v3643_v22 }
  0x55   :  { %3250 = vmatmul.mubr.msk.bf16.gmra.mrb[20].mxu1 %vm495_vm1, %v474_v5  ;;  %3207 = vmatmul.mubr.msk.bf16.gmra.mrb[20].mxu0 %vm123_vm2, %v96_v10 }
  0x56   :  { %619 = vmatprep.mubr.bf16.mxu1 %v4092_v0  ;;  %240 = vmatprep.mubr.bf16.mxu0 %v4092_v0 }
  0x57   :  { %1269 = vmatpush1.bf16.msra.mxu0 %v3641_v23 }
  0x58   :  { %1270 = vmatprep.subr.bf16.mxu0 %v3647_v24 }
  0x5b   :  { %1271 = vmatpush1.bf16.msra.mxu0 %v3645_v25 }
  0x5c   :  { %1272 = vmatprep.subr.bf16.mxu0 %v3651_v26 }
  0x5d   :  { %3251 = vmatmul.mubr.msk.bf16.gmra.mrb[24].mxu1 %vm495_vm1, %v475_v14  ;;  %3208 = vmatmul.mubr.msk.bf16.gmra.mrb[24].mxu0 %vm123_vm2, %v97_v17 }
  0x5e   :  { %629 = vmatprep.mubr.bf16.mxu1 %v4092_v0  ;;  %250 = vmatprep.mubr.bf16.mxu0 %v4092_v0  ;;  %v3644_v0 = vld [vmem:[#allocation6 + $0x80] ss:$12 sps:$4 sm:$0xff]  }
  0x5f   :  { %1273 = vmatpush1.bf16.msra.mxu0 %v3649_v27  ;;  %3440 = vmatpush3.bf16.msra.mxu1 %v3644_v0  ;;  %v4397_v27 = vrot.slane %v101_v62, %v4335_v45 }
  0x60   :  { %1274 = vmatprep.subr.bf16.mxu0 %v3655_v29  ;;  %3441 = vmatprep.subr.bf16.mxu1 %v3648_v31 }
  0x63   :  { %1275 = vmatpush1.bf16.msra.mxu0 %v3653_v30  ;;  %3442 = vmatpush3.bf16.msra.mxu1 %v3652_v32 }
  0x64   :  { %1276 = vmatprep.subr.bf16.mxu0 %v3659_v33  ;;  %3443 = vmatprep.subr.bf16.mxu1 %v3656_v35 }
  0x65   :  { %3252 = vmatmul.mubr.msk.bf16.gmra.mrb[28].mxu1 %vm495_vm1, %v476_v20  ;;  %3209 = vmatmul.mubr.msk.bf16.gmra.mrb[28].mxu0 %vm123_vm2, %v98_v21 }
  0x67   :  { %1277 = vmatpush1.bf16.msra.mxu0 %v3657_v34  ;;  %3444 = vmatpush3.bf16.msra.mxu1 %v3660_v37 }
  0x68   :  { %1278 = vmatprep.subr.bf16.mxu0 %v3663_v36  ;;  %3493 = vmatprep.subr.bf16.mxu1 %v3664_v40 }
  0x6b   :  { %1279 = vmatpush1.bf16.msra.mxu0 %v3661_v38 }
  0x6c   :  { %1714 = vmatprep.subr.bf16.mxu0 %v3667_v39 }
 0x100   :  { %v561_v48 = vpop.f32.mrb[0].mxu1  ;;  %v182_v56 = vpop.f32.mrb[0].mxu0 }
 0x101   :  { %v4344_v49 = vadd.f32 %v561_v48, %v4338_v46  ;;  %v563_v50 = vpop.f32.mrb[1].mxu1  ;;  %v4357_v59 = vpop.f32.mrb[1].mxu0  ;;  %v4386_v18 = vadd.f32 %v182_v56, %v4367_v7 }
 0x102   :  { %v4347_v51 = vadd.f32 %v563_v50, %v4341_v47  ;;  %v565_v52 = vpop.f32.mrb[2].mxu1  ;;  %v186_v63 = vpop.f32.mrb[2].mxu0 }
 0x103   :  { %v672_v53 = vmin.f32 %v4344_v49, 0.0  ;;  %v4351_v54 = vadd.f32 %v565_v52, %v4338_v46  ;;  %v567_v55 = vpop.f32.mrb[3].mxu1  ;;  %v4364_v3 = vpop.f32.mrb[3].mxu0  ;;  %v293_v0 = vmin.f32 %v4386_v18, 0.0  ;;  %v4401_v30 = vadd.f32 %v186_v63, %v4367_v7 }
 0x104   :  { %v673_v57 = vmin.f32 %v4347_v51, 0.0  ;;  %v4355_v58 = vadd.f32 %v567_v55, %v4341_v47  ;;  %vm640_vm3 = vcmp.gt.f32.partialorder %v4344_v49, 0.0  ;;  %vm641_vm4 = vcmp.gt.f32.partialorder %v4347_v51, 0.0 }
 0x105   :  { %v704_v60 = vmul.f32 1.442695, %v672_v53  ;;  %v674_v61 = vmin.f32 %v4351_v54, 0.0  ;;  %vm642_vm5 = vcmp.gt.f32.partialorder %v4351_v54, 0.0  ;;  %v325_v56 = vmul.f32 1.442695, %v293_v0 }
 0x106   :  { %v706_v1 = vmul.f32 1.442695, %v673_v57  ;;  %v675_v2 = vmin.f32 %v4355_v58, 0.0  ;;  %vm643_vm6 = vcmp.gt.f32.partialorder %v4355_v58, 0.0  ;;  %v295_v57 = vmin.f32 %v4401_v30, 0.0 }
 0x107   :  { %3728 = vpow2.f32 %v704_v60  ;;  %v708_v4 = vmul.f32 1.442695, %v674_v61  ;;  %v4449_v0 = vadd.f32 %v4357_v59, %v4397_v27  ;;  %vm261_vm15 = vcmp.gt.f32.partialorder %v4386_v18, 0.0 }
 0x108   :  { %3730 = vpow2.f32 %v706_v1  ;;  %v710_v5 = vmul.f32 1.442695, %v675_v2  ;;  %v571_v6 = vpop.f32.mrb[4].mxu1  ;;  %v4379_v15 = vpop.f32.mrb[4].mxu0  ;;  %vm263_vm0 = vcmp.gt.f32.partialorder %v4401_v30, 0.0 }
 0x109   :  { %3732 = vpow2.f32 %v708_v4  ;;  %v4370_v8 = vadd.f32 %v571_v6, %v4338_v46  ;;  %v573_v9 = vpop.f32.mrb[5].mxu1  ;;  %v4388_v19 = vpop.f32.mrb[5].mxu0 }
 0x10a   :  { %3734 = vpow2.f32 %v710_v5  ;;  %v4373_v10 = vadd.f32 %v573_v9, %v4341_v47  ;;  %v575_v11 = vpop.f32.mrb[6].mxu1  ;;  %v4391_v22 = vpop.f32.mrb[6].mxu0 }
 0x10b   :  { %v676_v12 = vmin.f32 %v4370_v8, 0.0  ;;  %v4377_v13 = vadd.f32 %v575_v11, %v4338_v46  ;;  %v577_v14 = vpop.f32.mrb[7].mxu1  ;;  %v4394_v25 = vpop.f32.mrb[7].mxu0  ;;  %vm644_vm7 = vcmp.gt.f32.partialorder %v4370_v8, 0.0 }
 0x10c   :  { %v677_v16 = vmin.f32 %v4373_v10, 0.0  ;;  %v4383_v17 = vadd.f32 %v577_v14, %v4341_v47  ;;  %vm645_vm8 = vcmp.gt.f32.partialorder %v4373_v10, 0.0 }
 0x10d   :  { %v712_v20 = vmul.f32 1.442695, %v676_v12  ;;  %v678_v21 = vmin.f32 %v4377_v13, 0.0  ;;  %vm646_vm9 = vcmp.gt.f32.partialorder %v4377_v13, 0.0 }
 0x10e   :  { %v714_v23 = vmul.f32 1.442695, %v677_v16  ;;  %v679_v24 = vmin.f32 %v4383_v17, 0.0  ;;  %v3665_v16 = vld [vmem:[#allocation3] ss:$12 sps:$4 sm:$0xff]   ;;  %vm647_vm10 = vcmp.gt.f32.partialorder %v4383_v17, 0.0 }
 0x10f   :  { %3736 = vpow2.f32 %v712_v20  ;;  %v716_v26 = vmul.f32 1.442695, %v678_v21 }
 0x110   :  { %3738 = vpow2.f32 %v714_v23  ;;  %v718_v28 = vmul.f32 1.442695, %v679_v24  ;;  %v581_v29 = vpop.f32.mrb[8].mxu1  ;;  %v4417_v50 = vpop.f32.mrb[8].mxu0  ;;  %v3668_v23 = vld [vmem:[#allocation3 + $0x8] ss:$12 sps:$4 sm:$0xff]  }
 0x111   :  { %v3729_v31 = vpop.eup %3728  ;;  %3740 = vpow2.f32 %v716_v26  ;;  %v4406_v32 = vadd.f32 %v581_v29, %v4338_v46  ;;  %v583_v33 = vpop.f32.mrb[9].mxu1  ;;  %v3671_v24 = vld [vmem:[#allocation3 + $0x1c] ss:$12 sps:$4 sm:$0xff]   ;;  %v3672_v29 = vld [vmem:[#allocation3 + $0xe0] ss:$12 sps:$4 sm:$0xff]  }
 0x112   :  { %v3731_v34 = vpop.eup %3730  ;;  %v3253_v35 = vadd.f32 -1.0, %v3729_v31  ;;  %3742 = vpow2.f32 %v718_v28  ;;  %v4410_v36 = vadd.f32 %v583_v33, %v4341_v47  ;;  %v585_v37 = vpop.f32.mrb[10].mxu1 }
 0x113   :  { %v3733_v38 = vpop.eup %3732  ;;  %v3254_v39 = vadd.f32 -1.0, %v3731_v34  ;;  %v680_v40 = vmin.f32 %v4406_v32, 0.0  ;;  %v4415_v44 = vadd.f32 %v585_v37, %v4338_v46  ;;  %v587_v48 = vpop.f32.mrb[11].mxu1  ;;  %v3669_v37 = vld [vmem:[#allocation3 + $0x18] ss:$12 sps:$4 sm:$0xff]   ;;  %vm648_vm12 = vcmp.gt.f32.partialorder %v4406_v32, 0.0 }
 0x114   :  { %v3735_v52 = vpop.eup %3734  ;;  %v3255_v53 = vadd.f32 -1.0, %v3733_v38  ;;  %v681_v55 = vmin.f32 %v4410_v36, 0.0  ;;  %v4421_v60 = vpop.f32.mrb[9].mxu0  ;;  %v800_v61 = vsel %vm640_vm3, %v4344_v49, %v3253_v35  ;;  %v4433_v6 = vadd.f32 %v587_v48, %v4341_v47 }
 0x115   :  { %v3256_v62 = vadd.f32 -1.0, %v3735_v52  ;;  %v720_v63 = vmul.f32 1.442695, %v680_v40  ;;  %v682_v1 = vmin.f32 %v4415_v44, 0.0  ;;  %v4427_v2 = vpop.f32.mrb[10].mxu0  ;;  %v801_v9 = vsel %vm641_vm4, %v4347_v51, %v3254_v39 }
 0x116   :  { %v802_v4 = vsel %vm642_vm5, %v4351_v54, %v3255_v53  ;;  %v722_v5 = vmul.f32 1.442695, %v681_v55  ;;  %v4438_v11 = vpop.f32.mrb[11].mxu0  ;;  %v683_v54 = vmin.f32 %v4433_v6, 0.0  ;;  %v3675_v52 = vld [vmem:[#allocation3 + $0x34] ss:$12 sps:$4 sm:$0xff]  }
 0x117   :  { %v912_v49 = vpack.c.bf16 %v802_v4, %v800_v61  ;;  %3744 = vpow2.f32 %v720_v63  ;;  %v724_v12 = vmul.f32 1.442695, %v682_v1  ;;  %v803_v14 = vsel %vm643_vm6, %v4355_v58, %v3256_v62  ;;  %v3676_v62 = vld [vmem:[#allocation3 + $0x20] ss:$12 sps:$4 sm:$0xff]  }
 0x118   :  { %3746 = vpow2.f32 %v722_v5  ;;  %v591_v20 = vpop.f32.mrb[12].mxu1  ;;  %v913_v21 = vpack.c.bf16 %v803_v14, %v801_v9  ;;  %v329_v58 = vmul.f32 1.442695, %v295_v57  ;;  %v726_v33 = vmul.f32 1.442695, %v683_v54  ;;  %v4460_v53 = vpop.f32.mrb[12].mxu0 }
 0x119   :  { %v3737_v26 = vpop.eup %3736  ;;  %3748 = vpow2.f32 %v724_v12  ;;  %v4445_v51 = vadd.f32 %v591_v20, %v4338_v46  ;;  %v593_v28 = vpop.f32.mrb[13].mxu1  ;;  %v3680_v5 = vld [vmem:[#allocation3 + $0xf8] ss:$12 sps:$4 sm:$0xff]   ;;  %vm650_vm11 = vcmp.gt.f32.partialorder %v4415_v44, 0.0  ;;  %vm649_vm13 = vcmp.gt.f32.partialorder %v4410_v36, 0.0 }
 0x11a   :  { %v3739_v31 = vpop.eup %3738  ;;  %v4453_v34 = vadd.f32 %v593_v28, %v4341_v47  ;;  %v595_v35 = vpop.f32.mrb[14].mxu1  ;;  %1280 = vmatprep.mubr.bf16.mxu0 %v913_v21  ;;  %1393 = vmatprep.mubr.bf16.mxu1 %v913_v21  ;;  %3750 = vpow2.f32 %v325_v56  ;;  %v3257_v57 = vadd.f32 -1.0, %v3737_v26  ;;  %vm651_vm14 = vcmp.gt.f32.partialorder %v4433_v6, 0.0 }
 0x11b   :  { %v3741_v38 = vpop.eup %3740  ;;  %v3258_v39 = vadd.f32 -1.0, %v3739_v31  ;;  %v684_v59 = vmin.f32 %v4445_v51, 0.0  ;;  %v4458_v40 = vadd.f32 %v595_v35, %v4338_v46  ;;  %v597_v48 = vpop.f32.mrb[15].mxu1  ;;  %1281 = vmatmul.mubr.bf16.vlgmr.msra.gmra.mrb[32].mxu0 %v912_v49  ;;  %1394 = vmatmul.mubr.bf16.vlgmr.msra.gmra.mrb[32].mxu1 %v912_v49  ;;  %3752 = vpow2.f32 %v726_v33  ;;  %v3684_v31 = vld [vmem:[#allocation3 + $0x38] ss:$12 sps:$4 sm:$0xff]  }
 0x11c   :  { %v3743_v55 = vpop.eup %3742  ;;  %v3259_v61 = vadd.f32 -1.0, %v3741_v38  ;;  %v685_v56 = vmin.f32 %v4453_v34, 0.0  ;;  %3494 = vmatpush3.bf16.msra.mxu1 %v3668_v23  ;;  %1715 = vmatpush1.bf16.msra.mxu0 %v3665_v16  ;;  %v4463_v63 = vpop.f32.mrb[13].mxu0  ;;  %3754 = vpow2.f32 %v329_v58  ;;  %v4471_v14 = vadd.f32 %v597_v48, %v4341_v47  ;;  %v3673_v58 = vld [vmem:[#allocation3 + $0x30] ss:$12 sps:$4 sm:$0xff]  }
 0x11d   :  { %v3260_v1 = vadd.f32 -1.0, %v3743_v55  ;;  %v686_v4 = vmin.f32 %v4458_v40, 0.0  ;;  %1716 = vmatprep.subr.bf16.mxu0 %v3671_v24  ;;  %3495 = vmatprep.subr.bf16.mxu1 %v3672_v29  ;;  %v4467_v9 = vpop.f32.mrb[14].mxu0  ;;  %v728_v49 = vmul.f32 1.442695, %v684_v59  ;;  %v805_v20 = vsel %vm645_vm8, %v4373_v10, %v3258_v39 }
 0x11e   :  { %v730_v12 = vmul.f32 1.442695, %v685_v56  ;;  %v4473_v16 = vpop.f32.mrb[15].mxu0  ;;  %v806_v23 = vsel %vm646_vm9, %v4377_v13, %v3259_v61  ;;  %v687_v24 = vmin.f32 %v4471_v14, 0.0  ;;  %v804_v29 = vsel %vm644_vm7, %v4370_v8, %v3257_v57  ;;  %v3679_v35 = vld [vmem:[#allocation3 + $0x4c] ss:$12 sps:$4 sm:$0xff]  }
 0x11f   :  { %v732_v54 = vmul.f32 1.442695, %v686_v4  ;;  %v807_v21 = vsel %vm647_vm10, %v4383_v17, %v3260_v1  ;;  %v914_v17 = vpack.c.bf16 %v806_v23, %v804_v29  ;;  %v294_v13 = vmin.f32 %v4449_v0, 0.0  ;;  %v3688_v38 = vld [vmem:[#allocation3 + $0x110] ss:$12 sps:$4 sm:$0xff]  }
 0x120   :  { %3756 = vpow2.f32 %v730_v12  ;;  %v601_v26 = vpop.f32.mrb[16].mxu1  ;;  %1717 = vmatpush1.bf16.msra.mxu0 %v3669_v37  ;;  %v915_v28 = vpack.c.bf16 %v807_v21, %v805_v20  ;;  %3496 = vmatpush3.bf16.msra.mxu1 %v3676_v62  ;;  %v734_v37 = vmul.f32 1.442695, %v687_v24  ;;  %v3677_v8 = vld [vmem:[#allocation3 + $0x48] ss:$12 sps:$4 sm:$0xff]   ;;  %v4493_v62 = vpop.f32.mrb[16].mxu0 }
 0x121   :  { %v3745_v10 = vpop.eup %3744  ;;  %v603_v33 = vpop.f32.mrb[17].mxu1  ;;  %1718 = vmatprep.subr.bf16.mxu0 %v3675_v52  ;;  %3497 = vmatprep.subr.bf16.mxu1 %v3680_v5  ;;  %3758 = vpow2.f32 %v732_v54  ;;  %v4491_v52 = vadd.f32 %v601_v26, %v4338_v46  ;;  %v3683_v56 = vld [vmem:[#allocation3 + $0x64] ss:$12 sps:$4 sm:$0xff]   ;;  %v3696_v54 = vld [vmem:[#allocation3 + $0x128] ss:$12 sps:$4 sm:$0xff]   ;;  %vm653_vm1 = vcmp.gt.f32.partialorder %v4453_v34, 0.0 }
 0x122   :  { %v3747_v39 = vpop.eup %3746  ;;  %v4488_v59 = vadd.f32 %v603_v33, %v4341_v47  ;;  %v605_v48 = vpop.f32.mrb[18].mxu1  ;;  %1290 = vmatprep.mubr.bf16.mxu0 %v915_v28  ;;  %1401 = vmatprep.mubr.bf16.mxu1 %v915_v28  ;;  %v3261_v57 = vadd.f32 -1.0, %v3745_v10  ;;  %3760 = vpow2.f32 %v728_v49  ;;  %v4500_v49 = vadd.f32 %v4364_v3, %v4397_v27  ;;  %v3692_v12 = vld [vmem:[#allocation3 + $0x50] ss:$12 sps:$4 sm:$0xff]  }
 0x123   :  { %v3749_v55 = vpop.eup %3748  ;;  %v607_v61 = vpop.f32.mrb[19].mxu1  ;;  %1291 = vmatmul.mubr.bf16.gmra.mrb[36].mxu0 %v914_v17  ;;  %1402 = vmatmul.mubr.bf16.gmra.mrb[36].mxu1 %v914_v17  ;;  %3762 = vpow2.f32 %v734_v37  ;;  %v4496_v5 = vadd.f32 %v605_v48, %v4338_v46  ;;  %v3262_v21 = vadd.f32 -1.0, %v3747_v39  ;;  %v327_v24 = vmul.f32 1.442695, %v294_v13  ;;  %v3681_v37 = vld [vmem:[#allocation3 + $0x60] ss:$12 sps:$4 sm:$0xff]  }
 0x124   :  { %v3751_v1 = vpop.eup %3750  ;;  %v3263_v4 = vadd.f32 -1.0, %v3749_v55  ;;  %1719 = vmatpush1.bf16.msra.mxu0 %v3673_v58  ;;  %3498 = vmatpush3.bf16.msra.mxu1 %v3684_v31  ;;  %v4502_v20 = vpop.f32.mrb[17].mxu0  ;;  %v4506_v23 = vadd.f32 %v607_v61, %v4341_v47  ;;  %v689_v3 = vmin.f32 %v4488_v59, 0.0  ;;  %v688_v33 = vmin.f32 %v4491_v52, 0.0 }
 0x125   :  { %1720 = vmatprep.subr.bf16.mxu0 %v3679_v35  ;;  %3499 = vmatprep.subr.bf16.mxu1 %v3688_v38  ;;  %v4508_v26 = vpop.f32.mrb[18].mxu0  ;;  %v3753_v28 = vpop.eup %3752  ;;  %v808_v17 = vsel %vm648_vm12, %v4406_v32, %v3261_v57  ;;  %v690_v35 = vmin.f32 %v4496_v5, 0.0  ;;  %v3210_v48 = vadd.f32 -1.0, %v3751_v1  ;;  %v809_v61 = vsel %vm649_vm13, %v4410_v36, %v3262_v21  ;;  %v3687_v32 = vld [vmem:[#allocation3 + $0x7c] ss:$12 sps:$4 sm:$0xff]  }
 0x126   :  { %v810_v29 = vsel %vm650_vm11, %v4415_v44, %v3263_v4  ;;  %v4514_v58 = vpop.f32.mrb[19].mxu0  ;;  %v3755_v31 = vpop.eup %3754  ;;  %v3264_v10 = vadd.f32 -1.0, %v3753_v28  ;;  %v691_v13 = vmin.f32 %v4506_v23, 0.0  ;;  %v3700_v44 = vld [vmem:[#allocation3 + $0x68] ss:$12 sps:$4 sm:$0xff]   ;;  %3764 = vpow2.f32 %v327_v24 }
 0x127   :  { %v916_v39 = vpack.c.bf16 %v810_v29, %v808_v17  ;;  %v738_v28 = vmul.f32 1.442695, %v689_v3  ;;  %v3212_v17 = vadd.f32 -1.0, %v3755_v31  ;;  %v736_v41 = vmul.f32 1.442695, %v688_v33 }
 0x128   :  { %v611_v38 = vpop.f32.mrb[20].mxu1  ;;  %1721 = vmatpush1.bf16.msra.mxu0 %v3677_v8  ;;  %3500 = vmatpush3.bf16.msra.mxu1 %v3692_v12  ;;  %v811_v4 = vsel %vm651_vm14, %v4433_v6, %v3264_v10  ;;  %v3704_v8 = vld [vmem:[#allocation3 + $0x140] ss:$12 sps:$4 sm:$0xff]   ;;  %v742_v1 = vmul.f32 1.442695, %v691_v13  ;;  %vm654_vm2 = vcmp.gt.f32.partialorder %v4458_v40, 0.0  ;;  %v421_v3 = vsel %vm261_vm15, %v4386_v18, %v3210_v48 }
 0x129   :  { %v613_v55 = vpop.f32.mrb[21].mxu1  ;;  %1722 = vmatprep.subr.bf16.mxu0 %v3683_v56  ;;  %3501 = vmatprep.subr.bf16.mxu1 %v3696_v54  ;;  %v917_v29 = vpack.c.bf16 %v811_v4, %v809_v61  ;;  %v4531_v56 = vpop.f32.mrb[20].mxu0  ;;  %v740_v54 = vmul.f32 1.442695, %v690_v35  ;;  %v4541_v33 = vadd.f32 %v611_v38, %v4338_v46  ;;  %v3685_v35 = vld [vmem:[#allocation3 + $0x78] ss:$12 sps:$4 sm:$0xff]   ;;  %v423_v38 = vsel %vm263_vm0, %v4401_v30, %v3212_v17 }
 0x12a   :  { %v3757_v57 = vpop.eup %3756  ;;  %v615_v12 = vpop.f32.mrb[22].mxu1  ;;  %v4528_v42 = vadd.f32 %v613_v55, %v4341_v47  ;;  %3766 = vpow2.f32 %v742_v1  ;;  %vm655_vm3 = vcmp.gt.f32.partialorder %v4471_v14, 0.0  ;;  %v3691_v48 = vld [vmem:[#allocation3 + $0x94] ss:$12 sps:$4 sm:$0xff]   ;;  %v3716_v6 = vld [vmem:[#allocation3 + $0x98] ss:$12 sps:$4 sm:$0xff]  }
 0x12b   :  { %v617_v36 = vpop.f32.mrb[23].mxu1  ;;  %v3759_v21 = vpop.eup %3758  ;;  %1300 = vmatprep.mubr.bf16.mxu0 %v917_v29  ;;  %1409 = vmatprep.mubr.bf16.mxu1 %v917_v29  ;;  %v3266_v24 = vadd.f32 -1.0, %v3757_v57  ;;  %3768 = vpow2.f32 %v738_v28  ;;  %v4550_v18 = vadd.f32 %v615_v12, %v4338_v46  ;;  %v3708_v4 = vld [vmem:[#allocation3 + $0x80] ss:$12 sps:$4 sm:$0xff]   ;;  %v3712_v28 = vld [vmem:[#allocation3 + $0x158] ss:$12 sps:$4 sm:$0xff]  }
 0x12c   :  { %v4538_v31 = vpop.f32.mrb[21].mxu0  ;;  %v3761_v10 = vpop.eup %3760  ;;  %v4544_v13 = vadd.f32 %v617_v36, %v4341_v47  ;;  %1301 = vmatmul.mubr.bf16.gmra.mrb[40].mxu0 %v916_v39  ;;  %1410 = vmatmul.mubr.bf16.gmra.mrb[40].mxu1 %v916_v39  ;;  %v3267_v39 = vadd.f32 -1.0, %v3759_v21  ;;  %3770 = vpow2.f32 %v736_v41  ;;  %v693_v29 = vmin.f32 %v4528_v42, 0.0 }
 0x12d   :  { %v4546_v55 = vpop.f32.mrb[22].mxu0  ;;  %v3763_v61 = vpop.eup %3762  ;;  %1723 = vmatpush1.bf16.msra.mxu0 %v3681_v37  ;;  %3502 = vmatpush3.bf16.msra.mxu1 %v3700_v44  ;;  %v3265_v12 = vadd.f32 -1.0, %v3761_v10  ;;  %3772 = vpow2.f32 %v740_v54  ;;  %v4559_v36 = vpack.c.bf16 %v423_v38, %v421_v3  ;;  %v692_v44 = vmin.f32 %v4541_v33, 0.0  ;;  %v3695_v54 = vld [vmem:[#allocation3 + $0xac] ss:$12 sps:$4 sm:$0xff]  }
 0x12e   :  { %v4555_v57 = vpop.f32.mrb[23].mxu0  ;;  %v3268_v1 = vadd.f32 -1.0, %v3763_v61  ;;  %1724 = vmatprep.subr.bf16.mxu0 %v3687_v32  ;;  %3503 = vmatprep.subr.bf16.mxu1 %v3704_v8  ;;  %v695_v37 = vmin.f32 %v4544_v13, 0.0  ;;  %v813_v41 = vsel %vm653_vm1, %v4453_v34, %v3266_v24  ;;  %v3689_v8 = vld [vmem:[#allocation3 + $0x90] ss:$12 sps:$4 sm:$0xff]   ;;  %v694_v3 = vmin.f32 %v4550_v18, 0.0 }
 0x12f   :  { %6371 = vst [vmem:[#allocation15_spill] sm:$0xff] %v4559_v36  ;;  %v746_v45 = vmul.f32 1.442695, %v693_v29  ;;  %vm652_vm4 = vcmp.gt.f32.partialorder %v4445_v51, 0.0  ;;  %vm656_vm5 = vcmp.gt.f32.partialorder %v4491_v52, 0.0  ;;  %vm659_vm6 = vcmp.gt.f32.partialorder %v4506_v23, 0.0 }
 0x130   :  { %v621_v30 = vpop.f32.mrb[24].mxu1  ;;  %v815_v32 = vsel %vm655_vm3, %v4471_v14, %v3268_v1  ;;  %v750_v10 = vmul.f32 1.442695, %v695_v37  ;;  %v814_v14 = vsel %vm654_vm2, %v4458_v40, %v3267_v39  ;;  %v3720_v1 = vld [vmem:[#allocation3 + $0x170] ss:$12 sps:$4 sm:$0xff]   ;;  %v6373_v37 = vmin.f32 %v4500_v49, 0.0 }
 0x131   :  { %v4563_v17 = vadd.f32 %v621_v30, %v4338_v46  ;;  %v623_v21 = vpop.f32.mrb[25].mxu1  ;;  %1725 = vmatpush1.bf16.msra.mxu0 %v3685_v35  ;;  %v919_v30 = vpack.c.bf16 %v815_v32, %v813_v41  ;;  %3504 = vmatpush3.bf16.msra.mxu1 %v3708_v4  ;;  %v4581_v35 = vpop.f32.mrb[24].mxu0  ;;  %v744_v32 = vmul.f32 1.442695, %v692_v44  ;;  %v812_v39 = vsel %vm652_vm4, %v4445_v51, %v3265_v12  ;;  %v3699_v51 = vld [vmem:[#allocation3 + $0xc4] ss:$12 sps:$4 sm:$0xff]  }
 0x132   :  { %v4573_v61 = vadd.f32 %v623_v21, %v4341_v47  ;;  %v625_v38 = vpop.f32.mrb[26].mxu1  ;;  %1726 = vmatprep.subr.bf16.mxu0 %v3691_v48  ;;  %3505 = vmatprep.subr.bf16.mxu1 %v3712_v28  ;;  %6372 = vst [vmem:[#allocation16_spill] sm:$0xff] %v4581_v35  ;;  %v331_v4 = vmul.f32 1.442695, %v6373_v37  ;;  %v4587_v21 = vpop.f32.mrb[25].mxu0  ;;  %3774 = vpow2.f32 %v750_v10  ;;  %v918_v37 = vpack.c.bf16 %v814_v14, %v812_v39 }
 0x133   :  { %v4576_v34 = vadd.f32 %v625_v38, %v4338_v46  ;;  %v627_v24 = vpop.f32.mrb[27].mxu1  ;;  %v696_v29 = vmin.f32 %v4563_v17, 0.0  ;;  %1310 = vmatprep.mubr.bf16.mxu0 %v919_v30  ;;  %1417 = vmatprep.mubr.bf16.mxu1 %v919_v30  ;;  %6374 = vst [vmem:[#allocation17_spill] sm:$0xff] %v4587_v21  ;;  %v3765_v41 = vpop.eup %3764  ;;  %v3693_v28 = vld [vmem:[#allocation3 + $0xa8] ss:$12 sps:$4 sm:$0xff]   ;;  %3776 = vpow2.f32 %v746_v45  ;;  %vm657_vm7 = vcmp.gt.f32.partialorder %v4488_v59, 0.0 }
 0x134   :  { %v697_v40 = vmin.f32 %v4573_v61, 0.0  ;;  %v4591_v48 = vadd.f32 %v627_v24, %v4341_v47  ;;  %v4594_v38 = vpop.f32.mrb[26].mxu0  ;;  %v748_v43 = vmul.f32 1.442695, %v694_v3  ;;  %v3724_v30 = vld [vmem:[#allocation3 + $0xb0] ss:$12 sps:$4 sm:$0xff]   ;;  %v3767_v21 = vpop.eup %3766  ;;  %v4601_v24 = vadd.f32 %v4379_v15, %v4367_v7  ;;  %1311 = vmatmul.mubr.bf16.gmra.mrb[44].mxu0 %v918_v37  ;;  %1418 = vmatmul.mubr.bf16.gmra.mrb[44].mxu1 %v918_v37 }
 0x135   :  { %6375 = vst [vmem:[#allocation18_spill] sm:$0xff] %v4594_v38  ;;  %1727 = vmatpush1.bf16.msra.mxu0 %v3689_v8  ;;  %3506 = vmatpush3.bf16.msra.mxu1 %v3716_v6  ;;  %v4596_v36 = vpop.f32.mrb[27].mxu0  ;;  %v698_v44 = vmin.f32 %v4576_v34, 0.0  ;;  %v3769_v12 = vpop.eup %3768  ;;  %3778 = vpow2.f32 %v331_v4  ;;  %v752_v3 = vmul.f32 1.442695, %v696_v29  ;;  %v4606_v6 = vadd.f32 %v4388_v19, %v4397_v27 }
 0x136   :  { %6376 = vst [vmem:[#allocation19_spill] sm:$0xff] %v4596_v36  ;;  %1728 = vmatprep.subr.bf16.mxu0 %v3695_v54  ;;  %3507 = vmatprep.subr.bf16.mxu1 %v3720_v1  ;;  %v699_v8 = vmin.f32 %v4591_v48, 0.0  ;;  %v3697_v10 = vld [vmem:[#allocation3 + $0xc0] ss:$12 sps:$4 sm:$0xff]   ;;  %v3771_v14 = vpop.eup %3770  ;;  %3780 = vpow2.f32 %v744_v32  ;;  %v754_v15 = vmul.f32 1.442695, %v697_v40  ;;  %v4610_v54 = vadd.f32 %v4391_v22, %v4367_v7 }
 0x137   :  { %v3703_v29 = vld [vmem:[#allocation3 + $0xdc] ss:$12 sps:$4 sm:$0xff]   ;;  %v3773_v39 = vpop.eup %3772  ;;  %v3272_v37 = vadd.f32 -1.0, %v3767_v21  ;;  %3782 = vpow2.f32 %v748_v43  ;;  %v4615_v36 = vadd.f32 -1.0, %v3765_v41  ;;  %v3270_v32 = vadd.f32 -1.0, %v3769_v12 }
 0x138   :  { %v631_v45 = vpop.f32.mrb[28].mxu1  ;;  %v758_v19 = vmul.f32 1.442695, %v699_v8  ;;  %v756_v40 = vmul.f32 1.442695, %v698_v44  ;;  %v297_v22 = vmin.f32 %v4601_v24, 0.0  ;;  %3784 = vpow2.f32 %v752_v3 }
 0x139   :  { %v4613_v1 = vadd.f32 %v631_v45, %v4338_v46  ;;  %v633_v4 = vpop.f32.mrb[29].mxu1  ;;  %1729 = vmatpush1.bf16.msra.mxu0 %v3693_v28  ;;  %3508 = vmatpush3.bf16.msra.mxu1 %v3724_v30  ;;  %v3269_v45 = vadd.f32 -1.0, %v3771_v14  ;;  %v298_v43 = vmin.f32 %v4606_v6, 0.0  ;;  %v4621_v21 = vpop.f32.mrb[28].mxu0  ;;  %v3271_v41 = vadd.f32 -1.0, %v3773_v39 }
 0x13a   :  { %v635_v38 = vpop.f32.mrb[30].mxu1  ;;  %1730 = vmatprep.subr.bf16.mxu0 %v3699_v51  ;;  %3786 = vpow2.f32 %v754_v15  ;;  %v4624_v28 = vadd.f32 %v633_v4, %v4341_v47  ;;  %v4629_v44 = vpop.f32.mrb[29].mxu0  ;;  %vm658_vm8 = vcmp.gt.f32.partialorder %v4496_v5, 0.0  ;;  %v819_v51 = vsel %vm659_vm6, %v4506_v23, %v3272_v37 }
 0x13b   :  { %v637_v35 = vpop.f32.mrb[31].mxu1  ;;  %v4627_v30 = vadd.f32 %v635_v38, %v4338_v46  ;;  %3788 = vpow2.f32 %v758_v19  ;;  %v4634_v12 = vpop.f32.mrb[30].mxu0  ;;  %v333_v3 = vmul.f32 1.442695, %v297_v22  ;;  %v817_v14 = vsel %vm657_vm7, %v4488_v59, %v3270_v32  ;;  %v3701_v46 = vld [vmem:[#allocation3 + $0xd8] ss:$12 sps:$4 sm:$0xff]  }
 0x13c   :  { %6377 = vst [vmem:[#allocation20_spill] sm:$0xff] %v4634_v12  ;;  %3790 = vpow2.f32 %v756_v40  ;;  %v701_v8 = vmin.f32 %v4624_v28, 0.0  ;;  %v4638_v38 = vpop.f32.mrb[31].mxu0  ;;  %v3775_v15 = vpop.eup %3774  ;;  %vm661_vm9 = vcmp.gt.f32.partialorder %v4528_v42, 0.0  ;;  %v335_v4 = vmul.f32 1.442695, %v298_v43 }
 0x13d   :  { %1731 = vmatpush1.bf16.msra.mxu0 %v3697_v10  ;;  %6378 = vst [vmem:[#allocation21_spill] sm:$0xff] %v4638_v38  ;;  %v4643_v23 = vadd.f32 %v4394_v25, %v4397_v27  ;;  %v700_v10 = vmin.f32 %v4613_v1, 0.0  ;;  %v921_v39 = vpack.c.bf16 %v819_v51, %v817_v14  ;;  %v3777_v37 = vpop.eup %3776  ;;  %v702_v19 = vmin.f32 %v4627_v30, 0.0  ;;  %v3707_v40 = vld [vmem:[#allocation3 + $0xf4] ss:$12 sps:$4 sm:$0xff]  }
 0x13e   :  { %1732 = vmatprep.subr.bf16.mxu0 %v3703_v29  ;;  %v4648_v59 = vadd.f32 %v637_v35, %v4341_v47  ;;  %v816_v29 = vsel %vm656_vm5, %v4491_v52, %v3269_v45  ;;  %v818_v32 = vsel %vm658_vm8, %v4496_v5, %v3271_v41  ;;  %vm660_vm10 = vcmp.gt.f32.partialorder %v4541_v33, 0.0  ;;  %v3705_v41 = vld [vmem:[#allocation3 + $0xf0] ss:$12 sps:$4 sm:$0xff]  }
 0x13f   :  { %v3779_v25 = vpop.eup %3778  ;;  %vm662_vm11 = vcmp.gt.f32.partialorder %v4550_v18, 0.0  ;;  %vm663_vm12 = vcmp.gt.f32.partialorder %v4544_v13, 0.0  ;;  %v299_v22 = vmin.f32 %v4610_v54, 0.0  ;;  %v762_v47 = vmul.f32 1.442695, %v701_v8  ;;  %1320 = vmatprep.mubr.bf16.mxu0 %v921_v39  ;;  %1425 = vmatprep.mubr.bf16.mxu1 %v921_v39 }
 0x140   :  { %v920_v35 = vpack.c.bf16 %v818_v32, %v816_v29  ;;  %v3781_v43 = vpop.eup %3780  ;;  %v3276_v52 = vadd.f32 -1.0, %v3775_v15  ;;  %3792 = vpow2.f32 %v333_v3  ;;  %v703_v45 = vmin.f32 %v4648_v59, 0.0  ;;  %v3711_v39 = vld [vmem:[#allocation3 + $0x10c] ss:$12 sps:$4 sm:$0xff]  }
 0x141   :  { %v4663_v5 = vadd.f32 %v4417_v50, %v4367_v7  ;;  %1733 = vmatpush1.bf16.msra.mxu0 %v3701_v46  ;;  %v3783_v51 = vpop.eup %3782  ;;  %v3274_v14 = vadd.f32 -1.0, %v3777_v37  ;;  %3794 = vpow2.f32 %v335_v4  ;;  %v300_v38 = vmin.f32 %v4643_v23, 0.0 }
 0x142   :  { %v760_v8 = vmul.f32 1.442695, %v700_v10  ;;  %1321 = vmatmul.mubr.bf16.gmra.mrb[48].mxu0 %v920_v35  ;;  %1426 = vmatmul.mubr.bf16.gmra.mrb[48].mxu1 %v920_v35  ;;  %v764_v29 = vmul.f32 1.442695, %v702_v19  ;;  %v766_v15 = vmul.f32 1.442695, %v703_v45  ;;  %v4668_v3 = vadd.f32 %v4421_v60, %v4397_v27  ;;  %v3785_v46 = vpop.eup %3784 }
 0x143   :  { %v4672_v50 = vadd.f32 %v4427_v2, %v4367_v7  ;;  %1734 = vmatprep.subr.bf16.mxu0 %v3707_v40  ;;  %v3273_v37 = vadd.f32 -1.0, %v3781_v43  ;;  %v337_v4 = vmul.f32 1.442695, %v299_v22  ;;  %3796 = vpow2.f32 %v762_v47  ;;  %v3709_v2 = vld [vmem:[#allocation3 + $0x108] ss:$12 sps:$4 sm:$0xff]  }
 0x144   :  { %v4676_v10 = vadd.f32 %v4438_v11, %v4397_v27  ;;  %v3787_v32 = vpop.eup %3786  ;;  %v3275_v19 = vadd.f32 -1.0, %v3783_v51  ;;  %3798 = vpow2.f32 %v766_v15  ;;  %v301_v35 = vmin.f32 %v4663_v5, 0.0 }
 0x145   :  { %v823_v60 = vsel %vm663_vm12, %v4544_v13, %v3276_v52  ;;  %1735 = vmatpush1.bf16.msra.mxu0 %v3705_v41  ;;  %v3789_v40 = vpop.eup %3788  ;;  %v4682_v45 = vadd.f32 -1.0, %v3779_v25  ;;  %vm665_vm13 = vcmp.gt.f32.partialorder %v4573_v61, 0.0  ;;  %3800 = vpow2.f32 %v760_v8  ;;  %v3715_v52 = vld [vmem:[#allocation3 + $0x124] ss:$12 sps:$4 sm:$0xff]  }
 0x146   :  { %v302_v11 = vmin.f32 %v4668_v3, 0.0  ;;  %1736 = vmatprep.subr.bf16.mxu0 %v3711_v39  ;;  %v3791_v22 = vpop.eup %3790  ;;  %vm664_vm14 = vcmp.gt.f32.partialorder %v4563_v17, 0.0  ;;  %v339_v47 = vmul.f32 1.442695, %v300_v38  ;;  %3802 = vpow2.f32 %v764_v29  ;;  %v3713_v29 = vld [vmem:[#allocation3 + $0x120] ss:$12 sps:$4 sm:$0xff]  }
 0x147   :  { %v303_v43 = vmin.f32 %v4672_v50, 0.0  ;;  %v821_v13 = vsel %vm661_vm9, %v4528_v42, %v3274_v14  ;;  %v3278_v25 = vadd.f32 -1.0, %v3787_v32  ;;  %3804 = vpow2.f32 %v337_v4  ;;  %v3719_v32 = vld [vmem:[#allocation3 + $0x13c] ss:$12 sps:$4 sm:$0xff]  }
 0x148   :  { %v304_v41 = vmin.f32 %v4676_v10, 0.0  ;;  %v923_v51 = vpack.c.bf16 %v823_v60, %v821_v13  ;;  %v3280_v8 = vadd.f32 -1.0, %v3789_v40  ;;  %v341_v15 = vmul.f32 1.442695, %v301_v35 }
 0x149   :  { %v820_v39 = vsel %vm660_vm10, %v4541_v33, %v3273_v37  ;;  %v822_v38 = vsel %vm662_vm11, %v4550_v18, %v3275_v19  ;;  %1737 = vmatpush1.bf16.msra.mxu0 %v3709_v2  ;;  %v343_v12 = vmul.f32 1.442695, %v302_v11  ;;  %v4700_v14 = vadd.f32 %v4460_v53, %v4367_v7 }
 0x14a   :  { %1330 = vmatprep.mubr.bf16.mxu0 %v923_v51  ;;  %1433 = vmatprep.mubr.bf16.mxu1 %v923_v51  ;;  %v922_v42 = vpack.c.bf16 %v822_v38, %v820_v39  ;;  %v4704_v4 = vadd.f32 %v4463_v63, %v4397_v27  ;;  %v4706_v33 = vpop.eup %3792  ;;  %3806 = vpow2.f32 %v339_v47  ;;  %v345_v37 = vmul.f32 1.442695, %v303_v43 }
 0x14b   :  { %v4710_v18 = vadd.f32 %v4467_v9, %v4367_v7  ;;  %v4714_v19 = vadd.f32 %v4473_v16, %v4397_v27  ;;  %1738 = vmatprep.subr.bf16.mxu0 %v3715_v52  ;;  %v4716_v53 = vpop.eup %3794  ;;  %v3277_v35 = vadd.f32 -1.0, %v3785_v46  ;;  %v3279_v60 = vadd.f32 -1.0, %v3791_v22  ;;  %v3717_v22 = vld [vmem:[#allocation3 + $0x138] ss:$12 sps:$4 sm:$0xff]  }
 0x14c   :  { %v347_v63 = vmul.f32 1.442695, %v304_v41  ;;  %1331 = vmatmul.mubr.bf16.gmra.mrb[52].mxu0 %v922_v42  ;;  %1434 = vmatmul.mubr.bf16.gmra.mrb[52].mxu1 %v922_v42  ;;  %v305_v2 = vmin.f32 %v4700_v14, 0.0  ;;  %vm667_vm15 = vcmp.gt.f32.partialorder %v4591_v48, 0.0  ;;  %3808 = vpow2.f32 %v341_v15  ;;  %v3723_v41 = vld [vmem:[#allocation3 + $0x154] ss:$12 sps:$4 sm:$0xff]  }
 0x14d   :  { %v306_v9 = vmin.f32 %v4704_v4, 0.0  ;;  %v307_v40 = vmin.f32 %v4710_v18, 0.0  ;;  %1739 = vmatpush1.bf16.msra.mxu0 %v3713_v29  ;;  %v3797_v16 = vpop.eup %3796  ;;  %vm262_vm0 = vcmp.gt.f32.partialorder %v4449_v0, 0.0  ;;  %vm264_vm1 = vcmp.gt.f32.partialorder %v4500_v49, 0.0 }
 0x14e   :  { %vm666_vm2 = vcmp.gt.f32.partialorder %v4576_v34, 0.0  ;;  %3810 = vpow2.f32 %v343_v12  ;;  %v825_v46 = vsel %vm665_vm13, %v4573_v61, %v3278_v25  ;;  %v827_v11 = vsel %vm667_vm15, %v4591_v48, %v3280_v8  ;;  %1740 = vmatprep.subr.bf16.mxu0 %v3719_v32  ;;  %v3799_v47 = vpop.eup %3798 }
 0x14f   :  { %vm668_vm3 = vcmp.gt.f32.partialorder %v4613_v1, 0.0  ;;  %3812 = vpow2.f32 %v345_v37  ;;  %v349_v43 = vmul.f32 1.442695, %v305_v2  ;;  %v308_v13 = vmin.f32 %v4714_v19, 0.0  ;;  %v3801_v51 = vpop.eup %3800  ;;  %v3721_v37 = vld [vmem:[#allocation3 + $0x150] ss:$12 sps:$4 sm:$0xff]  }
 0x150   :  { %v925_v52 = vpack.c.bf16 %v827_v11, %v825_v46  ;;  %3814 = vpow2.f32 %v347_v63  ;;  %v351_v12 = vmul.f32 1.442695, %v306_v9  ;;  %v824_v61 = vsel %vm664_vm14, %v4563_v17, %v3277_v35  ;;  %v3803_v25 = vpop.eup %3802  ;;  %v3725_v11 = vld [vmem:[#allocation3 + $0x168] ss:$12 sps:$4 sm:$0xff]  }
 0x151   :  { %v826_v48 = vsel %vm666_vm2, %v4576_v34, %v3279_v60  ;;  %v3282_v8 = vadd.f32 -1.0, %v3797_v16  ;;  %v353_v15 = vmul.f32 1.442695, %v307_v40  ;;  %v4739_v38 = vadd.f32 %v4493_v62, %v4367_v7  ;;  %v4741_v29 = vpop.eup %3804  ;;  %1741 = vmatpush1.bf16.msra.mxu0 %v3717_v22 }
 0x152   :  { %1340 = vmatprep.mubr.bf16.mxu0 %v925_v52  ;;  %1441 = vmatprep.mubr.bf16.mxu1 %v925_v52  ;;  %v924_v39 = vpack.c.bf16 %v826_v48, %v824_v61  ;;  %v3284_v42 = vadd.f32 -1.0, %v3799_v47  ;;  %v4745_v17 = vadd.f32 %v4502_v20, %v4397_v27  ;;  %v4749_v34 = vadd.f32 %v4508_v26, %v4367_v7  ;;  %v3727_v20 = vld [vmem:[#allocation3 + $0x16c] ss:$12 sps:$4 sm:$0xff]  }
 0x153   :  { %v4753_v32 = vadd.f32 %v4514_v58, %v4397_v27  ;;  %vm266_vm4 = vcmp.gt.f32.partialorder %v4606_v6, 0.0  ;;  %vm669_vm5 = vcmp.gt.f32.partialorder %v4624_v28, 0.0  ;;  %3816 = vpow2.f32 %v349_v43  ;;  %1742 = vmatprep.subr.bf16.mxu0 %v3723_v41 }
 0x154   :  { %v355_v62 = vmul.f32 1.442695, %v308_v13  ;;  %v309_v35 = vmin.f32 %v4739_v38, 0.0  ;;  %v3281_v60 = vadd.f32 -1.0, %v3801_v51  ;;  %v3283_v63 = vadd.f32 -1.0, %v3803_v25  ;;  %1341 = vmatmul.mubr.bf16.gmra.mrb[56].mxu0 %v924_v39  ;;  %1442 = vmatmul.mubr.bf16.gmra.mrb[56].mxu1 %v924_v39  ;;  %v3807_v58 = vpop.eup %3806 }
 0x155   :  { %3818 = vpow2.f32 %v351_v12  ;;  %v310_v26 = vmin.f32 %v4745_v17, 0.0  ;;  %vm268_vm6 = vcmp.gt.f32.partialorder %v4643_v23, 0.0  ;;  %vm670_vm7 = vcmp.gt.f32.partialorder %v4627_v30, 0.0  ;;  %1743 = vmatpush1.bf16.msra.mxu0 %v3721_v37 }
 0x156   :  { %vm671_vm8 = vcmp.gt.f32.partialorder %v4648_v59, 0.0  ;;  %3820 = vpow2.f32 %v353_v15  ;;  %v311_v2 = vmin.f32 %v4749_v34, 0.0  ;;  %v357_v9 = vmul.f32 1.442695, %v309_v35  ;;  %v3809_v22 = vpop.eup %3808  ;;  %1744 = vmatprep.subr.bf16.mxu0 %v3727_v20  ;;  %v6379_v15 = vld [vmem:[#allocation16_spill] sm:$0xff] }
 0x157   :  { %v312_v40 = vmin.f32 %v4753_v32, 0.0  ;;  %v829_v16 = vsel %vm669_vm5, %v4624_v28, %v3282_v8  ;;  %v831_v46 = vsel %vm671_vm8, %v4648_v59, %v3284_v42  ;;  %v4769_v47 = vadd.f32 -1.0, %v4706_v33 }
 0x158   :  { %3822 = vpow2.f32 %v355_v62  ;;  %v359_v43 = vmul.f32 1.442695, %v310_v26  ;;  %v927_v13 = vpack.c.bf16 %v831_v46, %v829_v16  ;;  %v3811_v52 = vpop.eup %3810  ;;  %v361_v41 = vmul.f32 1.442695, %v311_v2  ;;  %v6380_v2 = vld [vmem:[#allocation17_spill] sm:$0xff] }
 0x159   :  { %v828_v51 = vsel %vm668_vm3, %v4613_v1, %v3281_v60  ;;  %v830_v28 = vsel %vm670_vm7, %v4627_v30, %v3283_v63  ;;  %v4779_v59 = vadd.f32 %v4531_v56, %v4367_v7  ;;  %v3813_v33 = vpop.eup %3812  ;;  %v363_v12 = vmul.f32 1.442695, %v312_v40  ;;  %1745 = vmatpush1.bf16.msra.mxu0 %v3725_v11  ;;  %v6381_v40 = vld [vmem:[#allocation18_spill] sm:$0xff] }
 0x15a   :  { %1350 = vmatprep.mubr.bf16.mxu0 %v927_v13  ;;  %1449 = vmatprep.mubr.bf16.mxu1 %v927_v13  ;;  %v926_v61 = vpack.c.bf16 %v830_v28, %v828_v51  ;;  %v422_v48 = vsel %vm262_vm0, %v4449_v0, %v4615_v36  ;;  %v424_v1 = vsel %vm264_vm1, %v4500_v49, %v4682_v45  ;;  %v3815_v30 = vpop.eup %3814  ;;  %vm265_vm9 = vcmp.gt.f32.partialorder %v4601_v24, 0.0 }
 0x15b   :  { %v3215_v56 = vadd.f32 -1.0, %v4716_v53  ;;  %vm267_vm10 = vcmp.gt.f32.partialorder %v4610_v54, 0.0  ;;  %3824 = vpow2.f32 %v357_v9  ;;  %v313_v25 = vmin.f32 %v4779_v59, 0.0 }
 0x15c   :  { %v833_v8 = vpack.c.bf16 %v424_v1, %v422_v48  ;;  %3826 = vpow2.f32 %v359_v43  ;;  %v4795_v0 = vadd.f32 %v4538_v31, %v4397_v27  ;;  %v4799_v49 = vadd.f32 %v4546_v55, %v4367_v7  ;;  %1351 = vmatmul.mubr.bf16.gmra.mrb[60].mxu0 %v926_v61  ;;  %1450 = vmatmul.mubr.bf16.gmra.mrb[60].mxu1 %v926_v61  ;;  %v6383_v48 = vld [vmem:[#allocation19_spill] sm:$0xff] }
 0x15d   :  { %v4803_v36 = vadd.f32 %v4555_v57, %v4397_v27  ;;  %v3217_v45 = vadd.f32 -1.0, %v3807_v58  ;;  %3828 = vpow2.f32 %v361_v41  ;;  %v365_v53 = vmul.f32 1.442695, %v313_v25  ;;  %v3817_v42 = vpop.eup %3816 }
 0x15e   :  { %v4807_v39 = vadd.f32 %v6379_v15, %v4367_v7  ;;  %v3216_v31 = vadd.f32 -1.0, %v4741_v29  ;;  %vm270_vm11 = vcmp.gt.f32.partialorder %v4668_v3, 0.0  ;;  %3830 = vpow2.f32 %v363_v12  ;;  %1746 = vmatprep.mubr.bf16.mxu0 %v833_v8  ;;  %1859 = vmatprep.mubr.bf16.mxu1 %v833_v8 }
 0x15f   :  { %v314_v55 = vmin.f32 %v4795_v0, 0.0  ;;  %v3819_v57 = vpop.eup %3818  ;;  %vm272_vm12 = vcmp.gt.f32.partialorder %v4676_v10, 0.0  ;;  %3832 = vpow2.f32 %v365_v53  ;;  %v315_v37 = vmin.f32 %v4799_v49, 0.0 }
 0x160   :  { %v426_v62 = vsel %vm266_vm4, %v4606_v6, %v3215_v56  ;;  %v3821_v35 = vpop.eup %3820  ;;  %v4817_v20 = vadd.f32 -1.0, %v3809_v22  ;;  %v316_v60 = vmin.f32 %v4803_v36, 0.0  ;;  %v317_v63 = vmin.f32 %v4807_v39, 0.0 }
 0x161   :  { %v367_v29 = vmul.f32 1.442695, %v314_v55  ;;  %v369_v26 = vmul.f32 1.442695, %v315_v37  ;;  %v428_v58 = vsel %vm268_vm6, %v4643_v23, %v3217_v45  ;;  %v4826_v9 = vadd.f32 %v6380_v2, %v4397_v27 }
 0x162   :  { %v4830_v6 = vadd.f32 %v6381_v40, %v4367_v7  ;;  %v3823_v16 = vpop.eup %3822  ;;  %vm269_vm13 = vcmp.gt.f32.partialorder %v4663_v5, 0.0  ;;  %vm271_vm14 = vcmp.gt.f32.partialorder %v4672_v50, 0.0  ;;  %v371_v46 = vmul.f32 1.442695, %v316_v60 }
 0x163   :  { %3834 = vpow2.f32 %v367_v29  ;;  %v373_v11 = vmul.f32 1.442695, %v317_v63  ;;  %v835_v22 = vpack.c.bf16 %v428_v58, %v426_v62  ;;  %v3219_v43 = vadd.f32 -1.0, %v3811_v52  ;;  %v6382_v52 = vld [vmem:[#allocation15_spill] sm:$0xff]  ;;  %v6385_v63 = vld [vmem:[#allocation21_spill] sm:$0xff] }
 0x164   :  { %v4834_v13 = vadd.f32 -1.0, %v3813_v33  ;;  %3836 = vpow2.f32 %v369_v26  ;;  %v318_v23 = vmin.f32 %v4826_v9, 0.0  ;;  %v3221_v41 = vadd.f32 -1.0, %v3815_v30  ;;  %1747 = vmatmul.mubr.bf16.vlgmr.msra.gmra.mrb[32].mxu0 %v6382_v52  ;;  %1860 = vmatmul.mubr.bf16.vlgmr.msra.gmra.mrb[64].mxu1 %v6382_v52 }
 0x165   :  { %v4837_v51 = vadd.f32 -1.0, %v3817_v42  ;;  %vm274_vm15 = vcmp.gt.f32.partialorder %v4704_v4, 0.0  ;;  %3838 = vpow2.f32 %v371_v46  ;;  %v319_v28 = vmin.f32 %v4830_v6, 0.0  ;;  %v3825_v12 = vpop.eup %3824  ;;  %1756 = vmatprep.mubr.bf16.mxu0 %v835_v22  ;;  %1867 = vmatprep.mubr.bf16.mxu1 %v835_v22 }
 0x166   :  { %vm273_vm0 = vcmp.gt.f32.partialorder %v4700_v14, 0.0  ;;  %v4842_v61 = vadd.f32 -1.0, %v3819_v57  ;;  %vm276_vm1 = vcmp.gt.f32.partialorder %v4714_v19, 0.0  ;;  %3840 = vpow2.f32 %v373_v11  ;;  %v3827_v30 = vpop.eup %3826 }
 0x167   :  { %v375_v33 = vmul.f32 1.442695, %v318_v23  ;;  %v4849_v1 = vadd.f32 %v6383_v48, %v4397_v27  ;;  %vm275_vm2 = vcmp.gt.f32.partialorder %v4710_v18, 0.0  ;;  %v4852_v56 = vadd.f32 -1.0, %v3821_v35  ;;  %v3829_v53 = vpop.eup %3828  ;;  %v6384_v35 = vld [vmem:[#allocation20_spill] sm:$0xff] }
 0x168   :  { %vm278_vm3 = vcmp.gt.f32.partialorder %v4745_v17, 0.0  ;;  %v377_v25 = vmul.f32 1.442695, %v319_v28  ;;  %v425_v8 = vsel %vm265_vm9, %v4601_v24, %v4769_v47  ;;  %v427_v45 = vsel %vm267_vm10, %v4610_v54, %v3216_v31  ;;  %v3831_v57 = vpop.eup %3830 }
 0x169   :  { %v3225_v15 = vadd.f32 -1.0, %v3823_v16  ;;  %vm277_vm4 = vcmp.gt.f32.partialorder %v4739_v38, 0.0  ;;  %vm280_vm5 = vcmp.gt.f32.partialorder %v4753_v32, 0.0  ;;  %3842 = vpow2.f32 %v375_v33  ;;  %v3833_v31 = vpop.eup %3832 }
 0x16a   :  { %v320_v42 = vmin.f32 %v4849_v1, 0.0  ;;  %v834_v55 = vpack.c.bf16 %v427_v45, %v425_v8  ;;  %vm279_vm6 = vcmp.gt.f32.partialorder %v4749_v34, 0.0  ;;  %vm282_vm7 = vcmp.gt.f32.partialorder %v4795_v0, 0.0 }
 0x16b   :  { %3844 = vpow2.f32 %v377_v25  ;;  %v4869_v24 = vadd.f32 %v4621_v21, %v4367_v7  ;;  %v430_v54 = vsel %vm270_vm11, %v4668_v3, %v3219_v43  ;;  %v432_v47 = vsel %vm272_vm12, %v4676_v10, %v3221_v41 }
 0x16c   :  { %vm281_vm8 = vcmp.gt.f32.partialorder %v4779_v59, 0.0  ;;  %vm284_vm10 = vcmp.gt.f32.partialorder %v4803_v36, 0.0  ;;  %v379_v37 = vmul.f32 1.442695, %v320_v42  ;;  %v837_v62 = vpack.c.bf16 %v432_v47, %v430_v54  ;;  %1757 = vmatmul.mubr.bf16.gmra.mrb[36].mxu0 %v834_v55  ;;  %1868 = vmatmul.mubr.bf16.gmra.mrb[68].mxu1 %v834_v55 }
 0x16d   :  { %v4882_v21 = vadd.f32 %v4629_v44, %v4397_v27  ;;  %v4886_v3 = vadd.f32 %v6384_v35, %v4367_v7  ;;  %v3226_v29 = vadd.f32 -1.0, %v3825_v12  ;;  %v3227_v60 = vadd.f32 -1.0, %v3827_v30  ;;  %v3835_v44 = vpop.eup %3834 }
 0x16e   :  { %v321_v10 = vmin.f32 %v4869_v24, 0.0  ;;  %v4891_v26 = vadd.f32 %v6385_v63, %v4397_v27  ;;  %v3228_v58 = vadd.f32 -1.0, %v3829_v53  ;;  %v3229_v2 = vadd.f32 -1.0, %v3831_v57  ;;  %v3837_v27 = vpop.eup %3836  ;;  %1766 = vmatprep.mubr.bf16.mxu0 %v837_v62  ;;  %1875 = vmatprep.mubr.bf16.mxu1 %v837_v62 }
 0x16f   :  { %vm285_vm11 = vcmp.gt.f32.partialorder %v4807_v39, 0.0  ;;  %vm286_vm12 = vcmp.gt.f32.partialorder %v4826_v9, 0.0  ;;  %vm287_vm9 = vcmp.gt.f32.partialorder %v4830_v6, 0.0  ;;  %3846 = vpow2.f32 %v379_v37  ;;  %v3839_v28 = vpop.eup %3838 }
 0x170   :  { %v322_v7 = vmin.f32 %v4882_v21, 0.0  ;;  %v3230_v40 = vadd.f32 -1.0, %v3833_v31  ;;  %v381_v16 = vmul.f32 1.442695, %v321_v10  ;;  %v323_v46 = vmin.f32 %v4886_v3, 0.0  ;;  %v3841_v48 = vpop.eup %3840 }
 0x171   :  { %v324_v11 = vmin.f32 %v4891_v26, 0.0  ;;  %v3231_v22 = vadd.f32 -1.0, %v3835_v44  ;;  %v429_v23 = vsel %vm269_vm13, %v4663_v5, %v4817_v20  ;;  %v431_v41 = vsel %vm271_vm14, %v4672_v50, %v4834_v13 }
 0x172   :  { %v383_v43 = vmul.f32 1.442695, %v322_v7  ;;  %v3232_v12 = vadd.f32 -1.0, %v3837_v27  ;;  %3848 = vpow2.f32 %v381_v16  ;;  %v385_v52 = vmul.f32 1.442695, %v323_v46 }
 0x173   :  { %v387_v33 = vmul.f32 1.442695, %v324_v11  ;;  %v3233_v30 = vadd.f32 -1.0, %v3839_v28  ;;  %v836_v25 = vpack.c.bf16 %v431_v41, %v429_v23  ;;  %v434_v5 = vsel %vm274_vm15, %v4704_v4, %v4842_v61  ;;  %v3843_v8 = vpop.eup %3842 }
 0x174   :  { %3850 = vpow2.f32 %v383_v43  ;;  %v3234_v20 = vadd.f32 -1.0, %v3841_v48  ;;  %v436_v50 = vsel %vm276_vm1, %v4714_v19, %v3225_v15  ;;  %v433_v13 = vsel %vm273_vm0, %v4700_v14, %v4837_v51 }
 0x175   :  { %3852 = vpow2.f32 %v385_v52  ;;  %v839_v45 = vpack.c.bf16 %v436_v50, %v434_v5  ;;  %v435_v53 = vsel %vm275_vm2, %v4710_v18, %v4852_v56  ;;  %v438_v4 = vsel %vm278_vm3, %v4745_v17, %v3227_v60  ;;  %v3845_v61 = vpop.eup %3844  ;;  %1767 = vmatmul.mubr.bf16.gmra.mrb[40].mxu0 %v836_v25  ;;  %1876 = vmatmul.mubr.bf16.gmra.mrb[72].mxu1 %v836_v25 }
 0x176   :  { %3854 = vpow2.f32 %v387_v33  ;;  %v3235_v42 = vadd.f32 -1.0, %v3843_v8  ;;  %v838_v19 = vpack.c.bf16 %v435_v53, %v433_v13  ;;  %v440_v15 = vsel %vm280_vm5, %v4753_v32, %v3229_v2 }
 0x177   :  { %v437_v14 = vsel %vm277_vm4, %v4739_v38, %v3226_v29  ;;  %v3236_v51 = vadd.f32 -1.0, %v3845_v61  ;;  %v841_v55 = vpack.c.bf16 %v440_v15, %v438_v4  ;;  %v439_v18 = vsel %vm279_vm6, %v4749_v34, %v3228_v58  ;;  %1776 = vmatprep.mubr.bf16.mxu0 %v839_v45  ;;  %1883 = vmatprep.mubr.bf16.mxu1 %v839_v45 }
 0x178   :  { %v442_v17 = vsel %vm282_vm7, %v4795_v0, %v3231_v22  ;;  %v840_v56 = vpack.c.bf16 %v439_v18, %v437_v14  ;;  %v444_v57 = vsel %vm284_vm10, %v4803_v36, %v3233_v30  ;;  %v441_v32 = vsel %vm281_vm8, %v4779_v59, %v3230_v40 }
 0x179   :  { %vm6386_vm13 = vcmp.gt.f32.partialorder %v4799_v49, 0.0  ;;  %v3847_v54 = vpop.eup %3846  ;;  %vm288_vm14 = vcmp.gt.f32.partialorder %v4849_v1, 0.0  ;;  %v843_v34 = vpack.c.bf16 %v444_v57, %v442_v17  ;;  %v446_v36 = vsel %vm286_vm12, %v4826_v9, %v3235_v42 }
 0x17a   :  { %v443_v38 = vsel %vm6386_vm13, %v4799_v49, %v3232_v12  ;;  %v3237_v47 = vadd.f32 -1.0, %v3847_v54  ;;  %v445_v59 = vsel %vm285_vm11, %v4807_v39, %v3234_v20  ;;  %v447_v49 = vsel %vm287_vm9, %v4830_v6, %v3236_v51 }
 0x17b   :  { %v842_v0 = vpack.c.bf16 %v443_v38, %v441_v32  ;;  %v844_v31 = vpack.c.bf16 %v447_v49, %v445_v59  ;;  %vm289_vm15 = vcmp.gt.f32.partialorder %v4869_v24, 0.0  ;;  %vm290_vm0 = vcmp.gt.f32.partialorder %v4882_v21, 0.0 }
 0x17c   :  { %v3849_v37 = vpop.eup %3848  ;;  %v448_v62 = vsel %vm288_vm14, %v4849_v1, %v3237_v47  ;;  %vm291_vm1 = vcmp.gt.f32.partialorder %v4886_v3, 0.0  ;;  %vm292_vm2 = vcmp.gt.f32.partialorder %v4891_v26, 0.0 }
 0x17d   :  { %v3238_v29 = vadd.f32 -1.0, %v3849_v37  ;;  %v845_v60 = vpack.c.bf16 %v448_v62, %v446_v36  ;;  %1777 = vmatmul.mubr.bf16.gmra.mrb[44].mxu0 %v838_v19  ;;  %1884 = vmatmul.mubr.bf16.gmra.mrb[76].mxu1 %v838_v19  ;;  %v6387_v62 = vld [vmem:[#allocation13_spill] sm:$0xff] }
 0x17e   :  { %v3851_v35 = vpop.eup %3850  ;;  %1786 = vmatprep.mubr.bf16.mxu0 %v841_v55  ;;  %1891 = vmatprep.mubr.bf16.mxu1 %v841_v55 }
 0x17f   :  { %v3853_v9 = vpop.eup %3852  ;;  %v3239_v10 = vadd.f32 -1.0, %v3851_v35  ;;  %v449_v6 = vsel %vm289_vm15, %v4869_v24, %v3238_v29  ;;  %v6388_v29 = vld [vmem:[#allocation14_spill] sm:$0xff] }
 0x180   :  { %v3855_v39 = vpop.eup %3854  ;;  %v3240_v63 = vadd.f32 -1.0, %v3853_v9  ;;  %v6389_v9 = vld [vmem:[#allocation12_spill] sm:$0xff] }
 0x181   :  { %v3241_v58 = vadd.f32 -1.0, %v3855_v39  ;;  %v450_v2 = vsel %vm290_vm0, %v4882_v21, %v3239_v10  ;;  %v5005_v10 = vsub.s32 2, %v6389_v9 }
 0x182   :  { %v451_v1 = vsel %vm291_vm1, %v4886_v3, %v3240_v63 }
 0x183   :  { %v452_v7 = vsel %vm292_vm2, %v4891_v26, %v3241_v58  ;;  %v846_v44 = vpack.c.bf16 %v451_v1, %v449_v6 }
 0x184   :  { %v847_v40 = vpack.c.bf16 %v452_v7, %v450_v2 }
 0x185   :  { %1787 = vmatmul.mubr.bf16.gmra.mrb[48].mxu0 %v840_v56  ;;  %1892 = vmatmul.mubr.bf16.gmra.mrb[80].mxu1 %v840_v56 }
 0x186   :  { %1796 = vmatprep.mubr.bf16.mxu0 %v843_v34  ;;  %1899 = vmatprep.mubr.bf16.mxu1 %v843_v34 }
 0x18d   :  { %1797 = vmatmul.mubr.bf16.gmra.mrb[52].mxu0 %v842_v0  ;;  %1900 = vmatmul.mubr.bf16.gmra.mrb[84].mxu1 %v842_v0 }
 0x18e   :  { %1806 = vmatprep.mubr.bf16.mxu0 %v845_v60  ;;  %1907 = vmatprep.mubr.bf16.mxu1 %v845_v60 }
 0x195   :  { %1807 = vmatmul.mubr.bf16.gmra.mrb[56].mxu0 %v844_v31  ;;  %1908 = vmatmul.mubr.bf16.gmra.mrb[88].mxu1 %v844_v31  ;;  %v1924_v31 = vld [vmem:[%s6344_s8] sm:$0x7] }
 0x196   :  { %1816 = vmatprep.mubr.bf16.mxu0 %v847_v40  ;;  %1915 = vmatprep.mubr.bf16.mxu1 %v847_v40  ;;  %v4999_v35 = vrot.slane %v1924_v31, %v6387_v62  ;;  %v5002_v60 = vrot.slane %v1924_v31, %v6388_v29 }
 0x19d   :  { %1817 = vmatmul.mubr.bf16.gmra.mrb[60].mxu0 %v846_v44  ;;  %1916 = vmatmul.mubr.bf16.gmra.mrb[92].mxu1 %v846_v44 }
 0x1ee   :  { %v3445_v24 = vpop.f32.mrb[32].mxu1 }
 0x1ef   :  { %v3446_v21 = vpop.f32.mrb[33].mxu1 }
 0x1f0   :  { %v3447_v3 = vadd.f32 %v3446_v21, %v3445_v24  ;;  %v3448_v26 = vpop.f32.mrb[34].mxu1  ;;  %v5014_v24 = vrot.slane %v1924_v31, %v5005_v10 }
 0x1f1   :  { %v3449_v16 = vpop.f32.mrb[35].mxu1 }
 0x1f2   :  { %v4965_v46 = vadd.f32 %v3449_v16, %v3448_v26 }
 0x1f6   :  { %v3451_v11 = vpop.f32.mrb[36].mxu1 }
 0x1f7   :  { %v3452_v27 = vpop.f32.mrb[37].mxu1 }
 0x1f8   :  { %v4967_v22 = vadd.f32 %v3452_v27, %v3451_v11  ;;  %v3454_v43 = vpop.f32.mrb[38].mxu1 }
 0x1f9   :  { %v3455_v23 = vpop.f32.mrb[39].mxu1 }
 0x1fa   :  { %v4969_v41 = vadd.f32 %v3455_v23, %v3454_v43 }
 0x1ff   :  { %v3457_v28 = vpop.f32.mrb[40].mxu1 }
 0x200   :  { %v3458_v12 = vpop.f32.mrb[41].mxu1 }
 0x201   :  { %v4971_v52 = vadd.f32 %v3458_v12, %v3457_v28  ;;  %v3460_v33 = vpop.f32.mrb[42].mxu1 }
 0x202   :  { %v3461_v48 = vpop.f32.mrb[43].mxu1 }
 0x203   :  { %v4973_v30 = vadd.f32 %v3461_v48, %v3460_v33 }
 0x207   :  { %v3463_v25 = vpop.f32.mrb[44].mxu1 }
 0x208   :  { %v3464_v5 = vpop.f32.mrb[45].mxu1 }
 0x209   :  { %v4975_v20 = vadd.f32 %v3464_v5, %v3463_v25  ;;  %v3466_v50 = vpop.f32.mrb[46].mxu1 }
 0x20a   :  { %v3467_v13 = vpop.f32.mrb[47].mxu1 }
 0x20b   :  { %v4977_v8 = vadd.f32 %v3467_v13, %v3466_v50 }
 0x215   :  { %v3469_v45 = vpop.f32.mrb[48].mxu1 }
 0x216   :  { %v3470_v53 = vpop.f32.mrb[49].mxu1 }
 0x217   :  { %v4979_v4 = vadd.f32 %v3470_v53, %v3469_v45  ;;  %v3472_v61 = vpop.f32.mrb[50].mxu1 }
 0x218   :  { %v3473_v42 = vpop.f32.mrb[51].mxu1 }
 0x219   :  { %v4981_v19 = vadd.f32 %v3473_v42, %v3472_v61 }
 0x21f   :  { %v3475_v15 = vpop.f32.mrb[52].mxu1 }
 0x220   :  { %v3476_v14 = vpop.f32.mrb[53].mxu1 }
 0x221   :  { %v4983_v51 = vadd.f32 %v3476_v14, %v3475_v15  ;;  %v3478_v55 = vpop.f32.mrb[54].mxu1 }
 0x222   :  { %v3479_v18 = vpop.f32.mrb[55].mxu1 }
 0x223   :  { %v4985_v17 = vadd.f32 %v3479_v18, %v3478_v55 }
 0x227   :  { %v3481_v56 = vpop.f32.mrb[56].mxu1 }
 0x228   :  { %v3482_v57 = vpop.f32.mrb[57].mxu1 }
 0x229   :  { %v4987_v32 = vadd.f32 %v3482_v57, %v3481_v56  ;;  %v3484_v38 = vpop.f32.mrb[58].mxu1 }
 0x22a   :  { %v3485_v54 = vpop.f32.mrb[59].mxu1 }
 0x22b   :  { %v4989_v34 = vadd.f32 %v3485_v54, %v3484_v38 }
 0x22f   :  { %v3487_v0 = vpop.f32.mrb[60].mxu1 }
 0x230   :  { %v3488_v47 = vpop.f32.mrb[61].mxu1 }
 0x231   :  { %v4991_v36 = vadd.f32 %v3488_v47, %v3487_v0  ;;  %v3490_v59 = vpop.f32.mrb[62].mxu1 }
 0x232   :  { %v3491_v49 = vpop.f32.mrb[63].mxu1 }
 0x233   :  { %v4996_v37 = vadd.f32 %v3491_v49, %v3490_v59 }
 0x237   :  { %v1748_v39 = vpop.f32.mrb[32].mxu0  ;;  %v3509_v63 = vpop.f32.mrb[64].mxu1 }
 0x238   :  { %v1750_v6 = vpop.f32.mrb[33].mxu0  ;;  %v3510_v58 = vpop.f32.mrb[65].mxu1  ;;  %v5008_v2 = vadd.f32 %v4999_v35, %v1748_v39 }
 0x239   :  { %v5011_v1 = vadd.f32 %v5002_v60, %v1750_v6  ;;  %v3511_v7 = vadd.f32 %v3510_v58, %v3509_v63  ;;  %v1752_v44 = vpop.f32.mrb[34].mxu0  ;;  %v3512_v40 = vpop.f32.mrb[66].mxu1 }
 0x23a   :  { %v1754_v21 = vpop.f32.mrb[35].mxu0  ;;  %v3513_v26 = vpop.f32.mrb[67].mxu1  ;;  %v5017_v27 = vadd.f32 %v4999_v35, %v1752_v44 }
 0x23b   :  { %v1862_v16 = vadd.f32 %v3511_v7, %v3447_v3  ;;  %v3514_v11 = vadd.f32 %v3513_v26, %v3512_v40  ;;  %v5020_v43 = vadd.f32 %v5002_v60, %v1754_v21  ;;  %v1996_v12 = vadd.f32 %v5011_v1, %v5008_v2 }
 0x23d   :  { %v1865_v23 = vadd.f32 %v3514_v11, %v4965_v46  ;;  %v5024_v28 = vadd.f32 %v5014_v24, %v1862_v16  ;;  %v2000_v13 = vadd.f32 %v5020_v43, %v5017_v27 }
 0x23f   :  { %v1758_v33 = vpop.f32.mrb[36].mxu0  ;;  %v3515_v48 = vpop.f32.mrb[68].mxu1  ;;  %v1997_v25 = vadd.f32 %v1996_v12, %v5024_v28  ;;  %v5030_v3 = vadd.f32 %v5014_v24, %v1865_v23 }
 0x240   :  { %v1760_v5 = vpop.f32.mrb[37].mxu0  ;;  %v3516_v50 = vpop.f32.mrb[69].mxu1  ;;  %v5035_v46 = vadd.f32 %v4999_v35, %v1758_v33 }
 0x241   :  { %v5038_v45 = vadd.f32 %v5002_v60, %v1760_v5  ;;  %v3517_v53 = vadd.f32 %v3516_v50, %v3515_v48  ;;  %v3518_v61 = vpop.f32.mrb[70].mxu1  ;;  %1998 = vadd.xlane.f32.xlu0 %v1997_v25  ;;  %v1762_v42 = vpop.f32.mrb[38].mxu0  ;;  %v2001_v56 = vadd.f32 %v2000_v13, %v5030_v3 }
 0x242   :  { %v1764_v15 = vpop.f32.mrb[39].mxu0  ;;  %v3519_v14 = vpop.f32.mrb[71].mxu1  ;;  %v5043_v57 = vadd.f32 %v4999_v35, %v1762_v42 }
 0x243   :  { %v1870_v55 = vadd.f32 %v3517_v53, %v4967_v22  ;;  %v3520_v18 = vadd.f32 %v3519_v14, %v3518_v61  ;;  %v5046_v38 = vadd.f32 %v5002_v60, %v1764_v15  ;;  %v2004_v47 = vadd.f32 %v5038_v45, %v5035_v46 }
 0x245   :  { %v1873_v54 = vadd.f32 %v3520_v18, %v4969_v41  ;;  %2002 = vadd.xlane.f32.xlu0 %v2001_v56  ;;  %v5050_v0 = vadd.f32 %v5014_v24, %v1870_v55  ;;  %v2008_v39 = vadd.f32 %v5046_v38, %v5043_v57 }
 0x247   :  { %v2005_v49 = vadd.f32 %v2004_v47, %v5050_v0  ;;  %v5056_v31 = vadd.f32 %v5014_v24, %v1873_v54 }
 0x248   :  { %v1768_v59 = vpop.f32.mrb[40].mxu0  ;;  %v3521_v22 = vpop.f32.mrb[72].mxu1 }
 0x249   :  { %v1770_v63 = vpop.f32.mrb[41].mxu0  ;;  %v3522_v6 = vpop.f32.mrb[73].mxu1  ;;  %v5061_v41 = vadd.f32 %v4999_v35, %v1768_v59  ;;  %2006 = vadd.xlane.f32.xlu1 %v2005_v49  ;;  %v2009_v16 = vadd.f32 %v2008_v39, %v5056_v31 }
 0x24a   :  { %v5064_v58 = vadd.f32 %v5002_v60, %v1770_v63  ;;  %v3523_v7 = vadd.f32 %v3522_v6, %v3521_v22  ;;  %v3524_v44 = vpop.f32.mrb[74].mxu1  ;;  %v1772_v40 = vpop.f32.mrb[42].mxu0 }
 0x24b   :  { %v1774_v21 = vpop.f32.mrb[43].mxu0  ;;  %v3525_v26 = vpop.f32.mrb[75].mxu1  ;;  %v5069_v23 = vadd.f32 %v4999_v35, %v1772_v40 }
 0x24c   :  { %v1878_v11 = vadd.f32 %v3523_v7, %v4971_v52  ;;  %v5072_v12 = vadd.f32 %v5002_v60, %v1774_v21  ;;  %v3526_v33 = vadd.f32 %v3525_v26, %v3524_v44  ;;  %v2012_v48 = vadd.f32 %v5064_v58, %v5061_v41 }
 0x24d   :  { %2010 = vadd.xlane.f32.xlu1 %v2009_v16 }
 0x24e   :  { %v1881_v25 = vadd.f32 %v3526_v33, %v4973_v30  ;;  %v5078_v5 = vadd.f32 %v5014_v24, %v1878_v11  ;;  %v2016_v50 = vadd.f32 %v5072_v12, %v5069_v23 }
 0x250   :  { %v1778_v52 = vpop.f32.mrb[44].mxu0  ;;  %v3527_v13 = vpop.f32.mrb[76].mxu1  ;;  %v2013_v53 = vadd.f32 %v2012_v48, %v5078_v5  ;;  %v5084_v61 = vadd.f32 %v5014_v24, %v1881_v25 }
 0x251   :  { %v1780_v42 = vpop.f32.mrb[45].mxu0  ;;  %v3528_v15 = vpop.f32.mrb[77].mxu1  ;;  %v5087_v14 = vadd.f32 %v4999_v35, %v1778_v52 }
 0x252   :  { %v5090_v30 = vadd.f32 %v5002_v60, %v1780_v42  ;;  %v3529_v55 = vadd.f32 %v3528_v15, %v3527_v13  ;;  %v3530_v18 = vpop.f32.mrb[78].mxu1  ;;  %2014 = vadd.xlane.f32.xlu0 %v2013_v53  ;;  %v1782_v56 = vpop.f32.mrb[46].mxu0  ;;  %v2017_v54 = vadd.f32 %v2016_v50, %v5084_v61 }
 0x253   :  { %v1784_v47 = vpop.f32.mrb[47].mxu0  ;;  %v3531_v59 = vpop.f32.mrb[79].mxu1  ;;  %v5095_v49 = vadd.f32 %v4999_v35, %v1782_v56 }
 0x254   :  { %v1886_v22 = vadd.f32 %v3529_v55, %v4975_v20  ;;  %v5098_v39 = vadd.f32 %v5002_v60, %v1784_v47  ;;  %v3532_v63 = vadd.f32 %v3531_v59, %v3530_v18  ;;  %2018 = vadd.xlane.f32.xlu1 %v2017_v54  ;;  %v2020_v6 = vadd.f32 %v5090_v30, %v5087_v14 }
 0x256   :  { %v1889_v7 = vadd.f32 %v3532_v63, %v4977_v8  ;;  %v5104_v44 = vadd.f32 %v5014_v24, %v1886_v22  ;;  %v2024_v40 = vadd.f32 %v5098_v39, %v5095_v49 }
 0x258   :  { %v1788_v20 = vpop.f32.mrb[48].mxu0  ;;  %v3533_v21 = vpop.f32.mrb[80].mxu1  ;;  %v2021_v26 = vadd.f32 %v2020_v6, %v5104_v44  ;;  %v5110_v16 = vadd.f32 %v5014_v24, %v1889_v7 }
 0x259   :  { %v1790_v11 = vpop.f32.mrb[49].mxu0  ;;  %v3534_v33 = vpop.f32.mrb[81].mxu1  ;;  %v5113_v48 = vadd.f32 %v4999_v35, %v1788_v20 }
 0x25a   :  { %v5116_v8 = vadd.f32 %v5002_v60, %v1790_v11  ;;  %v3535_v25 = vadd.f32 %v3534_v33, %v3533_v21  ;;  %v3536_v50 = vpop.f32.mrb[82].mxu1  ;;  %2022 = vadd.xlane.f32.xlu0 %v2021_v26  ;;  %v1792_v52 = vpop.f32.mrb[50].mxu0  ;;  %v2025_v13 = vadd.f32 %v2024_v40, %v5110_v16 }
 0x25b   :  { %v1794_v53 = vpop.f32.mrb[51].mxu0  ;;  %v3537_v42 = vpop.f32.mrb[83].mxu1  ;;  %v5121_v55 = vadd.f32 %v4999_v35, %v1792_v52 }
 0x25c   :  { %v1894_v15 = vadd.f32 %v3535_v25, %v4979_v4  ;;  %v5124_v18 = vadd.f32 %v5002_v60, %v1794_v53  ;;  %v3538_v56 = vadd.f32 %v3537_v42, %v3536_v50  ;;  %2026 = vadd.xlane.f32.xlu1 %v2025_v13  ;;  %v2028_v54 = vadd.f32 %v5116_v8, %v5113_v48 }
 0x25e   :  { %v1897_v47 = vadd.f32 %v3538_v56, %v4981_v19  ;;  %v5130_v59 = vadd.f32 %v5014_v24, %v1894_v15  ;;  %v2032_v22 = vadd.f32 %v5124_v18, %v5121_v55 }
 0x260   :  { %v1798_v4 = vpop.f32.mrb[52].mxu0  ;;  %v3539_v63 = vpop.f32.mrb[84].mxu1  ;;  %v2029_v6 = vadd.f32 %v2028_v54, %v5130_v59  ;;  %v5136_v7 = vadd.f32 %v5014_v24, %v1897_v47 }
 0x261   :  { %v1800_v40 = vpop.f32.mrb[53].mxu0  ;;  %v3540_v20 = vpop.f32.mrb[85].mxu1  ;;  %v5139_v21 = vadd.f32 %v4999_v35, %v1798_v4 }
 0x262   :  { %v5142_v19 = vadd.f32 %v5002_v60, %v1800_v40  ;;  %v3541_v26 = vadd.f32 %v3540_v20, %v3539_v63  ;;  %v3542_v11 = vpop.f32.mrb[86].mxu1  ;;  %2030 = vadd.xlane.f32.xlu0 %v2029_v6  ;;  %v1802_v33 = vpop.f32.mrb[54].mxu0  ;;  %v2033_v25 = vadd.f32 %v2032_v22, %v5136_v7 }
 0x263   :  { %v1804_v50 = vpop.f32.mrb[55].mxu0  ;;  %v3543_v52 = vpop.f32.mrb[87].mxu1  ;;  %v5147_v53 = vadd.f32 %v4999_v35, %v1802_v33 }
 0x264   :  { %v1902_v13 = vadd.f32 %v3541_v26, %v4983_v51  ;;  %v5150_v42 = vadd.f32 %v5002_v60, %v1804_v50  ;;  %v3544_v15 = vadd.f32 %v3543_v52, %v3542_v11  ;;  %2034 = vadd.xlane.f32.xlu1 %v2033_v25  ;;  %v2036_v56 = vadd.f32 %v5142_v19, %v5139_v21 }
 0x266   :  { %v1905_v54 = vadd.f32 %v3544_v15, %v4985_v17  ;;  %v5156_v47 = vadd.f32 %v5014_v24, %v1902_v13  ;;  %v2040_v22 = vadd.f32 %v5150_v42, %v5147_v53 }
 0x268   :  { %v1808_v51 = vpop.f32.mrb[56].mxu0  ;;  %v3545_v4 = vpop.f32.mrb[88].mxu1  ;;  %v2037_v63 = vadd.f32 %v2036_v56, %v5156_v47  ;;  %v5162_v6 = vadd.f32 %v5014_v24, %v1905_v54 }
 0x269   :  { %v1810_v40 = vpop.f32.mrb[57].mxu0  ;;  %v3546_v20 = vpop.f32.mrb[89].mxu1  ;;  %v5165_v26 = vadd.f32 %v4999_v35, %v1808_v51 }
 0x26a   :  { %v5168_v17 = vadd.f32 %v5002_v60, %v1810_v40  ;;  %v3547_v11 = vadd.f32 %v3546_v20, %v3545_v4  ;;  %v3548_v33 = vpop.f32.mrb[90].mxu1  ;;  %2038 = vadd.xlane.f32.xlu0 %v2037_v63  ;;  %v1812_v25 = vpop.f32.mrb[58].mxu0  ;;  %v2041_v50 = vadd.f32 %v2040_v22, %v5162_v6 }
 0x26b   :  { %v1814_v52 = vpop.f32.mrb[59].mxu0  ;;  %v3549_v13 = vpop.f32.mrb[91].mxu1  ;;  %v5173_v56 = vadd.f32 %v4999_v35, %v1812_v25 }
 0x26c   :  { %v1910_v15 = vadd.f32 %v3547_v11, %v4987_v32  ;;  %v5176_v54 = vadd.f32 %v5002_v60, %v1814_v52  ;;  %v3550_v51 = vadd.f32 %v3549_v13, %v3548_v33  ;;  %2042 = vadd.xlane.f32.xlu1 %v2041_v50  ;;  %v2044_v4 = vadd.f32 %v5168_v17, %v5165_v26 }
 0x26d   :  { %6390 = vst [vmem:[#allocation16_spill] sm:$0xff] %v5173_v56 }
 0x26e   :  { %6391 = vst [vmem:[#allocation17_spill] sm:$0xff] %v5176_v54  ;;  %v1913_v63 = vadd.f32 %v3550_v51, %v4989_v34  ;;  %v5182_v40 = vadd.f32 %v5014_v24, %v1910_v15  ;;  %v2048_v22 = vadd.f32 %v5176_v54, %v5173_v56 }
 0x270   :  { %6392 = vst [vmem:[#allocation18_spill] sm:$0xff] %v5182_v40  ;;  %v1818_v32 = vpop.f32.mrb[60].mxu0  ;;  %v3551_v20 = vpop.f32.mrb[92].mxu1  ;;  %v2045_v11 = vadd.f32 %v2044_v4, %v5182_v40  ;;  %v5188_v25 = vadd.f32 %v5014_v24, %v1913_v63 }
 0x271   :  { %v1820_v33 = vpop.f32.mrb[61].mxu0  ;;  %v3552_v50 = vpop.f32.mrb[93].mxu1  ;;  %v5191_v52 = vadd.f32 %v4999_v35, %v1818_v32 }
 0x272   :  { %v5194_v34 = vadd.f32 %v5002_v60, %v1820_v33  ;;  %v3553_v13 = vadd.f32 %v3552_v50, %v3551_v20  ;;  %v3554_v15 = vpop.f32.mrb[94].mxu1  ;;  %2046 = vadd.xlane.f32.xlu0 %v2045_v11  ;;  %v1822_v51 = vpop.f32.mrb[62].mxu0  ;;  %v2049_v9 = vadd.f32 %v2048_v22, %v5188_v25 }
 0x273   :  { %v1824_v54 = vpop.f32.mrb[63].mxu0  ;;  %v3555_v56 = vpop.f32.mrb[95].mxu1  ;;  %v5199_v63 = vadd.f32 %v4999_v35, %v1822_v51 }
 0x274   :  { %v1918_v4 = vadd.f32 %v3553_v13, %v4991_v36  ;;  %v5202_v40 = vadd.f32 %v5002_v60, %v1824_v54  ;;  %v3556_v32 = vadd.f32 %v3555_v56, %v3554_v15  ;;  %2050 = vadd.xlane.f32.xlu1 %v2049_v9  ;;  %v2052_v20 = vadd.f32 %v5194_v34, %v5191_v52 }
 0x275   :  { %v6393_v9 = vlaneseq }
 0x276   :  { %v1921_v11 = vadd.f32 %v3556_v32, %v4996_v37  ;;  %v5208_v33 = vadd.f32 %v5014_v24, %v1918_v4  ;;  %v2056_v22 = vadd.f32 %v5202_v40, %v5199_v63 }
 0x277   :  { %v5218_v56 = vand.u32 127, %v6393_v9 }
 0x278   :  { %v2053_v36 = vadd.f32 %v2052_v20, %v5208_v33  ;;  %v5214_v35 = vadd.f32 %v5014_v24, %v1921_v11 }
 0x279   :  { %6394 = vst [vmem:[#allocation15_spill] sm:$0xff] %v5218_v56  ;;  %v5221_v37 = vadd.s32 256, %v5218_v56 }
 0x27a   :  { %2054 = vadd.xlane.f32.xlu0 %v2053_v36  ;;  %v2057_v60 = vadd.f32 %v2056_v22, %v5214_v35 }
 0x27b   :  { %vm1995_vm3 = vcmp.lt.s32.totalorder %v5221_v37, 300 }
 0x27c   :  { %2058 = vadd.xlane.f32.xlu1 %v2057_v60 }
 0x2ce   :  { %v1999_v54 = vpop.xlane.xlu0 %1998 }
 0x2cf   :  { %v2060_v50 = vmul.f32 0.0033333334, %v1999_v54 }
 0x2d1   :  { %v5225_v13 = vsub.f32 %v5008_v2, %v2060_v50  ;;  %v5228_v24 = vsub.f32 %v5011_v1, %v2060_v50  ;;  %v2078_v15 = vsub.f32 %v5024_v28, %v2060_v50 }
 0x2d2   :  { %v2003_v51 = vpop.xlane.xlu0 %2002 }
 0x2d3   :  { %v2061_v4 = vmul.f32 0.0033333334, %v2003_v51  ;;  %v5233_v32 = vsel %vm1995_vm3, %v2078_v15, 0.0  ;;  %v2172_v20 = vmul.f32 %v5225_v13, %v5225_v13  ;;  %v2173_v11 = vmul.f32 %v5228_v24, %v5228_v24 }
 0x2d4   :  { %v2174_v2 = vmul.f32 %v5233_v32, %v5233_v32 }
 0x2d5   :  { %v5242_v1 = vsub.f32 %v5017_v27, %v2061_v4  ;;  %v5245_v28 = vsub.f32 %v5020_v43, %v2061_v4  ;;  %v2081_v22 = vsub.f32 %v5030_v3, %v2061_v4  ;;  %v2220_v60 = vadd.f32 %v2173_v11, %v2172_v20 }
 0x2d6   :  { %v2007_v36 = vpop.xlane.xlu1 %2006 }
 0x2d7   :  { %v2062_v9 = vmul.f32 0.0033333334, %v2007_v36  ;;  %v5250_v54 = vsel %vm1995_vm3, %v2081_v22, 0.0  ;;  %v2221_v50 = vadd.f32 %v2220_v60, %v2174_v2  ;;  %v2175_v15 = vmul.f32 %v5242_v1, %v5242_v1 }
 0x2d8   :  { %v2176_v27 = vmul.f32 %v5245_v28, %v5245_v28  ;;  %v2177_v43 = vmul.f32 %v5250_v54, %v5250_v54 }
 0x2d9   :  { %v5259_v51 = vsub.f32 %v5035_v46, %v2062_v9  ;;  %v5262_v3 = vsub.f32 %v5038_v45, %v2062_v9  ;;  %v2084_v4 = vsub.f32 %v5050_v0, %v2062_v9  ;;  %2222 = vadd.xlane.f32.xlu0 %v2221_v50 }
 0x2da   :  { %v2011_v20 = vpop.xlane.xlu1 %2010  ;;  %v2224_v11 = vadd.f32 %v2176_v27, %v2175_v15 }
 0x2db   :  { %v2063_v2 = vmul.f32 0.0033333334, %v2011_v20  ;;  %v5267_v22 = vsel %vm1995_vm3, %v2084_v4, 0.0  ;;  %v2178_v60 = vmul.f32 %v5259_v51, %v5259_v51  ;;  %v2179_v46 = vmul.f32 %v5262_v3, %v5262_v3 }
 0x2dc   :  { %v2225_v36 = vadd.f32 %v2224_v11, %v2177_v43  ;;  %v2180_v45 = vmul.f32 %v5267_v22, %v5267_v22 }
 0x2dd   :  { %v5276_v0 = vsub.f32 %v5043_v57, %v2063_v2  ;;  %v5279_v9 = vsub.f32 %v5046_v38, %v2063_v2  ;;  %v2087_v50 = vsub.f32 %v5056_v31, %v2063_v2  ;;  %v2228_v27 = vadd.f32 %v2179_v46, %v2178_v60 }
 0x2de   :  { %2226 = vadd.xlane.f32.xlu1 %v2225_v36 }
 0x2df   :  { %v2015_v15 = vpop.xlane.xlu0 %2014  ;;  %v5284_v4 = vsel %vm1995_vm3, %v2087_v50, 0.0  ;;  %v2229_v11 = vadd.f32 %v2228_v27, %v2180_v45  ;;  %v2181_v56 = vmul.f32 %v5276_v0, %v5276_v0  ;;  %v2182_v57 = vmul.f32 %v5279_v9, %v5279_v9 }
 0x2e0   :  { %v2064_v43 = vmul.f32 0.0033333334, %v2015_v15  ;;  %v2183_v38 = vmul.f32 %v5284_v4, %v5284_v4 }
 0x2e1   :  { %v2019_v20 = vpop.xlane.xlu1 %2018  ;;  %2230 = vadd.xlane.f32.xlu0 %v2229_v11  ;;  %v2232_v46 = vadd.f32 %v2182_v57, %v2181_v56 }
 0x2e2   :  { %v5293_v31 = vsub.f32 %v5061_v41, %v2064_v43  ;;  %v5296_v2 = vsub.f32 %v5064_v58, %v2064_v43  ;;  %v2090_v36 = vsub.f32 %v5078_v5, %v2064_v43  ;;  %v2065_v60 = vmul.f32 0.0033333334, %v2019_v20 }
 0x2e3   :  { %v2233_v27 = vadd.f32 %v2232_v46, %v2183_v38 }
 0x2e4   :  { %v5300_v45 = vsub.f32 %v5069_v23, %v2065_v60  ;;  %v5303_v50 = vsub.f32 %v5072_v12, %v2065_v60  ;;  %v2093_v15 = vsub.f32 %v5084_v61, %v2065_v60  ;;  %v5308_v41 = vsel %vm1995_vm3, %v2090_v36, 0.0 }
 0x2e5   :  { %6397 = vst [vmem:[#allocation21_spill] sm:$0xff] %v5308_v41  ;;  %v2184_v58 = vmul.f32 %v5293_v31, %v5293_v31  ;;  %v2185_v5 = vmul.f32 %v5296_v2, %v5296_v2  ;;  %2234 = vadd.xlane.f32.xlu1 %v2233_v27  ;;  %v2186_v23 = vmul.f32 %v5308_v41, %v5308_v41 }
 0x2e6   :  { %6395 = vst [vmem:[#allocation19_spill] sm:$0xff] %v5300_v45  ;;  %6396 = vst [vmem:[#allocation20_spill] sm:$0xff] %v5303_v50  ;;  %v5318_v12 = vsel %vm1995_vm3, %v2093_v15, 0.0  ;;  %v2187_v61 = vmul.f32 %v5300_v45, %v5300_v45  ;;  %v2188_v43 = vmul.f32 %v5303_v50, %v5303_v50 }
 0x2e7   :  { %v2023_v56 = vpop.xlane.xlu0 %2022  ;;  %v2236_v11 = vadd.f32 %v2185_v5, %v2184_v58  ;;  %v2189_v57 = vmul.f32 %v5318_v12, %v5318_v12 }
 0x2e8   :  { %v2066_v20 = vmul.f32 0.0033333334, %v2023_v56  ;;  %v2240_v36 = vadd.f32 %v2188_v43, %v2187_v61 }
 0x2e9   :  { %v2027_v38 = vpop.xlane.xlu1 %2026  ;;  %v2237_v41 = vadd.f32 %v2236_v11, %v2186_v23 }
 0x2ea   :  { %v5327_v60 = vsub.f32 %v5087_v14, %v2066_v20  ;;  %v5330_v46 = vsub.f32 %v5090_v30, %v2066_v20  ;;  %v2096_v15 = vsub.f32 %v5104_v44, %v2066_v20  ;;  %v2067_v27 = vmul.f32 0.0033333334, %v2027_v38 }
 0x2eb   :  { %v2241_v45 = vadd.f32 %v2240_v36, %v2189_v57  ;;  %2238 = vadd.xlane.f32.xlu0 %v2237_v41 }
 0x2ec   :  { %v5334_v50 = vsub.f32 %v5095_v49, %v2067_v27  ;;  %v5337_v58 = vsub.f32 %v5098_v39, %v2067_v27  ;;  %v2099_v5 = vsub.f32 %v5110_v16, %v2067_v27  ;;  %v5342_v14 = vsel %vm1995_vm3, %v2096_v15, 0.0  ;;  %v2444_v49 = vld [vmem:[%s6345_s9] sm:$0x7] }
 0x2ed   :  { %2242 = vadd.xlane.f32.xlu1 %v2241_v45  ;;  %v2190_v30 = vmul.f32 %v5327_v60, %v5327_v60  ;;  %v2191_v44 = vmul.f32 %v5330_v46, %v5330_v46  ;;  %v2192_v39 = vmul.f32 %v5342_v14, %v5342_v14  ;;  %v5364_v20 = vrot.slane %v2444_v49, %v6387_v62 }
 0x2ee   :  { %v5355_v45 = vsel %vm1995_vm3, %v2099_v5, 0.0  ;;  %v2193_v56 = vmul.f32 %v5334_v50, %v5334_v50  ;;  %v2194_v23 = vmul.f32 %v5337_v58, %v5337_v58  ;;  %v5367_v11 = vrot.slane %v2444_v49, %v6388_v29 }
 0x2ef   :  { %v2031_v16 = vpop.xlane.xlu0 %2030  ;;  %v2244_v41 = vadd.f32 %v2191_v44, %v2190_v30  ;;  %v2195_v43 = vmul.f32 %v5355_v45, %v5355_v45  ;;  %v5373_v44 = vrot.slane %v2444_v49, %v5005_v10 }
 0x2f0   :  { %v2068_v61 = vmul.f32 0.0033333334, %v2031_v16  ;;  %v2248_v36 = vadd.f32 %v2194_v23, %v2193_v56 }
 0x2f1   :  { %v2035_v57 = vpop.xlane.xlu1 %2034  ;;  %v2245_v38 = vadd.f32 %v2244_v41, %v2192_v39 }
 0x2f2   :  { %v2100_v15 = vsub.f32 %v5113_v48, %v2068_v61  ;;  %v2101_v27 = vsub.f32 %v5116_v8, %v2068_v61  ;;  %v2102_v5 = vsub.f32 %v5130_v59, %v2068_v61  ;;  %v2069_v30 = vmul.f32 0.0033333334, %v2035_v57 }
 0x2f3   :  { %2246 = vadd.xlane.f32.xlu0 %v2245_v38  ;;  %v2249_v16 = vadd.f32 %v2248_v36, %v2195_v43 }
 0x2f4   :  { %v5376_v62 = vmul.f32 %v5364_v20, %v2100_v15  ;;  %v5379_v29 = vmul.f32 %v5367_v11, %v2101_v27  ;;  %v2103_v39 = vsub.f32 %v5121_v55, %v2069_v30  ;;  %v2104_v48 = vsub.f32 %v5124_v18, %v2069_v30 }
 0x2f5   :  { %v2105_v8 = vsub.f32 %v5136_v7, %v2069_v30  ;;  %2250 = vadd.xlane.f32.xlu1 %v2249_v16  ;;  %v2150_v59 = vsel %vm1995_vm3, %v2102_v5, 0.0  ;;  %v2196_v49 = vmul.f32 %v2100_v15, %v2100_v15  ;;  %v2197_v41 = vmul.f32 %v2101_v27, %v2101_v27 }
 0x2f6   :  { %v5387_v56 = vmul.f32 %v5364_v20, %v2103_v39  ;;  %v5390_v23 = vmul.f32 %v5367_v11, %v2104_v48  ;;  %v2198_v61 = vmul.f32 %v2150_v59, %v2150_v59  ;;  %v5393_v43 = vmul.f32 %v5373_v44, %v2150_v59 }
 0x2f7   :  { %v2039_v55 = vpop.xlane.xlu0 %2038  ;;  %v2252_v18 = vadd.f32 %v2197_v41, %v2196_v49  ;;  %v2153_v7 = vsel %vm1995_vm3, %v2105_v8, 0.0  ;;  %v2199_v57 = vmul.f32 %v2103_v39, %v2103_v39  ;;  %v2200_v38 = vmul.f32 %v2104_v48, %v2104_v48 }
 0x2f8   :  { %6398 = vst [vmem:[#allocation22_spill] sm:$0xff] %v5387_v56  ;;  %6399 = vst [vmem:[#allocation23_spill] sm:$0xff] %v5390_v23  ;;  %v2070_v36 = vmul.f32 0.0033333334, %v2039_v55  ;;  %v2201_v15 = vmul.f32 %v2153_v7, %v2153_v7  ;;  %v5398_v27 = vmul.f32 %v5373_v44, %v2153_v7 }
 0x2f9   :  { %v2043_v5 = vpop.xlane.xlu1 %2042  ;;  %v2253_v30 = vadd.f32 %v2252_v18, %v2198_v61  ;;  %v2256_v16 = vadd.f32 %v2200_v38, %v2199_v57 }
 0x2fa   :  { %v2106_v23 = vsub.f32 %v5139_v21, %v2070_v36  ;;  %v2107_v59 = vsub.f32 %v5142_v19, %v2070_v36  ;;  %v2108_v56 = vsub.f32 %v5156_v47, %v2070_v36  ;;  %v2071_v49 = vmul.f32 0.0033333334, %v2043_v5 }
 0x2fb   :  { %2254 = vadd.xlane.f32.xlu0 %v2253_v30  ;;  %v2257_v41 = vadd.f32 %v2256_v16, %v2201_v15 }
 0x2fc   :  { %v5404_v39 = vmul.f32 %v5364_v20, %v2106_v23  ;;  %v5407_v48 = vmul.f32 %v5367_v11, %v2107_v59  ;;  %v2109_v8 = vsub.f32 %v5147_v53, %v2071_v49  ;;  %v2110_v61 = vsub.f32 %v5150_v42, %v2071_v49 }
 0x2fd   :  { %v2111_v55 = vsub.f32 %v5162_v6, %v2071_v49  ;;  %2258 = vadd.xlane.f32.xlu1 %v2257_v41  ;;  %v2156_v21 = vsel %vm1995_vm3, %v2108_v56, 0.0  ;;  %v2202_v19 = vmul.f32 %v2106_v23, %v2106_v23  ;;  %v2203_v47 = vmul.f32 %v2107_v59, %v2107_v59 }
 0x2fe   :  { %6400 = vst [vmem:[#allocation24_spill] sm:$0xff] %v5404_v39  ;;  %6401 = vst [vmem:[#allocation25_spill] sm:$0xff] %v5407_v48  ;;  %v5415_v18 = vmul.f32 %v5364_v20, %v2109_v8  ;;  %v5418_v7 = vmul.f32 %v5367_v11, %v2110_v61  ;;  %v2204_v57 = vmul.f32 %v2156_v21, %v2156_v21 }
 0x2ff   :  { %v5421_v38 = vmul.f32 %v5373_v44, %v2156_v21  ;;  %v2047_v53 = vpop.xlane.xlu0 %2046  ;;  %v2260_v42 = vadd.f32 %v2203_v47, %v2202_v19  ;;  %v2159_v6 = vsel %vm1995_vm3, %v2111_v55, 0.0  ;;  %v2205_v36 = vmul.f32 %v2109_v8, %v2109_v8  ;;  %v6406_v21 = vld [vmem:[#allocation18_spill] sm:$0xff]  ;;  %v6409_v55 = vld [vmem:[#allocation16_spill] sm:$0xff] }
 0x300   :  { %6402 = vst [vmem:[#allocation26_spill] sm:$0xff] %v5415_v18  ;;  %6403 = vst [vmem:[#allocation27_spill] sm:$0xff] %v5418_v7  ;;  %v2206_v15 = vmul.f32 %v2110_v61, %v2110_v61  ;;  %v2072_v56 = vmul.f32 0.0033333334, %v2047_v53  ;;  %v2207_v23 = vmul.f32 %v2159_v6, %v2159_v6  ;;  %v5426_v5 = vmul.f32 %v5373_v44, %v2159_v6  ;;  %v6410_v6 = vld [vmem:[#allocation17_spill] sm:$0xff] }
 0x301   :  { %6404 = vst [vmem:[#allocation28_spill] sm:$0xff] %v5421_v38  ;;  %v2051_v30 = vpop.xlane.xlu1 %2050  ;;  %v2261_v16 = vadd.f32 %v2260_v42, %v2204_v57 }
 0x302   :  { %6405 = vst [vmem:[#allocation29_spill] sm:$0xff] %v5426_v5  ;;  %v2264_v59 = vadd.f32 %v2206_v15, %v2205_v36  ;;  %v2112_v49 = vsub.f32 %v5165_v26, %v2072_v56  ;;  %v2113_v41 = vsub.f32 %v5168_v17, %v2072_v56  ;;  %v2114_v7 = vsub.f32 %v6406_v21, %v2072_v56 }
 0x303   :  { %v2073_v19 = vmul.f32 0.0033333334, %v2051_v30  ;;  %2262 = vadd.xlane.f32.xlu0 %v2261_v16 }
 0x304   :  { %v2265_v47 = vadd.f32 %v2264_v59, %v2207_v23  ;;  %v5432_v8 = vmul.f32 %v5364_v20, %v2112_v49  ;;  %v5435_v61 = vmul.f32 %v5367_v11, %v2113_v41  ;;  %v2162_v26 = vsel %vm1995_vm3, %v2114_v7, 0.0 }
 0x305   :  { %v2115_v53 = vsub.f32 %v6409_v55, %v2073_v19  ;;  %v2116_v57 = vsub.f32 %v6410_v6, %v2073_v19  ;;  %v2117_v42 = vsub.f32 %v5188_v25, %v2073_v19  ;;  %v2208_v17 = vmul.f32 %v2112_v49, %v2112_v49 }
 0x306   :  { %6407 = vst [vmem:[#allocation18_spill] sm:$0xff] %v5432_v8  ;;  %6408 = vst [vmem:[#allocation30_spill] sm:$0xff] %v5435_v61  ;;  %2266 = vadd.xlane.f32.xlu1 %v2265_v47  ;;  %v2209_v36 = vmul.f32 %v2113_v41, %v2113_v41  ;;  %v2210_v23 = vmul.f32 %v2162_v26, %v2162_v26  ;;  %v5449_v30 = vmul.f32 %v5373_v44, %v2162_v26 }
 0x307   :  { %v5443_v15 = vmul.f32 %v5364_v20, %v2115_v53  ;;  %v5446_v56 = vmul.f32 %v5367_v11, %v2116_v57  ;;  %v2055_v16 = vpop.xlane.xlu0 %2054  ;;  %v2165_v25 = vsel %vm1995_vm3, %v2117_v42, 0.0  ;;  %v2211_v21 = vmul.f32 %v2115_v53, %v2115_v53 }
 0x308   :  { %6413 = vst [vmem:[#allocation31_spill] sm:$0xff] %v5449_v30  ;;  %v2268_v59 = vadd.f32 %v2209_v36, %v2208_v17  ;;  %v2212_v19 = vmul.f32 %v2116_v57, %v2116_v57  ;;  %v2074_v7 = vmul.f32 0.0033333334, %v2055_v16  ;;  %v2213_v49 = vmul.f32 %v2165_v25, %v2165_v25 }
 0x309   :  { %6411 = vst [vmem:[#allocation16_spill] sm:$0xff] %v5443_v15  ;;  %6412 = vst [vmem:[#allocation17_spill] sm:$0xff] %v5446_v56  ;;  %v5454_v41 = vmul.f32 %v5373_v44, %v2165_v25  ;;  %v2059_v47 = vpop.xlane.xlu1 %2058 }
 0x30a   :  { %v2269_v55 = vadd.f32 %v2268_v59, %v2210_v23  ;;  %v2272_v6 = vadd.f32 %v2212_v19, %v2211_v21  ;;  %v2118_v56 = vsub.f32 %v5191_v52, %v2074_v7  ;;  %v2119_v26 = vsub.f32 %v5194_v34, %v2074_v7 }
 0x30b   :  { %6414 = vst [vmem:[#allocation32_spill] sm:$0xff] %v5454_v41  ;;  %v2120_v15 = vsub.f32 %v5208_v33, %v2074_v7  ;;  %v2075_v17 = vmul.f32 0.0033333334, %v2059_v47 }
 0x30c   :  { %2270 = vadd.xlane.f32.xlu0 %v2269_v55  ;;  %v2273_v36 = vadd.f32 %v2272_v6, %v2213_v49  ;;  %v5460_v53 = vmul.f32 %v5364_v20, %v2118_v56  ;;  %v5463_v57 = vmul.f32 %v5367_v11, %v2119_v26  ;;  %v2214_v34 = vmul.f32 %v2118_v56, %v2118_v56 }
 0x30d   :  { %v2121_v42 = vsub.f32 %v5199_v63, %v2075_v17  ;;  %v2122_v23 = vsub.f32 %v5202_v40, %v2075_v17  ;;  %v2123_v16 = vsub.f32 %v5214_v35, %v2075_v17  ;;  %v2168_v52 = vsel %vm1995_vm3, %v2120_v15, 0.0 }
 0x30e   :  { %6415 = vst [vmem:[#allocation33_spill] sm:$0xff] %v5460_v53  ;;  %6416 = vst [vmem:[#allocation34_spill] sm:$0xff] %v5463_v57  ;;  %2274 = vadd.xlane.f32.xlu1 %v2273_v36  ;;  %v2215_v33 = vmul.f32 %v2119_v26, %v2119_v26  ;;  %v2216_v21 = vmul.f32 %v2168_v52, %v2168_v52  ;;  %v5477_v19 = vmul.f32 %v5373_v44, %v2168_v52 }
 0x30f   :  { %v5471_v59 = vmul.f32 %v5364_v20, %v2121_v42  ;;  %v5474_v25 = vmul.f32 %v5367_v11, %v2122_v23  ;;  %v2171_v40 = vsel %vm1995_vm3, %v2123_v16, 0.0  ;;  %v2217_v35 = vmul.f32 %v2121_v42, %v2121_v42 }
 0x310   :  { %6419 = vst [vmem:[#allocation37_spill] sm:$0xff] %v5477_v19  ;;  %v2276_v63 = vadd.f32 %v2215_v33, %v2214_v34  ;;  %v2218_v7 = vmul.f32 %v2122_v23, %v2122_v23  ;;  %v2219_v49 = vmul.f32 %v2171_v40, %v2171_v40  ;;  %v5482_v15 = vmul.f32 %v5373_v44, %v2171_v40 }
 0x311   :  { %6417 = vst [vmem:[#allocation35_spill] sm:$0xff] %v5471_v59  ;;  %6418 = vst [vmem:[#allocation36_spill] sm:$0xff] %v5474_v25  ;;  %v5492_v40 = vmul.f32 %v5364_v20, %v5225_v13 }
 0x312   :  { %6420 = vst [vmem:[#allocation38_spill] sm:$0xff] %v5482_v15  ;;  %v2277_v56 = vadd.f32 %v2276_v63, %v2216_v21  ;;  %v2280_v47 = vadd.f32 %v2218_v7, %v2217_v35  ;;  %v5496_v7 = vmul.f32 %v5367_v11, %v5228_v24  ;;  %v5512_v24 = vmul.f32 %v5367_v11, %v5245_v28 }
 0x313   :  { %v5529_v28 = vmul.f32 %v5373_v44, %v5267_v22  ;;  %v5550_v22 = vmul.f32 %v5367_v11, %v5296_v2  ;;  %v5569_v2 = vmul.f32 %v5373_v44, %v5318_v12  ;;  %v5588_v12 = vmul.f32 %v5367_v11, %v5337_v58 }
 0x314   :  { %2278 = vadd.xlane.f32.xlu0 %v2277_v56  ;;  %v2281_v55 = vadd.f32 %v2280_v47, %v2219_v49  ;;  %v5500_v49 = vmul.f32 %v5373_v44, %v5233_v32 }
 0x316   :  { %2282 = vadd.xlane.f32.xlu1 %v2281_v55 }
 0x366   :  { %v2223_v6 = vpop.xlane.xlu0 %2222 }
 0x367   :  { %v2284_v26 = vmul.f32 0.0033444816, %v2223_v6 }
 0x369   :  { %3856 = vrsqrt.f32 %v2284_v26  ;;  %vm2302_vm4 = vcmp.eq.f32.partialorder %v2284_v26, inf  ;;  %v2305_v33 = vand.u32 2147483648, %v2284_v26  ;;  %vm2304_vm5 = vcmp.eq.f32.partialorder %v2284_v26, 0.0 }
 0x36b   :  { %v2227_v17 = vpop.xlane.xlu1 %2226 }
 0x36c   :  { %v2285_v36 = vmul.f32 0.0033444816, %v2227_v17 }
 0x36e   :  { %3858 = vrsqrt.f32 %v2285_v36  ;;  %v2231_v52 = vpop.xlane.xlu0 %2230  ;;  %vm2309_vm6 = vcmp.eq.f32.partialorder %v2285_v36, inf  ;;  %vm2311_vm7 = vcmp.eq.f32.partialorder %v2285_v36, 0.0 }
 0x36f   :  { %v5484_v37 = vmul.f32 0.0033444816, %v2231_v52  ;;  %v2312_v52 = vand.u32 2147483648, %v2285_v36 }
 0x371   :  { %3860 = vrsqrt.f32 %v5484_v37  ;;  %vm2316_vm8 = vcmp.eq.f32.partialorder %v5484_v37, inf  ;;  %v2319_v25 = vand.u32 2147483648, %v5484_v37  ;;  %vm2318_vm9 = vcmp.eq.f32.partialorder %v5484_v37, 0.0 }
 0x372   :  { %v2235_v42 = vpop.xlane.xlu1 %2234 }
 0x373   :  { %v3857_v23 = vpop.eup %3856  ;;  %v5487_v16 = vmul.f32 0.0033444816, %v2235_v42  ;;  %v5516_v42 = vmul.f32 %v5364_v20, %v5259_v51  ;;  %v5534_v51 = vmul.f32 %v5364_v20, %v5276_v0 }
 0x374   :  { %v2301_v34 = vmul.f32 %v3857_v23, %v2284_v26 }
 0x375   :  { %3862 = vrsqrt.f32 %v5487_v16  ;;  %vm2323_vm10 = vcmp.eq.f32.partialorder %v5487_v16, inf  ;;  %vm2325_vm12 = vcmp.eq.f32.partialorder %v5487_v16, 0.0 }
 0x376   :  { %v2303_v21 = vsel %vm2302_vm4, %v2284_v26, %v2301_v34  ;;  %v5504_v26 = vmul.f32 %v5364_v20, %v5242_v1  ;;  %v5520_v1 = vmul.f32 %v5373_v44, %v5250_v54  ;;  %v5525_v34 = vmul.f32 %v5367_v11, %v5262_v3 }
 0x377   :  { %v2306_v35 = vsel %vm2304_vm5, %v2305_v33, %v2303_v21  ;;  %v5538_v54 = vmul.f32 %v5367_v11, %v5279_v9  ;;  %v5546_v3 = vmul.f32 %v5373_v44, %v5284_v4  ;;  %v6421_v21 = vld [vmem:[#allocation19_spill] sm:$0xff] }
 0x378   :  { %v3859_v63 = vpop.eup %3858  ;;  %v2412_v56 = vadd.f32 1e-06, %v2306_v35  ;;  %v2239_v55 = vpop.xlane.xlu0 %2238  ;;  %v5554_v0 = vmul.f32 %v5364_v20, %v6421_v21  ;;  %v6423_v35 = vld [vmem:[#allocation21_spill] sm:$0xff]  ;;  %v2557_v4 = vld [vmem:[%s6346_s10] sm:$0x7]  ;;  %v5580_v21 = vmul.f32 %v5367_v11, %v5330_v46  ;;  %v5599_v46 = vmul.f32 %v5373_v44, %v5355_v45 }
 0x379   :  { %v2308_v47 = vmul.f32 %v3859_v63, %v2285_v36  ;;  %v5506_v13 = vmul.f32 0.0033444816, %v2239_v55  ;;  %v6422_v63 = vld [vmem:[#allocation20_spill] sm:$0xff]  ;;  %v5614_v45 = vrot.slane %v2557_v4, %v5005_v10 }
 0x37a   :  { %v2243_v6 = vpop.xlane.xlu1 %2242  ;;  %3864 = vrcp.f32 %v2412_v56  ;;  %v5558_v9 = vmul.f32 %v5367_v11, %v6422_v63  ;;  %v5584_v63 = vmul.f32 %v5364_v20, %v5334_v50  ;;  %v6424_v50 = vld [vmem:[#allocation13_spill] sm:$0xff] }
 0x37b   :  { %v5508_v17 = vmul.f32 0.0033444816, %v2243_v6  ;;  %v2310_v32 = vsel %vm2309_vm6, %v2285_v36, %v2308_v47  ;;  %3866 = vrsqrt.f32 %v5506_v13  ;;  %v3861_v23 = vpop.eup %3860  ;;  %v5542_v36 = vmul.f32 %v5364_v20, %v5293_v31 }
 0x37c   :  { %v2313_v33 = vsel %vm2311_vm7, %v2312_v52, %v2310_v32  ;;  %v5562_v31 = vmul.f32 %v5373_v44, %v6423_v35  ;;  %v2315_v6 = vmul.f32 %v3861_v23, %v5484_v37  ;;  %v5576_v52 = vmul.f32 %v5364_v20, %v5327_v60  ;;  %v2910_v23 = vld [vmem:[%s6347_s11] sm:$0x7]  ;;  %v6425_v35 = vld [vmem:[#allocation14_spill] sm:$0xff] }
 0x37d   :  { %3868 = vrsqrt.f32 %v5508_v17  ;;  %v2413_v55 = vadd.f32 1e-06, %v2313_v33  ;;  %v5595_v60 = vmul.f32 %v5373_v44, %v5342_v14  ;;  %v5603_v20 = vrot.slane %v2557_v4, %v6424_v50 }
 0x37e   :  { %v2317_v14 = vsel %vm2316_vm8, %v5484_v37, %v2315_v6  ;;  %v5617_v44 = vrot.slane %v2910_v23, %v6424_v50  ;;  %vm2330_vm11 = vcmp.eq.f32.partialorder %v5506_v13, inf  ;;  %vm2332_vm13 = vcmp.eq.f32.partialorder %v5506_v13, 0.0 }
 0x37f   :  { %v3863_v47 = vpop.eup %3862  ;;  %v2320_v59 = vsel %vm2318_vm9, %v2319_v25, %v2317_v14  ;;  %v2333_v25 = vand.u32 2147483648, %v5506_v13  ;;  %vm2337_vm14 = vcmp.eq.f32.partialorder %v5508_v17, inf  ;;  %vm2339_vm15 = vcmp.eq.f32.partialorder %v5508_v17, 0.0 }
 0x380   :  { %v2247_v56 = vpop.xlane.xlu0 %2246  ;;  %v2322_v58 = vmul.f32 %v3863_v47, %v5487_v16  ;;  %v5622_v47 = vrot.slane %v2910_v23, %v6425_v35 }
 0x381   :  { %v5572_v32 = vmul.f32 0.0033444816, %v2247_v56  ;;  %v5610_v56 = vrot.slane %v2557_v4, %v6425_v35  ;;  %v2326_v4 = vand.u32 2147483648, %v5487_v16 }
 0x382   :  { %v2251_v33 = vpop.xlane.xlu1 %2250  ;;  %v2324_v19 = vsel %vm2323_vm10, %v5487_v16, %v2322_v58 }
 0x383   :  { %3870 = vrsqrt.f32 %v5572_v32  ;;  %v5607_v11 = vmul.f32 0.0033444816, %v2251_v33  ;;  %v5625_v33 = vrot.slane %v2910_v23, %v5005_v10  ;;  %vm2344_vm0 = vcmp.eq.f32.partialorder %v5572_v32, inf }
 0x384   :  { %3872 = vrcp.f32 %v2413_v55  ;;  %v3865_v15 = vpop.eup %3864  ;;  %vm2346_vm1 = vcmp.eq.f32.partialorder %v5572_v32, 0.0 }
 0x385   :  { %3874 = vrsqrt.f32 %v5607_v11  ;;  %v3867_v55 = vpop.eup %3866  ;;  %v2509_v6 = vmul.f32 %v3865_v15, %v5492_v40  ;;  %v2510_v53 = vmul.f32 %v3865_v15, %v5496_v7  ;;  %v2511_v23 = vmul.f32 %v3865_v15, %v5500_v49 }
 0x386   :  { %v2329_v57 = vmul.f32 %v3867_v55, %v5506_v13  ;;  %v2414_v55 = vadd.f32 1e-06, %v2320_v59  ;;  %v2327_v7 = vsel %vm2325_vm12, %v2326_v4, %v2324_v19  ;;  %v2340_v49 = vand.u32 2147483648, %v5508_v17 }
 0x387   :  { %v3869_v50 = vpop.eup %3868  ;;  %v5643_v14 = vadd.f32 %v5603_v20, %v2509_v6  ;;  %v5650_v15 = vadd.f32 %v5610_v56, %v2510_v53  ;;  %v5657_v59 = vadd.f32 %v5614_v45, %v2511_v23  ;;  %v2415_v19 = vadd.f32 1e-06, %v2327_v7 }
 0x388   :  { %v2255_v35 = vpop.xlane.xlu0 %2254  ;;  %v2336_v10 = vmul.f32 %v3869_v50, %v5508_v17  ;;  %v2331_v40 = vsel %vm2330_vm11, %v5506_v13, %v2329_v57  ;;  %vm2351_vm2 = vcmp.eq.f32.partialorder %v5607_v11, inf  ;;  %vm2353_vm3 = vcmp.eq.f32.partialorder %v5607_v11, 0.0 }
 0x389   :  { %v5636_v37 = vmul.f32 0.0033444816, %v2255_v35  ;;  %v2334_v50 = vsel %vm2332_vm13, %v2333_v25, %v2331_v40  ;;  %v2670_v4 = vmin.f32 %v5643_v14, 0.0  ;;  %v2671_v7 = vmin.f32 %v5650_v15, 0.0 }
 0x38a   :  { %v2259_v58 = vpop.xlane.xlu1 %2258  ;;  %v2338_v16 = vsel %vm2337_vm14, %v5508_v17, %v2336_v10  ;;  %v2416_v53 = vadd.f32 1e-06, %v2334_v50  ;;  %v2347_v10 = vand.u32 2147483648, %v5572_v32  ;;  %v2354_v17 = vand.u32 2147483648, %v5607_v11 }
 0x38b   :  { %3876 = vrsqrt.f32 %v5636_v37  ;;  %v5654_v6 = vmul.f32 0.0033444816, %v2259_v58  ;;  %v2341_v25 = vsel %vm2339_vm15, %v2340_v49, %v2338_v16  ;;  %v2718_v50 = vmul.f32 1.442695, %v2670_v4 }
 0x38c   :  { %3878 = vrcp.f32 %v2414_v55  ;;  %v2672_v55 = vmin.f32 %v5657_v59, 0.0  ;;  %v2417_v49 = vadd.f32 1e-06, %v2341_v25  ;;  %vm2358_vm4 = vcmp.eq.f32.partialorder %v5636_v37, inf }
 0x38d   :  { %v3871_v57 = vpop.eup %3870  ;;  %3880 = vrsqrt.f32 %v5654_v6  ;;  %vm2360_vm5 = vcmp.eq.f32.partialorder %v5636_v37, 0.0  ;;  %vm2365_vm6 = vcmp.eq.f32.partialorder %v5654_v6, inf  ;;  %vm2367_vm7 = vcmp.eq.f32.partialorder %v5654_v6, 0.0 }
 0x38e   :  { %v2343_v13 = vmul.f32 %v3871_v57, %v5572_v32  ;;  %v3873_v35 = vpop.eup %3872  ;;  %3882 = vrcp.f32 %v2415_v19  ;;  %v2720_v19 = vmul.f32 1.442695, %v2671_v7  ;;  %v2722_v61 = vmul.f32 1.442695, %v2672_v55 }
 0x38f   :  { %v3875_v40 = vpop.eup %3874  ;;  %v2513_v25 = vmul.f32 %v3873_v35, %v5512_v24  ;;  %v2514_v24 = vmul.f32 %v3873_v35, %v5520_v1  ;;  %vm2622_vm8 = vcmp.gt.f32.partialorder %v5643_v14, 0.0  ;;  %vm2623_vm12 = vcmp.gt.f32.partialorder %v5650_v15, 0.0 }
 0x390   :  { %v2345_v23 = vsel %vm2344_vm0, %v5572_v32, %v2343_v13  ;;  %v2263_v58 = vpop.xlane.xlu0 %2262  ;;  %v2350_v57 = vmul.f32 %v3875_v40, %v5607_v11  ;;  %v2512_v40 = vmul.f32 %v3873_v35, %v5504_v26  ;;  %v2361_v32 = vand.u32 2147483648, %v5636_v37 }
 0x391   :  { %v5670_v41 = vmul.f32 0.0033444816, %v2263_v58  ;;  %v2348_v58 = vsel %vm2346_vm1, %v2347_v10, %v2345_v23  ;;  %vm2624_vm13 = vcmp.gt.f32.partialorder %v5657_v59, 0.0 }
 0x392   :  { %v2352_v13 = vsel %vm2351_vm2, %v5607_v11, %v2350_v57  ;;  %v2418_v26 = vadd.f32 1e-06, %v2348_v58  ;;  %v5697_v11 = vadd.f32 %v5610_v56, %v2513_v25 }
 0x393   :  { %v2267_v16 = vpop.xlane.xlu1 %2266  ;;  %3884 = vrsqrt.f32 %v5670_v41  ;;  %v2355_v57 = vsel %vm2353_vm3, %v2354_v17, %v2352_v13  ;;  %vm2372_vm9 = vcmp.eq.f32.partialorder %v5670_v41, inf  ;;  %vm2374_vm10 = vcmp.eq.f32.partialorder %v5670_v41, 0.0 }
 0x394   :  { %3886 = vrcp.f32 %v2416_v53  ;;  %v5681_v4 = vmul.f32 0.0033444816, %v2267_v16  ;;  %v5692_v53 = vadd.f32 %v5603_v20, %v2512_v40  ;;  %v2419_v7 = vadd.f32 1e-06, %v2355_v57 }
 0x395   :  { %v3877_v30 = vpop.eup %3876  ;;  %3888 = vpow2.f32 %v2718_v50  ;;  %v2674_v13 = vmin.f32 %v5697_v11, 0.0 }
 0x396   :  { %v2357_v8 = vmul.f32 %v3877_v30, %v5636_v37  ;;  %3890 = vrsqrt.f32 %v5681_v4  ;;  %v5699_v30 = vpop.eup %3878  ;;  %v2673_v35 = vmin.f32 %v5692_v53, 0.0  ;;  %vm2379_vm11 = vcmp.eq.f32.partialorder %v5681_v4, inf }
 0x397   :  { %3892 = vrcp.f32 %v2417_v49  ;;  %v3881_v50 = vpop.eup %3880  ;;  %v5719_v49 = vadd.f32 %v5614_v45, %v2514_v24  ;;  %vm2381_vm14 = vcmp.eq.f32.partialorder %v5681_v4, 0.0  ;;  %v2515_v24 = vmul.f32 %v5699_v30, %v5516_v42 }
 0x398   :  { %v2359_v10 = vsel %vm2358_vm4, %v5636_v37, %v2357_v8  ;;  %3894 = vpow2.f32 %v2720_v19  ;;  %v2368_v8 = vand.u32 2147483648, %v5654_v6  ;;  %v2364_v16 = vmul.f32 %v3881_v50, %v5654_v6 }
 0x399   :  { %v2271_v23 = vpop.xlane.xlu0 %2270  ;;  %3896 = vpow2.f32 %v2722_v61  ;;  %v2362_v17 = vsel %vm2360_vm5, %v2361_v32, %v2359_v10  ;;  %v5714_v61 = vpop.eup %3882  ;;  %v2724_v25 = vmul.f32 1.442695, %v2673_v35  ;;  %v2675_v35 = vmin.f32 %v5719_v49, 0.0 }
 0x39a   :  { %v5702_v55 = vmul.f32 0.0033444816, %v2271_v23  ;;  %v2420_v58 = vadd.f32 1e-06, %v2362_v17  ;;  %v2366_v19 = vsel %vm2365_vm6, %v5654_v6, %v2364_v16  ;;  %v2382_v23 = vand.u32 2147483648, %v5681_v4 }
 0x39b   :  { %v2275_v1 = vpop.xlane.xlu1 %2274  ;;  %v2369_v50 = vsel %vm2367_vm7, %v2368_v8, %v2366_v19  ;;  %v2726_v16 = vmul.f32 1.442695, %v2674_v13  ;;  %v2516_v13 = vmul.f32 %v5699_v30, %v5525_v34  ;;  %vm2625_vm2 = vcmp.gt.f32.partialorder %v5692_v53, 0.0 }
 0x39c   :  { %3898 = vrsqrt.f32 %v5702_v55  ;;  %v5716_v37 = vmul.f32 0.0033444816, %v2275_v1  ;;  %vm2386_vm15 = vcmp.eq.f32.partialorder %v5702_v55, inf  ;;  %v2389_v8 = vand.u32 2147483648, %v5702_v55 }
 0x39d   :  { %3900 = vrcp.f32 %v2418_v26  ;;  %v3885_v40 = vpop.eup %3884  ;;  %v2375_v26 = vand.u32 2147483648, %v5670_v41  ;;  %vm2388_vm1 = vcmp.eq.f32.partialorder %v5702_v55, 0.0  ;;  %vm2626_vm4 = vcmp.gt.f32.partialorder %v5697_v11, 0.0 }
 0x39e   :  { %3902 = vrcp.f32 %v2419_v7  ;;  %v5725_v57 = vpop.eup %3886  ;;  %v2371_v32 = vmul.f32 %v3885_v40, %v5670_v41  ;;  %vm2393_vm0 = vcmp.eq.f32.partialorder %v5716_v37, inf  ;;  %vm2395_vm3 = vcmp.eq.f32.partialorder %v5716_v37, 0.0 }
 0x39f   :  { %3904 = vrsqrt.f32 %v5716_v37  ;;  %v3889_v10 = vpop.eup %3888  ;;  %v2396_v18 = vand.u32 2147483648, %v5716_v37 }
 0x3a0   :  { %3906 = vpow2.f32 %v2724_v25  ;;  %v3891_v7 = vpop.eup %3890  ;;  %v3381_v1 = vadd.f32 -1.0, %v3889_v10  ;;  %v2373_v25 = vsel %vm2372_vm9, %v5670_v41, %v2371_v32 }
 0x3a1   :  { %v2279_v17 = vpop.xlane.xlu0 %2278  ;;  %v5741_v40 = vpop.eup %3892  ;;  %3908 = vrcp.f32 %v2420_v58  ;;  %v2378_v42 = vmul.f32 %v3891_v7, %v5681_v4  ;;  %v2421_v58 = vadd.f32 1e-06, %v2369_v50  ;;  %v2728_v50 = vmul.f32 1.442695, %v2675_v35 }
 0x3a2   :  { %v5747_v5 = vmul.f32 0.0033444816, %v2279_v17  ;;  %v3895_v6 = vpop.eup %3894  ;;  %3910 = vpow2.f32 %v2726_v16  ;;  %v2862_v7 = vsel %vm2622_vm8, %v5643_v14, %v3381_v1  ;;  %v2376_v17 = vsel %vm2374_vm10, %v2375_v26, %v2373_v25 }
 0x3a3   :  { %v2283_v19 = vpop.xlane.xlu1 %2282  ;;  %v3897_v10 = vpop.eup %3896  ;;  %v2380_v32 = vsel %vm2379_vm11, %v5681_v4, %v2378_v42  ;;  %v3382_v38 = vadd.f32 -1.0, %v3895_v6  ;;  %v2927_v41 = vmul.f32 %v5617_v44, %v2862_v7  ;;  %v2517_v26 = vmul.f32 %v5699_v30, %v5529_v28 }
 0x3a4   :  { %3912 = vrsqrt.f32 %v5747_v5  ;;  %v5765_v34 = vmul.f32 0.0033444816, %v2283_v19  ;;  %v2383_v42 = vsel %vm2381_vm14, %v2382_v23, %v2380_v32  ;;  %v3383_v48 = vadd.f32 -1.0, %v3897_v10 }
 0x3a5   :  { %v2422_v4 = vadd.f32 1e-06, %v2376_v17  ;;  %v2863_v23 = vsel %vm2623_vm12, %v5650_v15, %v3382_v38  ;;  %v2423_v6 = vadd.f32 1e-06, %v2383_v42  ;;  %vm2400_vm5 = vcmp.eq.f32.partialorder %v5747_v5, inf }
 0x3a6   :  { %v3899_v16 = vpop.eup %3898  ;;  %3914 = vrsqrt.f32 %v5765_v34  ;;  %v2864_v35 = vsel %vm2624_vm13, %v5657_v59, %v3383_v48  ;;  %v2928_v19 = vmul.f32 %v5622_v47, %v2863_v23  ;;  %v5794_v15 = vadd.f32 %v5603_v20, %v2515_v24 }
 0x3a7   :  { %v5770_v39 = vpop.eup %3900  ;;  %v2385_v14 = vmul.f32 %v3899_v16, %v5702_v55  ;;  %3916 = vrcp.f32 %v2421_v58  ;;  %v2929_v38 = vmul.f32 %v5625_v33, %v2864_v35  ;;  %vm2402_vm6 = vcmp.eq.f32.partialorder %v5747_v5, 0.0 }
 0x3a8   :  { %v5778_v1 = vpop.eup %3902  ;;  %3918 = vpow2.f32 %v2728_v50  ;;  %v2975_v48 = vadd.f32 %v2928_v19, %v2927_v41  ;;  %v5798_v58 = vadd.f32 %v5610_v56, %v2516_v13  ;;  %v5801_v32 = vadd.f32 %v5614_v45, %v2517_v26 }
 0x3a9   :  { %v3905_v25 = vpop.eup %3904  ;;  %v2387_v30 = vsel %vm2386_vm15, %v5702_v55, %v2385_v14  ;;  %3920 = vrcp.f32 %v2422_v4  ;;  %v2403_v24 = vand.u32 2147483648, %v5747_v5  ;;  %v2676_v50 = vmin.f32 %v5794_v15, 0.0 }
 0x3aa   :  { %v3907_v28 = vpop.eup %3906  ;;  %v2392_v10 = vmul.f32 %v3905_v25, %v5716_v37  ;;  %v2390_v42 = vsel %vm2388_vm1, %v2389_v8, %v2387_v30  ;;  %vm2407_vm7 = vcmp.eq.f32.partialorder %v5765_v34, inf  ;;  %v2976_v13 = vadd.f32 %v2975_v48, %v2929_v38 }
 0x3ab   :  { %v3384_v59 = vadd.f32 -1.0, %v3907_v28  ;;  %v5803_v7 = vpop.eup %3908  ;;  %vm2627_vm8 = vcmp.gt.f32.partialorder %v5719_v49, 0.0  ;;  %3922 = vrcp.f32 %v2423_v6  ;;  %v2677_v8 = vmin.f32 %v5798_v58, 0.0 }
 0x3ac   :  { %v2394_v17 = vsel %vm2393_vm0, %v5716_v37, %v2392_v10  ;;  %v3911_v16 = vpop.eup %3910  ;;  %2977 = vadd.xlane.f32.xlu0 %v2976_v13  ;;  %v2678_v35 = vmin.f32 %v5801_v32, 0.0  ;;  %v2730_v25 = vmul.f32 1.442695, %v2676_v50  ;;  %v2424_v19 = vadd.f32 1e-06, %v2390_v42 }
 0x3ad   :  { %v2865_v14 = vsel %vm2625_vm2, %v5692_v53, %v3384_v59  ;;  %v2397_v26 = vsel %vm2395_vm3, %v2396_v18, %v2394_v17  ;;  %v3385_v4 = vadd.f32 -1.0, %v3911_v16  ;;  %v2518_v37 = vmul.f32 %v5714_v61, %v5534_v51 }
 0x3ae   :  { %v3913_v41 = vpop.eup %3912  ;;  %v2930_v23 = vmul.f32 %v5617_v44, %v2865_v14  ;;  %v2519_v18 = vmul.f32 %v5714_v61, %v5538_v54  ;;  %3924 = vpow2.f32 %v2730_v25  ;;  %v2732_v10 = vmul.f32 1.442695, %v2677_v8 }
 0x3af   :  { %v2399_v55 = vmul.f32 %v3913_v41, %v5747_v5  ;;  %v2866_v53 = vsel %vm2626_vm4, %v5697_v11, %v3385_v4  ;;  %v2425_v48 = vadd.f32 1e-06, %v2397_v26  ;;  %v2734_v59 = vmul.f32 1.442695, %v2678_v35 }
 0x3b0   :  { %v3915_v6 = vpop.eup %3914  ;;  %v2931_v30 = vmul.f32 %v5622_v47, %v2866_v53  ;;  %v2520_v51 = vmul.f32 %v5714_v61, %v5546_v3  ;;  %vm2409_vm9 = vcmp.eq.f32.partialorder %v5765_v34, 0.0  ;;  %3926 = vpow2.f32 %v2732_v10 }
 0x3b1   :  { %v2401_v28 = vsel %vm2400_vm5, %v5747_v5, %v2399_v55  ;;  %v5834_v38 = vpop.eup %3916  ;;  %v2406_v11 = vmul.f32 %v3915_v6, %v5765_v34  ;;  %v5841_v50 = vadd.f32 %v5603_v20, %v2518_v37  ;;  %3928 = vpow2.f32 %v2734_v59 }
 0x3b2   :  { %v3919_v17 = vpop.eup %3918  ;;  %v2979_v54 = vadd.f32 %v2931_v30, %v2930_v23  ;;  %v2404_v16 = vsel %vm2402_vm6, %v2403_v24, %v2401_v28  ;;  %v5846_v13 = vadd.f32 %v5610_v56, %v2519_v18  ;;  %3930 = vrcp.f32 %v2424_v19 }
 0x3b3   :  { %v3386_v42 = vadd.f32 -1.0, %v3919_v17  ;;  %v2408_v3 = vsel %vm2407_vm7, %v5765_v34, %v2406_v11  ;;  %v2410_v61 = vand.u32 2147483648, %v5765_v34  ;;  %v5853_v14 = vadd.f32 %v5614_v45, %v2520_v51  ;;  %v5855_v41 = vpop.eup %3920 }
 0x3b4   :  { %3932 = vrcp.f32 %v2425_v48  ;;  %vm2628_vm10 = vcmp.gt.f32.partialorder %v5794_v15, 0.0  ;;  %v2679_v24 = vmin.f32 %v5841_v50, 0.0  ;;  %v2426_v26 = vadd.f32 1e-06, %v2404_v16 }
 0x3b5   :  { %v2867_v5 = vsel %vm2627_vm8, %v5719_v49, %v3386_v42  ;;  %vm2629_vm11 = vcmp.gt.f32.partialorder %v5798_v58, 0.0  ;;  %v2680_v23 = vmin.f32 %v5846_v13, 0.0  ;;  %v2681_v55 = vmin.f32 %v5853_v14, 0.0  ;;  %v5866_v8 = vpop.eup %3922 }
 0x3b6   :  { %v2932_v4 = vmul.f32 %v5625_v33, %v2867_v5  ;;  %v2411_v35 = vsel %vm2409_vm9, %v2410_v61, %v2408_v3  ;;  %v2736_v25 = vmul.f32 1.442695, %v2679_v24  ;;  %v2521_v49 = vmul.f32 %v5725_v57, %v5542_v36 }
 0x3b7   :  { %v2522_v19 = vmul.f32 %v5725_v57, %v5550_v22  ;;  %v2738_v37 = vmul.f32 1.442695, %v2680_v23  ;;  %v2740_v18 = vmul.f32 1.442695, %v2681_v55  ;;  %v2523_v6 = vmul.f32 %v5725_v57, %v5562_v31 }
 0x3b8   :  { %v2980_v53 = vadd.f32 %v2979_v54, %v2932_v4  ;;  %3934 = vpow2.f32 %v2736_v25  ;;  %v5877_v28 = vadd.f32 %v5603_v20, %v2521_v49  ;;  %v2524_v30 = vmul.f32 %v5741_v40, %v5554_v0  ;;  %v3925_v36 = vpop.eup %3924 }
 0x3b9   :  { %v5880_v34 = vadd.f32 %v5610_v56, %v2522_v19  ;;  %vm2630_vm12 = vcmp.gt.f32.partialorder %v5801_v32, 0.0  ;;  %3936 = vpow2.f32 %v2738_v37  ;;  %v5886_v22 = vadd.f32 %v5614_v45, %v2523_v6 }
 0x3ba   :  { %2981 = vadd.xlane.f32.xlu1 %v2980_v53  ;;  %v2525_v31 = vmul.f32 %v5741_v40, %v5558_v9  ;;  %v2427_v57 = vadd.f32 1e-06, %v2411_v35  ;;  %v3387_v10 = vadd.f32 -1.0, %v3925_v36  ;;  %3938 = vpow2.f32 %v2740_v18  ;;  %v3927_v11 = vpop.eup %3926 }
 0x3bb   :  { %v2526_v48 = vmul.f32 %v5741_v40, %v5569_v2  ;;  %3940 = vrcp.f32 %v2426_v26  ;;  %v2682_v0 = vmin.f32 %v5877_v28, 0.0  ;;  %v2683_v59 = vmin.f32 %v5880_v34, 0.0  ;;  %v3929_v17 = vpop.eup %3928 }
 0x3bc   :  { %v2684_v51 = vmin.f32 %v5886_v22, 0.0  ;;  %v3388_v54 = vadd.f32 -1.0, %v3927_v11  ;;  %v2868_v9 = vsel %vm2628_vm10, %v5794_v15, %v3387_v10  ;;  %vm2631_vm13 = vcmp.gt.f32.partialorder %v5841_v50, 0.0  ;;  %v5905_v40 = vpop.eup %3930 }
 0x3bd   :  { %v5900_v16 = vadd.f32 %v5603_v20, %v2524_v30  ;;  %v5903_v2 = vadd.f32 %v5610_v56, %v2525_v31  ;;  %v3389_v42 = vadd.f32 -1.0, %v3929_v17  ;;  %v2933_v3 = vmul.f32 %v5617_v44, %v2868_v9 }
 0x3be   :  { %v2742_v61 = vmul.f32 1.442695, %v2682_v0  ;;  %v2744_v5 = vmul.f32 1.442695, %v2683_v59  ;;  %v5908_v24 = vpop.eup %3932  ;;  %3942 = vrcp.f32 %v2427_v57  ;;  %v2869_v15 = vsel %vm2629_vm11, %v5798_v58, %v3388_v54 }
 0x3bf   :  { %v2746_v26 = vmul.f32 1.442695, %v2684_v51  ;;  %v5914_v4 = vadd.f32 %v5614_v45, %v2526_v48  ;;  %v2870_v23 = vsel %vm2630_vm12, %v5801_v32, %v3389_v42  ;;  %v2934_v55 = vmul.f32 %v5622_v47, %v2869_v15 }
 0x3c0   :  { %vm2632_vm14 = vcmp.gt.f32.partialorder %v5846_v13, 0.0  ;;  %3944 = vpow2.f32 %v2742_v61  ;;  %v2935_v35 = vmul.f32 %v5625_v33, %v2870_v23  ;;  %vm2633_vm15 = vcmp.gt.f32.partialorder %v5853_v14, 0.0 }
 0x3c1   :  { %3946 = vpow2.f32 %v2744_v5  ;;  %v2685_v58 = vmin.f32 %v5900_v16, 0.0  ;;  %v2983_v25 = vadd.f32 %v2934_v55, %v2933_v3  ;;  %v2686_v49 = vmin.f32 %v5903_v2, 0.0 }
 0x3c2   :  { %3948 = vpow2.f32 %v2746_v26  ;;  %v2687_v19 = vmin.f32 %v5914_v4, 0.0  ;;  %v3935_v53 = vpop.eup %3934  ;;  %v2527_v37 = vmul.f32 %v5770_v39, %v5576_v52  ;;  %v2528_v18 = vmul.f32 %v5770_v39, %v5580_v21 }
 0x3c3   :  { %v2748_v32 = vmul.f32 1.442695, %v2685_v58  ;;  %v2529_v6 = vmul.f32 %v5770_v39, %v5595_v60  ;;  %v3937_v30 = vpop.eup %3936  ;;  %v2984_v36 = vadd.f32 %v2983_v25, %v2935_v35  ;;  %v3390_v31 = vadd.f32 -1.0, %v3935_v53 }
 0x3c4   :  { %v2750_v57 = vmul.f32 1.442695, %v2686_v49  ;;  %v2752_v10 = vmul.f32 1.442695, %v2687_v19  ;;  %v3939_v48 = vpop.eup %3938  ;;  %v3391_v11 = vadd.f32 -1.0, %v3937_v30  ;;  %v5933_v0 = vadd.f32 %v5603_v20, %v2527_v37 }
 0x3c5   :  { %3950 = vpow2.f32 %v2748_v32  ;;  %v5936_v59 = vadd.f32 %v5610_v56, %v2528_v18  ;;  %v5938_v52 = vpop.eup %3940  ;;  %2985 = vadd.xlane.f32.xlu0 %v2984_v36  ;;  %v3392_v21 = vadd.f32 -1.0, %v3939_v48  ;;  %v2871_v39 = vsel %vm2631_vm13, %v5841_v50, %v3390_v31 }
 0x3c6   :  { %3952 = vpow2.f32 %v2750_v57  ;;  %v5944_v60 = vadd.f32 %v5614_v45, %v2529_v6  ;;  %v2872_v51 = vsel %vm2632_vm14, %v5846_v13, %v3391_v11  ;;  %v2936_v17 = vmul.f32 %v5617_v44, %v2871_v39 }
 0x3c7   :  { %vm2634_vm0 = vcmp.gt.f32.partialorder %v5877_v28, 0.0  ;;  %3954 = vpow2.f32 %v2752_v10  ;;  %v2873_v54 = vsel %vm2633_vm15, %v5853_v14, %v3392_v21  ;;  %v2937_v9 = vmul.f32 %v5622_v47, %v2872_v51 }
 0x3c8   :  { %vm2635_vm1 = vcmp.gt.f32.partialorder %v5880_v34, 0.0  ;;  %vm2636_vm2 = vcmp.gt.f32.partialorder %v5886_v22, 0.0  ;;  %v5957_v50 = vpop.eup %3942  ;;  %v2938_v42 = vmul.f32 %v5625_v33, %v2873_v54  ;;  %v2688_v13 = vmin.f32 %v5933_v0, 0.0 }
 0x3c9   :  { %v2689_v3 = vmin.f32 %v5936_v59, 0.0  ;;  %v2690_v61 = vmin.f32 %v5944_v60, 0.0  ;;  %v2987_v15 = vadd.f32 %v2937_v9, %v2936_v17  ;;  %v2530_v14 = vmul.f32 %v5778_v1, %v5584_v63 }
 0x3ca   :  { %v3945_v5 = vpop.eup %3944  ;;  %v2531_v26 = vmul.f32 %v5778_v1, %v5588_v12  ;;  %v2532_v23 = vmul.f32 %v5778_v1, %v5599_v46  ;;  %vm2637_vm3 = vcmp.gt.f32.partialorder %v5900_v16, 0.0  ;;  %v2754_v58 = vmul.f32 1.442695, %v2688_v13 }
 0x3cb   :  { %v3947_v55 = vpop.eup %3946  ;;  %v3393_v35 = vadd.f32 -1.0, %v3945_v5  ;;  %v2756_v25 = vmul.f32 1.442695, %v2689_v3  ;;  %v2988_v19 = vadd.f32 %v2987_v15, %v2938_v42  ;;  %v2758_v32 = vmul.f32 1.442695, %v2690_v61 }
 0x3cc   :  { %v3949_v49 = vpop.eup %3948  ;;  %v3394_v53 = vadd.f32 -1.0, %v3947_v55  ;;  %v5971_v37 = vadd.f32 %v5603_v20, %v2530_v14  ;;  %3956 = vpow2.f32 %v2754_v58  ;;  %v5977_v46 = vadd.f32 %v5610_v56, %v2531_v26 }
 0x3cd   :  { %v3395_v63 = vadd.f32 -1.0, %v3949_v49  ;;  %v2874_v12 = vsel %vm2634_vm0, %v5877_v28, %v3393_v35  ;;  %2989 = vadd.xlane.f32.xlu1 %v2988_v19  ;;  %3958 = vpow2.f32 %v2756_v25  ;;  %v5984_v6 = vadd.f32 %v5614_v45, %v2532_v23 }
 0x3ce   :  { %v2875_v1 = vsel %vm2635_vm1, %v5880_v34, %v3394_v53  ;;  %v2939_v18 = vmul.f32 %v5617_v44, %v2874_v12  ;;  %vm2638_vm4 = vcmp.gt.f32.partialorder %v5903_v2, 0.0  ;;  %3960 = vpow2.f32 %v2758_v32 }
 0x3cf   :  { %v3951_v30 = vpop.eup %3950  ;;  %v2876_v28 = vsel %vm2636_vm2, %v5886_v22, %v3395_v63  ;;  %v2940_v36 = vmul.f32 %v5622_v47, %v2875_v1  ;;  %vm2639_vm5 = vcmp.gt.f32.partialorder %v5914_v4, 0.0  ;;  %v2533_v10 = vmul.f32 %v5803_v7, %v5376_v62  ;;  %v6426_v63 = vld [vmem:[#allocation22_spill] sm:$0xff] }
 0x3d0   :  { %v3953_v31 = vpop.eup %3952  ;;  %v2941_v57 = vmul.f32 %v5625_v33, %v2876_v28  ;;  %v3396_v34 = vadd.f32 -1.0, %v3951_v30  ;;  %v2691_v39 = vmin.f32 %v5971_v37, 0.0  ;;  %v2692_v22 = vmin.f32 %v5977_v46, 0.0  ;;  %v6427_v28 = vld [vmem:[#allocation23_spill] sm:$0xff] }
 0x3d1   :  { %v3955_v48 = vpop.eup %3954  ;;  %v2991_v11 = vadd.f32 %v2940_v36, %v2939_v18  ;;  %v3397_v21 = vadd.f32 -1.0, %v3953_v31  ;;  %v2693_v54 = vmin.f32 %v5984_v6, 0.0  ;;  %v2534_v9 = vmul.f32 %v5803_v7, %v5379_v29 }
 0x3d2   :  { %v3398_v51 = vadd.f32 -1.0, %v3955_v48  ;;  %v2877_v17 = vsel %vm2637_vm3, %v5900_v16, %v3396_v34  ;;  %v2760_v3 = vmul.f32 1.442695, %v2691_v39  ;;  %v2762_v16 = vmul.f32 1.442695, %v2692_v22  ;;  %v6428_v22 = vld [vmem:[#allocation24_spill] sm:$0xff] }
 0x3d3   :  { %v2992_v42 = vadd.f32 %v2991_v11, %v2941_v57  ;;  %v2878_v62 = vsel %vm2638_vm4, %v5903_v2, %v3397_v21  ;;  %v2942_v13 = vmul.f32 %v5617_v44, %v2877_v17  ;;  %v2764_v15 = vmul.f32 1.442695, %v2693_v54  ;;  %v6429_v54 = vld [vmem:[#allocation25_spill] sm:$0xff] }
 0x3d4   :  { %v2879_v61 = vsel %vm2639_vm5, %v5914_v4, %v3398_v51  ;;  %v2943_v5 = vmul.f32 %v5622_v47, %v2878_v62  ;;  %vm2640_vm6 = vcmp.gt.f32.partialorder %v5933_v0, 0.0  ;;  %3962 = vpow2.f32 %v2760_v3 }
 0x3d5   :  { %2993 = vadd.xlane.f32.xlu0 %v2992_v42  ;;  %v2535_v29 = vmul.f32 %v5803_v7, %v5393_v43  ;;  %v6015_v2 = vadd.f32 %v5603_v20, %v2533_v10  ;;  %v2944_v14 = vmul.f32 %v5625_v33, %v2879_v61  ;;  %3964 = vpow2.f32 %v2762_v16 }
 0x3d6   :  { %v2995_v26 = vadd.f32 %v2943_v5, %v2942_v13  ;;  %v6019_v4 = vadd.f32 %v5610_v56, %v2534_v9  ;;  %v3957_v23 = vpop.eup %3956  ;;  %vm2641_vm7 = vcmp.gt.f32.partialorder %v5936_v59, 0.0  ;;  %3966 = vpow2.f32 %v2764_v15 }
 0x3d7   :  { %v6023_v55 = vadd.f32 %v5614_v45, %v2535_v29  ;;  %v2694_v35 = vmin.f32 %v6015_v2, 0.0  ;;  %v3959_v43 = vpop.eup %3958  ;;  %vm2642_vm8 = vcmp.gt.f32.partialorder %v5944_v60, 0.0  ;;  %v3399_v58 = vadd.f32 -1.0, %v3957_v23  ;;  %v6430_v29 = vld [vmem:[#allocation28_spill] sm:$0xff] }
 0x3d8   :  { %v2996_v7 = vadd.f32 %v2995_v26, %v2944_v14  ;;  %v2695_v25 = vmin.f32 %v6019_v4, 0.0  ;;  %v3961_v49 = vpop.eup %3960  ;;  %v3400_v19 = vadd.f32 -1.0, %v3959_v43  ;;  %v2536_v12 = vmul.f32 %v5834_v38, %v6426_v63 }
 0x3d9   :  { %v2696_v53 = vmin.f32 %v6023_v55, 0.0  ;;  %v2766_v32 = vmul.f32 1.442695, %v2694_v35  ;;  %v3401_v1 = vadd.f32 -1.0, %v3961_v49  ;;  %v2880_v18 = vsel %vm2640_vm6, %v5933_v0, %v3399_v58 }
 0x3da   :  { %2997 = vadd.xlane.f32.xlu1 %v2996_v7  ;;  %v2768_v30 = vmul.f32 1.442695, %v2695_v25  ;;  %v2537_v36 = vmul.f32 %v5834_v38, %v6427_v28  ;;  %v2881_v31 = vsel %vm2641_vm7, %v5936_v59, %v3400_v19  ;;  %v2945_v57 = vmul.f32 %v5617_v44, %v2880_v18  ;;  %v6431_v28 = vld [vmem:[#allocation26_spill] sm:$0xff] }
 0x3db   :  { %3968 = vpow2.f32 %v2766_v32  ;;  %v2770_v34 = vmul.f32 1.442695, %v2696_v53  ;;  %v2882_v10 = vsel %vm2642_vm8, %v5944_v60, %v3401_v1  ;;  %v2946_v48 = vmul.f32 %v5622_v47, %v2881_v31 }
 0x3dc   :  { %3970 = vpow2.f32 %v2768_v30  ;;  %v2538_v0 = vmul.f32 %v5834_v38, %v5398_v27  ;;  %vm2643_vm9 = vcmp.gt.f32.partialorder %v5971_v37, 0.0  ;;  %v6048_v11 = vadd.f32 %v5603_v20, %v2536_v12 }
 0x3dd   :  { %3972 = vpow2.f32 %v2770_v34  ;;  %v6051_v59 = vadd.f32 %v5610_v56, %v2537_v36  ;;  %v2947_v21 = vmul.f32 %v5625_v33, %v2882_v10  ;;  %v2999_v39 = vadd.f32 %v2946_v48, %v2945_v57 }
 0x3de   :  { %v6055_v60 = vadd.f32 %v5614_v45, %v2538_v0  ;;  %v2539_v51 = vmul.f32 %v5855_v41, %v6428_v22  ;;  %v3963_v17 = vpop.eup %3962  ;;  %vm2644_vm10 = vcmp.gt.f32.partialorder %v5977_v46, 0.0  ;;  %v2697_v27 = vmin.f32 %v6048_v11, 0.0 }
 0x3df   :  { %v2698_v38 = vmin.f32 %v6051_v59, 0.0  ;;  %v2540_v9 = vmul.f32 %v5855_v41, %v6429_v54  ;;  %v3965_v42 = vpop.eup %3964  ;;  %v3000_v62 = vadd.f32 %v2999_v39, %v2947_v21  ;;  %vm2645_vm11 = vcmp.gt.f32.partialorder %v5984_v6, 0.0 }
 0x3e0   :  { %v3402_v13 = vadd.f32 -1.0, %v3963_v17  ;;  %v2699_v3 = vmin.f32 %v6055_v60, 0.0  ;;  %v3967_v61 = vpop.eup %3966  ;;  %v3403_v5 = vadd.f32 -1.0, %v3965_v42  ;;  %v2772_v16 = vmul.f32 1.442695, %v2697_v27  ;;  %v6432_v17 = vld [vmem:[#allocation27_spill] sm:$0xff] }
 0x3e1   :  { %v2774_v15 = vmul.f32 1.442695, %v2698_v38  ;;  %v2541_v14 = vmul.f32 %v5855_v41, %v6430_v29  ;;  %3001 = vadd.xlane.f32.xlu0 %v3000_v62  ;;  %v3404_v26 = vadd.f32 -1.0, %v3967_v61  ;;  %v6072_v43 = vadd.f32 %v5603_v20, %v2539_v51  ;;  %v6433_v27 = vld [vmem:[#allocation29_spill] sm:$0xff] }
 0x3e2   :  { %v2883_v23 = vsel %vm2643_vm9, %v5971_v37, %v3402_v13  ;;  %v2776_v35 = vmul.f32 1.442695, %v2699_v3  ;;  %v2884_v7 = vsel %vm2644_vm10, %v5977_v46, %v3403_v5  ;;  %3974 = vpow2.f32 %v2772_v16  ;;  %v6434_v16 = vld [vmem:[#allocation18_spill] sm:$0xff] }
 0x3e3   :  { %v2948_v58 = vmul.f32 %v5617_v44, %v2883_v23  ;;  %v6079_v25 = vadd.f32 %v5610_v56, %v2540_v9  ;;  %v2885_v41 = vsel %vm2645_vm11, %v5984_v6, %v3404_v26  ;;  %v2949_v37 = vmul.f32 %v5622_v47, %v2884_v7 }
 0x3e4   :  { %3976 = vpow2.f32 %v2774_v15  ;;  %v6086_v49 = vadd.f32 %v5614_v45, %v2541_v14  ;;  %vm2646_vm12 = vcmp.gt.f32.partialorder %v6015_v2, 0.0  ;;  %vm2647_vm13 = vcmp.gt.f32.partialorder %v6019_v4, 0.0 }
 0x3e5   :  { %v3969_v19 = vpop.eup %3968  ;;  %vm2648_vm14 = vcmp.gt.f32.partialorder %v6023_v55, 0.0  ;;  %3978 = vpow2.f32 %v2776_v35  ;;  %v2950_v53 = vmul.f32 %v5625_v33, %v2885_v41  ;;  %v3003_v32 = vadd.f32 %v2949_v37, %v2948_v58  ;;  %v6435_v35 = vld [vmem:[#allocation30_spill] sm:$0xff] }
 0x3e6   :  { %v3971_v46 = vpop.eup %3970  ;;  %v3405_v63 = vadd.f32 -1.0, %v3969_v19  ;;  %v2700_v6 = vmin.f32 %v6072_v43, 0.0  ;;  %v2701_v18 = vmin.f32 %v6079_v25, 0.0  ;;  %v2702_v30 = vmin.f32 %v6086_v49, 0.0  ;;  %v6436_v19 = vld [vmem:[#allocation31_spill] sm:$0xff] }
 0x3e7   :  { %v3973_v12 = vpop.eup %3972  ;;  %v3406_v1 = vadd.f32 -1.0, %v3971_v46  ;;  %v2542_v36 = vmul.f32 %v5866_v8, %v6431_v28  ;;  %v3004_v31 = vadd.f32 %v3003_v32, %v2950_v53  ;;  %vm2649_vm15 = vcmp.gt.f32.partialorder %v6048_v11, 0.0 }
 0x3e8   :  { %v3407_v57 = vadd.f32 -1.0, %v3973_v12  ;;  %v2886_v34 = vsel %vm2646_vm12, %v6015_v2, %v3405_v63  ;;  %v2778_v10 = vmul.f32 1.442695, %v2700_v6  ;;  %v2780_v21 = vmul.f32 1.442695, %v2701_v18 }
 0x3e9   :  { %v2887_v48 = vsel %vm2647_vm13, %v6019_v4, %v3406_v1  ;;  %v2951_v0 = vmul.f32 %v5617_v44, %v2886_v34  ;;  %v2782_v39 = vmul.f32 1.442695, %v2702_v30  ;;  %3005 = vadd.xlane.f32.xlu1 %v3004_v31  ;;  %v2543_v2 = vmul.f32 %v5866_v8, %v6432_v17 }
 0x3ea   :  { %v2888_v22 = vsel %vm2648_vm14, %v6023_v55, %v3407_v57  ;;  %v2952_v51 = vmul.f32 %v5622_v47, %v2887_v48  ;;  %3980 = vpow2.f32 %v2778_v10  ;;  %v2544_v4 = vmul.f32 %v5866_v8, %v6433_v27  ;;  %v6437_v57 = vld [vmem:[#allocation16_spill] sm:$0xff] }
 0x3eb   :  { %3982 = vpow2.f32 %v2780_v21  ;;  %v6114_v38 = vadd.f32 %v5603_v20, %v2542_v36  ;;  %v2953_v54 = vmul.f32 %v5625_v33, %v2888_v22  ;;  %v6118_v55 = vadd.f32 %v5610_v56, %v2543_v2  ;;  %v6438_v2 = vld [vmem:[#allocation17_spill] sm:$0xff] }
 0x3ec   :  { %v3007_v9 = vadd.f32 %v2952_v51, %v2951_v0  ;;  %3984 = vpow2.f32 %v2782_v39  ;;  %v3975_v42 = vpop.eup %3974  ;;  %vm2650_vm0 = vcmp.gt.f32.partialorder %v6051_v59, 0.0  ;;  %vm2651_vm1 = vcmp.gt.f32.partialorder %v6055_v60, 0.0 }
 0x3ed   :  { %v6123_v62 = vadd.f32 %v5614_v45, %v2544_v4  ;;  %v2703_v8 = vmin.f32 %v6114_v38, 0.0  ;;  %v3408_v61 = vadd.f32 -1.0, %v3975_v42  ;;  %v2704_v5 = vmin.f32 %v6118_v55, 0.0 }
 0x3ee   :  { %v3977_v13 = vpop.eup %3976  ;;  %v3008_v3 = vadd.f32 %v3007_v9, %v2953_v54  ;;  %v2545_v15 = vmul.f32 %v5905_v40, %v6434_v16  ;;  %v2546_v7 = vmul.f32 %v5905_v40, %v6435_v35  ;;  %v2547_v46 = vmul.f32 %v5905_v40, %v6436_v19 }
 0x3ef   :  { %v3979_v29 = vpop.eup %3978  ;;  %v3409_v14 = vadd.f32 -1.0, %v3977_v13  ;;  %v2705_v26 = vmin.f32 %v6123_v62, 0.0  ;;  %v2784_v23 = vmul.f32 1.442695, %v2703_v8  ;;  %v2889_v41 = vsel %vm2649_vm15, %v6048_v11, %v3408_v61 }
 0x3f0   :  { %3009 = vadd.xlane.f32.xlu0 %v3008_v3  ;;  %v3410_v58 = vadd.f32 -1.0, %v3979_v29  ;;  %v2786_v37 = vmul.f32 1.442695, %v2704_v5  ;;  %v2954_v32 = vmul.f32 %v5617_v44, %v2889_v41  ;;  %v6146_v11 = vadd.f32 %v5603_v20, %v2545_v15  ;;  %v6441_v41 = vld [vmem:[#allocation34_spill] sm:$0xff] }
 0x3f1   :  { %v2890_v53 = vsel %vm2650_vm0, %v6051_v59, %v3409_v14  ;;  %3986 = vpow2.f32 %v2784_v23  ;;  %v2788_v63 = vmul.f32 1.442695, %v2705_v26  ;;  %vm2652_vm2 = vcmp.gt.f32.partialorder %v6072_v43, 0.0  ;;  %v6440_v14 = vld [vmem:[#allocation33_spill] sm:$0xff] }
 0x3f2   :  { %v2891_v6 = vsel %vm2651_vm1, %v6055_v60, %v3410_v58  ;;  %v2955_v12 = vmul.f32 %v5622_v47, %v2890_v53  ;;  %3988 = vpow2.f32 %v2786_v37  ;;  %v6150_v40 = vadd.f32 %v5610_v56, %v2546_v7 }
 0x3f3   :  { %3990 = vpow2.f32 %v2788_v63  ;;  %v6153_v59 = vadd.f32 %v5614_v45, %v2547_v46  ;;  %v2956_v18 = vmul.f32 %v5625_v33, %v2891_v6  ;;  %vm2653_vm3 = vcmp.gt.f32.partialorder %v6079_v25, 0.0 }
 0x3f4   :  { %v3981_v1 = vpop.eup %3980  ;;  %v3011_v30 = vadd.f32 %v2955_v12, %v2954_v32  ;;  %v2706_v60 = vmin.f32 %v6146_v11, 0.0  ;;  %vm2654_vm4 = vcmp.gt.f32.partialorder %v6086_v49, 0.0  ;;  %v2707_v31 = vmin.f32 %v6150_v40, 0.0 }
 0x3f5   :  { %v3983_v28 = vpop.eup %3982  ;;  %v3411_v36 = vadd.f32 -1.0, %v3981_v1  ;;  %v2548_v34 = vmul.f32 %v5908_v24, %v6437_v57  ;;  %v2708_v21 = vmin.f32 %v6153_v59, 0.0  ;;  %v2549_v27 = vmul.f32 %v5908_v24, %v6438_v2  ;;  %v6442_v1 = vld [vmem:[#allocation37_spill] sm:$0xff] }
 0x3f6   :  { %v3985_v10 = vpop.eup %3984  ;;  %v3012_v48 = vadd.f32 %v3011_v30, %v2956_v18  ;;  %v3412_v0 = vadd.f32 -1.0, %v3983_v28  ;;  %v2790_v39 = vmul.f32 1.442695, %v2706_v60  ;;  %v2792_v17 = vmul.f32 1.442695, %v2707_v31 }
 0x3f7   :  { %v3413_v22 = vadd.f32 -1.0, %v3985_v10  ;;  %v2892_v51 = vsel %vm2652_vm2, %v6072_v43, %v3411_v36  ;;  %v2794_v9 = vmul.f32 1.442695, %v2708_v21  ;;  %v6439_v43 = vld [vmem:[#allocation32_spill] sm:$0xff]  ;;  %vm2655_vm5 = vcmp.gt.f32.partialorder %v6114_v38, 0.0 }
 0x3f8   :  { %3013 = vadd.xlane.f32.xlu1 %v3012_v48  ;;  %v2893_v4 = vsel %vm2653_vm3, %v6079_v25, %v3412_v0  ;;  %v2957_v54 = vmul.f32 %v5617_v44, %v2892_v51  ;;  %3992 = vpow2.f32 %v2790_v39  ;;  %v2550_v13 = vmul.f32 %v5908_v24, %v6439_v43 }
 0x3f9   :  { %v2894_v42 = vsel %vm2654_vm4, %v6086_v49, %v3413_v22  ;;  %v2958_v8 = vmul.f32 %v5622_v47, %v2893_v4  ;;  %3994 = vpow2.f32 %v2792_v17  ;;  %v6180_v3 = vadd.f32 %v5603_v20, %v2548_v34  ;;  %v6443_v22 = vld [vmem:[#allocation35_spill] sm:$0xff] }
 0x3fa   :  { %3996 = vpow2.f32 %v2794_v9  ;;  %v6183_v25 = vadd.f32 %v5610_v56, %v2549_v27  ;;  %v2959_v5 = vmul.f32 %v5625_v33, %v2894_v42  ;;  %vm2656_vm6 = vcmp.gt.f32.partialorder %v6118_v55, 0.0 }
 0x3fb   :  { %v3987_v61 = vpop.eup %3986  ;;  %v3015_v16 = vadd.f32 %v2958_v8, %v2957_v54  ;;  %v6188_v49 = vadd.f32 %v5614_v45, %v2550_v13  ;;  %vm2657_vm7 = vcmp.gt.f32.partialorder %v6123_v62, 0.0  ;;  %v2709_v29 = vmin.f32 %v6180_v3, 0.0  ;;  %v6444_v8 = vld [vmem:[#allocation36_spill] sm:$0xff] }
 0x3fc   :  { %v3989_v15 = vpop.eup %3988  ;;  %v3414_v24 = vadd.f32 -1.0, %v3987_v61  ;;  %v2551_v26 = vmul.f32 %v5938_v52, %v6440_v14  ;;  %v2710_v58 = vmin.f32 %v6183_v25, 0.0  ;;  %v2552_v37 = vmul.f32 %v5938_v52, %v6441_v41 }
 0x3fd   :  { %v3991_v23 = vpop.eup %3990  ;;  %v3016_v35 = vadd.f32 %v3015_v16, %v2959_v5  ;;  %v3415_v7 = vadd.f32 -1.0, %v3989_v15  ;;  %v2711_v53 = vmin.f32 %v6188_v49, 0.0  ;;  %v2796_v32 = vmul.f32 1.442695, %v2709_v29  ;;  %v6445_v5 = vld [vmem:[#allocation38_spill] sm:$0xff] }
 0x3fe   :  { %v3416_v19 = vadd.f32 -1.0, %v3991_v23  ;;  %v2895_v46 = vsel %vm2655_vm5, %v6114_v38, %v3414_v24  ;;  %v2798_v12 = vmul.f32 1.442695, %v2710_v58  ;;  %v2553_v18 = vmul.f32 %v5938_v52, %v6442_v1 }
 0x3ff   :  { %3017 = vadd.xlane.f32.xlu0 %v3016_v35  ;;  %v2896_v63 = vsel %vm2656_vm6, %v6118_v55, %v3415_v7  ;;  %v2960_v6 = vmul.f32 %v5617_v44, %v2895_v46  ;;  %3998 = vpow2.f32 %v2796_v32  ;;  %v2800_v60 = vmul.f32 1.442695, %v2711_v53 }
 0x400   :  { %v2897_v30 = vsel %vm2657_vm7, %v6123_v62, %v3416_v19  ;;  %v2961_v38 = vmul.f32 %v5622_v47, %v2896_v63  ;;  %vm2658_vm8 = vcmp.gt.f32.partialorder %v6146_v11, 0.0  ;;  %4000 = vpow2.f32 %v2798_v12 }
 0x401   :  { %v6213_v28 = vadd.f32 %v5603_v20, %v2551_v26  ;;  %v6216_v55 = vadd.f32 %v5610_v56, %v2552_v37  ;;  %v2962_v52 = vmul.f32 %v5625_v33, %v2897_v30  ;;  %4002 = vpow2.f32 %v2800_v60 }
 0x402   :  { %v3993_v36 = vpop.eup %3992  ;;  %v3019_v31 = vadd.f32 %v2961_v38, %v2960_v6  ;;  %v6220_v62 = vadd.f32 %v5614_v45, %v2553_v18  ;;  %vm2659_vm9 = vcmp.gt.f32.partialorder %v6150_v40, 0.0  ;;  %vm2660_vm10 = vcmp.gt.f32.partialorder %v6153_v59, 0.0 }
 0x403   :  { %v3995_v57 = vpop.eup %3994  ;;  %v3417_v34 = vadd.f32 -1.0, %v3993_v36  ;;  %v2712_v10 = vmin.f32 %v6213_v28, 0.0  ;;  %v2713_v39 = vmin.f32 %v6216_v55, 0.0  ;;  %v2554_v51 = vmul.f32 %v5957_v50, %v6443_v22 }
 0x404   :  { %v3997_v48 = vpop.eup %3996  ;;  %v3020_v0 = vadd.f32 %v3019_v31, %v2962_v52  ;;  %v3418_v21 = vadd.f32 -1.0, %v3995_v57  ;;  %v2714_v27 = vmin.f32 %v6220_v62, 0.0  ;;  %v2555_v43 = vmul.f32 %v5957_v50, %v6444_v8 }
 0x405   :  { %v3419_v17 = vadd.f32 -1.0, %v3997_v48  ;;  %v2898_v2 = vsel %vm2658_vm8, %v6146_v11, %v3417_v34  ;;  %v2802_v4 = vmul.f32 1.442695, %v2712_v10  ;;  %v2804_v42 = vmul.f32 1.442695, %v2713_v39 }
 0x406   :  { %3021 = vadd.xlane.f32.xlu1 %v3020_v0  ;;  %v2899_v54 = vsel %vm2659_vm9, %v6150_v40, %v3418_v21  ;;  %v2963_v9 = vmul.f32 %v5617_v44, %v2898_v2  ;;  %v2806_v11 = vmul.f32 1.442695, %v2714_v27  ;;  %v2556_v16 = vmul.f32 %v5957_v50, %v6445_v5 }
 0x407   :  { %v2900_v13 = vsel %vm2660_vm10, %v6153_v59, %v3419_v17  ;;  %v2964_v61 = vmul.f32 %v5622_v47, %v2899_v54  ;;  %4004 = vpow2.f32 %v2802_v4  ;;  %v2619_v40 = vadd.f32 %v5603_v20, %v2554_v51 }
 0x408   :  { %4006 = vpow2.f32 %v2804_v42  ;;  %v2965_v15 = vmul.f32 %v5625_v33, %v2900_v13  ;;  %v2620_v29 = vadd.f32 %v5610_v56, %v2555_v43  ;;  %v2621_v26 = vadd.f32 %v5614_v45, %v2556_v16  ;;  %v6446_v13 = vld [vmem:[#allocation15_spill] sm:$0xff] }
 0x409   :  { %v3023_v24 = vadd.f32 %v2964_v61, %v2963_v9  ;;  %4008 = vpow2.f32 %v2806_v11  ;;  %v3999_v14 = vpop.eup %3998  ;;  %v2715_v59 = vmin.f32 %v2619_v40, 0.0  ;;  %vm2661_vm11 = vcmp.gt.f32.partialorder %v6180_v3, 0.0 }
 0x40a   :  { %v4001_v23 = vpop.eup %4000  ;;  %v3420_v7 = vadd.f32 -1.0, %v3999_v14  ;;  %v2716_v58 = vmin.f32 %v2620_v29, 0.0  ;;  %vm2662_vm12 = vcmp.gt.f32.partialorder %v6183_v25, 0.0  ;;  %v2717_v50 = vmin.f32 %v2621_v26, 0.0 }
 0x40b   :  { %v3024_v35 = vadd.f32 %v3023_v24, %v2965_v15  ;;  %v4003_v41 = vpop.eup %4002  ;;  %v3421_v20 = vadd.f32 -1.0, %v4001_v23  ;;  %v2808_v37 = vmul.f32 1.442695, %v2715_v59  ;;  %vm2663_vm13 = vcmp.gt.f32.partialorder %v6188_v49, 0.0 }
 0x40c   :  { %v3422_v56 = vadd.f32 -1.0, %v4003_v41  ;;  %v2901_v19 = vsel %vm2661_vm11, %v6180_v3, %v3420_v7  ;;  %v2810_v45 = vmul.f32 1.442695, %v2716_v58  ;;  %v2812_v32 = vmul.f32 1.442695, %v2717_v50 }
 0x40d   :  { %3025 = vadd.xlane.f32.xlu0 %v3024_v35  ;;  %v2902_v46 = vsel %vm2662_vm12, %v6183_v25, %v3421_v20  ;;  %v2966_v53 = vmul.f32 %v5617_v44, %v2901_v19  ;;  %4010 = vpow2.f32 %v2808_v37  ;;  %vm2664_vm14 = vcmp.gt.f32.partialorder %v6213_v28, 0.0 }
 0x40e   :  { %v2903_v63 = vsel %vm2663_vm13, %v6188_v49, %v3422_v56  ;;  %v2967_v6 = vmul.f32 %v5622_v47, %v2902_v46  ;;  %4012 = vpow2.f32 %v2810_v45  ;;  %vm2665_vm15 = vcmp.gt.f32.partialorder %v6216_v55, 0.0 }
 0x40f   :  { %4014 = vpow2.f32 %v2812_v32  ;;  %v2968_v1 = vmul.f32 %v5625_v33, %v2903_v63  ;;  %vm2666_vm0 = vcmp.gt.f32.partialorder %v6220_v62, 0.0  ;;  %vm2667_vm1 = vcmp.gt.f32.partialorder %v2619_v40, 0.0 }
 0x410   :  { %v3027_v18 = vadd.f32 %v2967_v6, %v2966_v53  ;;  %vm2668_vm2 = vcmp.gt.f32.partialorder %v2620_v29, 0.0  ;;  %vm2669_vm3 = vcmp.gt.f32.partialorder %v2621_v26, 0.0  ;;  %v3077_v61 = vadd.s32 4294967288, %v6446_v13 }
 0x411   :  { %v4005_v12 = vpop.eup %4004  ;;  %v3084_v5 = vadd.s32 4294967280, %v6446_v13  ;;  %v3091_v16 = vadd.s32 4294967272, %v6446_v13  ;;  %v3105_v59 = vadd.s32 4294967256, %v6446_v13  ;;  %v3112_v37 = vadd.s32 4294967248, %v6446_v13 }
 0x412   :  { %v4007_v30 = vpop.eup %4006  ;;  %v3423_v38 = vadd.f32 -1.0, %v4005_v12  ;;  %v3028_v60 = vadd.f32 %v3027_v18, %v2968_v1  ;;  %vm3082_vm4 = vcmask 130112   ;;  %vm3089_vm5 = vcmask 195712  }
 0x413   :  { %v4009_v3 = vpop.eup %4008  ;;  %v3424_v25 = vadd.f32 -1.0, %v4007_v30  ;;  %v3119_v53 = vadd.s32 4294967240, %v6446_v13  ;;  %v3126_v12 = vadd.s32 4294967232, %v6446_v13  ;;  %vm3096_vm6 = vcmask 261312  }
 0x414   :  { %v3425_v36 = vadd.f32 -1.0, %v4009_v3  ;;  %v2904_v49 = vsel %vm2664_vm14, %v6213_v28, %v3423_v38  ;;  %3029 = vadd.xlane.f32.xlu1 %v3028_v60  ;;  %vm3103_vm7 = vcmask 326912   ;;  %vm3110_vm8 = vcmask 392512  }
 0x415   :  { %v2905_v52 = vsel %vm2665_vm15, %v6216_v55, %v3424_v25  ;;  %v2969_v31 = vmul.f32 %v5617_v44, %v2904_v49  ;;  %v3133_v49 = vadd.s32 4294967224, %v6446_v13  ;;  %vm3117_vm9 = vcmask 458112  }
 0x416   :  { %v2906_v57 = vsel %vm2666_vm0, %v6220_v62, %v3425_v36  ;;  %v2970_v34 = vmul.f32 %v5622_v47, %v2905_v52  ;;  %vm3124_vm10 = vcmask 523712   ;;  %vm3131_vm11 = vcmask 589312  }
 0x417   :  { %v4011_v10 = vpop.eup %4010  ;;  %v2971_v48 = vmul.f32 %v5625_v33, %v2906_v57  ;;  %vm3138_vm12 = vcmask 654912   ;;  %vm3145_vm13 = vcmask 720512   ;;  %vm3152_vm14 = vcmask 786112  }
 0x418   :  { %v3031_v0 = vadd.f32 %v2970_v34, %v2969_v31  ;;  %v4013_v21 = vpop.eup %4012  ;;  %v3426_v39 = vadd.f32 -1.0, %v4011_v10  ;;  %vm3159_vm15 = vcmask 851712   ;;  %vm3166_vm0 = vcmask 917312  }
 0x419   :  { %v4015_v22 = vpop.eup %4014  ;;  %v3427_v28 = vadd.f32 -1.0, %v4013_v21 }
 0x41a   :  { %v3032_v51 = vadd.f32 %v3031_v0, %v2971_v48  ;;  %v3428_v17 = vadd.f32 -1.0, %v4015_v22  ;;  %v2907_v2 = vsel %vm2667_vm1, %v2619_v40, %v3426_v39  ;;  %v6447_v40 = vld [vmem:[#allocation12_spill] sm:$0xff]  ;;  %v3140_v39 = vadd.s32 4294967216, %v6446_v13 }
 0x41b   :  { %v2908_v55 = vsel %vm2668_vm2, %v2620_v29, %v3427_v28  ;;  %v2972_v62 = vmul.f32 %v5617_v44, %v2907_v2  ;;  %v6273_v44 = vstv %s6348_s12  ;;  %v3080_v15 = vsub.s32 %v3077_v61, %v6447_v40  ;;  %s4093_s12 = smov [#allocation8]  }
 0x41c   :  { %3033 = vadd.xlane.f32.xlu0 %v3032_v51  ;;  %v2909_v27 = vsel %vm2669_vm3, %v2621_v26, %v3428_v17  ;;  %v2973_v4 = vmul.f32 %v5622_v47, %v2908_v55  ;;  %v3087_v14 = vsub.s32 %v3084_v5, %v6447_v40  ;;  %v3075_v23 = vsub.s32 %v6446_v13, %v6447_v40  ;;  %s3190_s28 = sshll.u32 %s4093_s12, 4  ;;  %s3191_s28 = int_to_ptr.vmem [resolvable:$true] %s3190_s28 }
 0x41d   :  { %v2974_v54 = vmul.f32 %v5625_v33, %v2909_v27  ;;  %v3098_v33 = vadd.s32 4294967264, %v6446_v13  ;;  %v3094_v7 = vsub.s32 %v3091_v16, %v6447_v40  ;;  %v3108_v46 = vsub.s32 %v3105_v59, %v6447_v40  ;;  %s4060_s29 = scalar_lea.vmem %s3191_s28, 16  ;;  %s4064_s30 = scalar_lea.vmem %s3191_s28, 32 }
 0x41e   :  { %v3035_v9 = vadd.f32 %v2973_v4, %v2972_v62  ;;  %v3115_v18 = vsub.s32 %v3112_v37, %v6447_v40  ;;  %v3122_v36 = vsub.s32 %v3119_v53, %v6447_v40  ;;  %v3129_v34 = vsub.s32 %v3126_v12, %v6447_v40  ;;  %p4061_p2 = scmp.ne.s32.totalorder %s3191_s28, %s4060_s29  ;;  %p4065_p3 = scmp.lt.s32.totalorder %s3191_s28, %s3191_s28 }
 0x41f   :  { %v3101_v41 = vsub.s32 %v3098_v33, %v6447_v40  ;;  %v3147_v51 = vadd.s32 4294967208, %v6446_v13  ;;  %v3154_v28 = vadd.s32 4294967200, %v6446_v13  ;;  %v3136_v55 = vsub.s32 %v3133_v49, %v6447_v40  ;;  %p4066_p4 = scmp.lt.s32.totalorder %s4064_s30, %s4060_s29 }
 0x420   :  { %v3036_v42 = vadd.f32 %v3035_v9, %v2974_v54  ;;  %v3143_v54 = vsub.s32 %v3140_v39, %v6447_v40  ;;  %v3175_v37 = vadd.s32 4294967176, %v6446_v13  ;;  %vm3173_vm1 = vcmask 982912  }
 0x421   :  { %v3157_v61 = vsub.s32 %v3154_v28, %v6447_v40  ;;  %vm3180_vm2 = vcmask 1048512   ;;  %p4067_p5 = por %p4066_p4, %p4065_p3 }
 0x422   :  { %3037 = vadd.xlane.f32.xlu1 %v3036_v42  ;;  %v3178_v53 = vsub.s32 %v3175_v37, %v6447_v40 }
 0x423   :  { %p4068_p6 = pnand %p4067_p5, %p4061_p2 }
 0x439   :  { %v2978_v8 = vpop.xlane.xlu0 %2977 }
 0x43a   :  { %v3041_v35 = vadd.f32 %v6273_v44, %v2978_v8 }
 0x43c   :  { %v3076_v32 = vrot.slane %v3041_v35, %v3075_v23 }
 0x447   :  { %v2982_v43 = vpop.xlane.xlu1 %2981 }
 0x448   :  { %v3042_v24 = vadd.f32 %v6273_v44, %v2982_v43  ;;  %v3150_v43 = vsub.s32 %v3147_v51, %v6447_v40 }
 0x44a   :  { %v3081_v56 = vrot.slane %v3042_v24, %v3080_v15 }
 0x44c   :  { %v3083_v3 = vsel %vm3082_vm4, %v3081_v56, %v3076_v32 }
 0x452   :  { %v2986_v11 = vpop.xlane.xlu0 %2985 }
 0x453   :  { %v3043_v26 = vadd.f32 %v6273_v44, %v2986_v11 }
 0x455   :  { %v3088_v45 = vrot.slane %v3043_v26, %v3087_v14  ;;  %v3168_v14 = vadd.s32 4294967184, %v6446_v13 }
 0x457   :  { %v3090_v25 = vsel %vm3089_vm5, %v3088_v45, %v3083_v3 }
 0x45a   :  { %v2990_v47 = vpop.xlane.xlu1 %2989 }
 0x45b   :  { %v3044_v58 = vadd.f32 %v6273_v44, %v2990_v47  ;;  %v3161_v47 = vadd.s32 4294967192, %v6446_v13 }
 0x45d   :  { %v3095_v63 = vrot.slane %v3044_v58, %v3094_v7  ;;  %v3164_v23 = vsub.s32 %v3161_v47, %v6447_v40 }
 0x45f   :  { %v3097_v52 = vsel %vm3096_vm6, %v3095_v63, %v3090_v25 }
 0x462   :  { %v2994_v29 = vpop.xlane.xlu0 %2993 }
 0x463   :  { %v3045_v20 = vadd.f32 %v6273_v44, %v2994_v29 }
 0x465   :  { %v3102_v1 = vrot.slane %v3045_v20, %v3101_v41  ;;  %v3171_v20 = vsub.s32 %v3168_v14, %v6447_v40 }
 0x467   :  { %v2998_v50 = vpop.xlane.xlu1 %2997  ;;  %v3104_v10 = vsel %vm3103_vm7, %v3102_v1, %v3097_v52 }
 0x468   :  { %v3046_v6 = vadd.f32 %v6273_v44, %v2998_v50 }
 0x46a   :  { %v3109_v31 = vrot.slane %v3046_v6, %v3108_v46 }
 0x46c   :  { %v3111_v17 = vsel %vm3110_vm8, %v3109_v31, %v3104_v10 }
 0x46e   :  { %v3002_v19 = vpop.xlane.xlu0 %3001 }
 0x46f   :  { %v3047_v30 = vadd.f32 %v6273_v44, %v3002_v19 }
 0x471   :  { %v3116_v48 = vrot.slane %v3047_v30, %v3115_v18 }
 0x473   :  { %v3118_v27 = vsel %vm3117_vm9, %v3116_v48, %v3111_v17 }
 0x476   :  { %v3006_v38 = vpop.xlane.xlu1 %3005 }
 0x477   :  { %v3048_v57 = vadd.f32 %v6273_v44, %v3006_v38 }
 0x479   :  { %v3123_v2 = vrot.slane %v3048_v57, %v3122_v36 }
 0x47b   :  { %v3125_v11 = vsel %vm3124_vm10, %v3123_v2, %v3118_v27 }
 0x47d   :  { %v3010_v60 = vpop.xlane.xlu0 %3009 }
 0x47e   :  { %v3049_v0 = vadd.f32 %v6273_v44, %v3010_v60 }
 0x480   :  { %v3130_v4 = vrot.slane %v3049_v0, %v3129_v34 }
 0x482   :  { %v3132_v33 = vsel %vm3131_vm11, %v3130_v4, %v3125_v11 }
 0x485   :  { %v3014_v21 = vpop.xlane.xlu1 %3013 }
 0x486   :  { %v3050_v62 = vadd.f32 %v6273_v44, %v3014_v21 }
 0x488   :  { %v3137_v5 = vrot.slane %v3050_v62, %v3136_v55 }
 0x48a   :  { %v3139_v26 = vsel %vm3138_vm12, %v3137_v5, %v3132_v33 }
 0x48c   :  { %v3018_v22 = vpop.xlane.xlu0 %3017 }
 0x48d   :  { %v3051_v9 = vadd.f32 %v6273_v44, %v3018_v22 }
 0x48f   :  { %v3144_v15 = vrot.slane %v3051_v9, %v3143_v54 }
 0x491   :  { %v3146_v58 = vsel %vm3145_vm13, %v3144_v15, %v3139_v26 }
 0x493   :  { %v3022_v42 = vpop.xlane.xlu1 %3021 }
 0x494   :  { %v3052_v16 = vadd.f32 %v6273_v44, %v3022_v42 }
 0x496   :  { %v3151_v59 = vrot.slane %v3052_v16, %v3150_v43 }
 0x498   :  { %v3153_v56 = vsel %vm3152_vm14, %v3151_v59, %v3146_v58 }
 0x49a   :  { %v3026_v8 = vpop.xlane.xlu0 %3025 }
 0x49b   :  { %v3053_v24 = vadd.f32 %v6273_v44, %v3026_v8 }
 0x49d   :  { %v3158_v41 = vrot.slane %v3053_v24, %v3157_v61 }
 0x49f   :  { %v3160_v45 = vsel %vm3159_vm15, %v3158_v41, %v3153_v56 }
 0x4a1   :  { %v3030_v29 = vpop.xlane.xlu1 %3029 }
 0x4a2   :  { %v3054_v35 = vadd.f32 %v6273_v44, %v3030_v29 }
 0x4a4   :  { %v3165_v19 = vrot.slane %v3054_v35, %v3164_v23 }
 0x4a6   :  { %v3167_v63 = vsel %vm3166_vm0, %v3165_v19, %v3160_v45 }
 0x4a9   :  { %v3034_v7 = vpop.xlane.xlu0 %3033 }
 0x4aa   :  { %v3055_v50 = vadd.f32 %v6273_v44, %v3034_v7 }
 0x4ac   :  { %v3172_v46 = vrot.slane %v3055_v50, %v3171_v20 }
 0x4ae   :  { %v3174_v12 = vsel %vm3173_vm1, %v3172_v46, %v3167_v63 }
 0x4af   :  { %v3038_v32 = vpop.xlane.xlu1 %3037 }
 0x4b0   :  { %v3056_v6 = vadd.f32 %v6273_v44, %v3038_v32 }
 0x4b2   :  { %v3179_v1 = vrot.slane %v3056_v6, %v3178_v53 }
 0x4b4   :  { %v3181_v18 = vsel %vm3180_vm2, %v3179_v1, %v3174_v12 }
 0x4b5   :  { %3183 = vst [vmem:[#allocation8] sm:$0x1] %v3181_v18 }
 0x4b6   :  { %4071 = shalt.err (!%p4068_p6)
}
 0x4b7   :  { %s4072_s15 = scalar_lea.hbm %s6349_s13, 16 }
 0x4b8   :  { %p4073_p7 = scmp.ne.s32.totalorder %s6349_s13, %s4072_s15  ;;  %p4076_p8 = scmp.lt.u32.totalorder %s4072_s15, %s6349_s13 }
 0x4ba   :  { %p4078_p9 = pnand %p4076_p8, %p4073_p7 }
 0x4bc   :  { %4081 = shalt.err (!%p4078_p9)
}
 0x4bd   :  { %3193 = dma.vmem_to_hbm [thread:$0]  %s3191_s28, 16, %s6349_s13, [#allocation5]  }
 0x4be   :  { %4086 = dma.done.wait [#allocation5], 16  }
 0x4bf   :  { %4087 = vsyncadd [#allocation5], 4294967280 }
 0x4c0   :  { %3197 = vsyncpa [#allocation4], 1 }
 0x4c1   :  { %3198 = vsyncpa [#allocation7], 1 }
 0x4c2   :  { %3199 = vsyncpa [#allocation5], 1 }

</bundles_post_ra>
